<compile_context>
chip_gen: v5e
topology: v5e:2x2
jax: 0.10.0
libtpu: 0.0.40
codegen_flags: <defaults>
</compile_context>

<pallas_src>
import functools

import jax
import jax.numpy as jnp
from jax import lax
from jax.experimental import pallas as pl
from jax.experimental.pallas import tpu as pltpu


def _dit_conv_kernel(
    x_ref, mrow_ref, mcol_ref, mods_ref,
    wqkv_ref, bqkv_ref, wo_ref, bo_ref,
    c1w_ref, c1b_ref, c2w_ref, c2b_ref,
    o_ref, oh_sc,
    *, batch_block, num_heads, eps, approx_recip,
):
    T = x_ref.shape[1]
    C = x_ref.shape[2]
    Dh = C // num_heads
    f32 = jnp.float32
    bf16 = jnp.bfloat16

    # k=3 conv boundary masks (depend only on T; shared across the batch block).
    ridx = lax.broadcasted_iota(jnp.int32, (T, 1), 0)
    keep_first = (ridx > 0).astype(f32)        # zero wrapped row 0   (tap t-1)
    keep_last = (ridx < T - 1).astype(f32)     # zero wrapped row T-1 (tap t+1)

    def conv3(a, w_ref, b_ref):
        # taps via sublane roll (XLU) + ONE fused K=3*width MXU matmul.
        a_m1 = pltpu.roll(a, shift=1, axis=0) * keep_first      # row t -> a[t-1]
        a_p1 = pltpu.roll(a, shift=T - 1, axis=0) * keep_last   # row t -> a[t+1]
        a_cat = jnp.concatenate(
            [a_m1.astype(bf16), a.astype(bf16), a_p1.astype(bf16)], axis=-1)
        return jnp.dot(a_cat, w_ref[...], preferred_element_type=f32) + b_ref[...]

    # Static loop over the samples of this grid step (batch_block is small/static).
    for bb in range(batch_block):
        x = x_ref[bb]             # [T, C]  f32
        m = mrow_ref[bb]          # [T, 1]  time mask (column vector)
        mc = mcol_ref[bb]         # [1, T]  time mask (row vector)
        mods = mods_ref[bb]       # [6, C]  precomputed adaLN modulation

        shift_msa = mods[0:1, :]
        scale_msa = mods[1:2, :]
        gate_msa = mods[2:3, :]
        shift_mlp = mods[3:4, :]
        scale_mlp = mods[4:5, :]
        gate_mlp = mods[5:6, :]

        # apply_mask(x, x_mask)
        xm = x * m

        # LayerNorm over channels (no affine); norm1 == norm2 on same input.
        mu = jnp.mean(xm, axis=-1, keepdims=True)
        var = jnp.mean(jnp.square(xm - mu), axis=-1, keepdims=True)
        z = (xm - mu) * lax.rsqrt(var + eps)                     # [T, C] f32

        # ---------------- attention branch ----------------
        # fused QKV: one [T,C]x[C,3C] bf16 matmul; 1/sqrt(Dh) is pre-folded into
        # the Q weights/bias in prepare_params.
        s = (z * (1.0 + scale_msa) + shift_msa).astype(bf16)
        qkv = jnp.dot(s, wqkv_ref[...], preferred_element_type=f32) + bqkv_ref[...]
        q = qkv[:, 0:C].astype(bf16)
        kT = jnp.transpose(qkv[:, C:2 * C]).astype(bf16)         # [C, T]: ONE transpose
        v = qkv[:, 2 * C:3 * C].astype(bf16)

        # additive attention bias: 0 where valid, -1e9 where padded (no select).
        bias = (m * mc - 1.0) * 1e9                              # [T, T] f32

        # NOTE: at production H/T switch to lax.fori_loop + flash-style q-tiling;
        # the static unroll keeps all slices static at demo sizes.
        for hd in range(num_heads):
            lo = hd * Dh
            qh = q[:, lo:lo + Dh]                                # lane slice
            kTh = kT[lo:lo + Dh, :]                              # sublane slice (8-aligned)
            vh = v[:, lo:lo + Dh]
            sc = jnp.dot(qh, kTh, preferred_element_type=f32) + bias
            sc = sc - jnp.max(sc, axis=-1, keepdims=True)
            p = jnp.exp(sc)
            denom = jnp.sum(p, axis=-1, keepdims=True)
            if approx_recip:
                p = p * pl.reciprocal(denom, approx=True)
            else:
                p = p / denom
            # write this head's PV into its lane slice of the bf16 scratch.
            oh_sc[:, lo:lo + Dh] = jnp.dot(
                p.astype(bf16), vh, preferred_element_type=f32).astype(bf16)

        attn = (jnp.dot(oh_sc[...], wo_ref[...], preferred_element_type=f32)
                + bo_ref[...])
        # Fully-masked query rows give uniform softmax; the trailing *m re-zeroes them.
        x1 = xm + (gate_msa * attn) * m

        # ---------------- conv-FFN branch (kernel_size=3, padding=1) ----------------
        u = (z * (1.0 + scale_mlp) + shift_mlp) * m              # FFNConv masks its input
        # TODO(synk): dropout (p_dropout=0.1) is an eval-mode no-op and is not implemented.
        y1 = jnp.maximum(conv3(u, c1w_ref, c1b_ref), 0.0) * m    # ReLU + mask
        y2 = conv3(y1, c2w_ref, c2b_ref) * m                     # FFNConv masks its output

        o_ref[bb] = (x1 + gate_mlp * y2).astype(o_ref.dtype)


def prepare_params(params, *, num_heads):
    """One-time weight fusion / casting — hoisted out of the per-call path."""
    f32, bf16 = jnp.float32, jnp.bfloat16
    C = params["wq"].shape[0]
    F = params["conv1_w"].shape[-1]
    Dh = C // num_heads
    inv_sqrt_d = 1.0 / (float(Dh) ** 0.5)
    return {
        # adaLN MLP stays f32 (tiny, computed outside the kernel).
        "ada_w1": params["ada_w1"].astype(f32),
        "ada_b1": params["ada_b1"].astype(f32),
        "ada_w2": params["ada_w2"].astype(f32),
        "ada_b2": params["ada_b2"].astype(f32),
        # fused QKV with 1/sqrt(Dh) folded into Q weights and bias.
        "wqkv": jnp.concatenate(
            [params["wq"] * inv_sqrt_d, params["wk"], params["wv"]],
            axis=1).astype(bf16),                                   # [C, 3C]
        "bqkv": jnp.concatenate(
            [params["bq"] * inv_sqrt_d, params["bk"], params["bv"]]
        )[None, :].astype(f32),                                     # [1, 3C]
        "wo": params["wo"].astype(bf16),                            # [C, C]
        "bo": params["bo"][None, :].astype(f32),                    # [1, C]
        # conv taps pre-flattened for the single fused matmul per conv.
        "c1w": params["conv1_w"].reshape(3 * C, F).astype(bf16),    # [3C, F]
        "c1b": params["conv1_b"][None, :].astype(f32),              # [1, F]
        "c2w": params["conv2_w"].reshape(3 * F, C).astype(bf16),    # [3F, C]
        "c2b": params["conv2_b"][None, :].astype(f32),              # [1, C]
    }


def dit_conv_forward(x, x_mask, c, prep, *, num_heads=4, eps=1e-5,
                     batch_block=None, approx_softmax_recip=True):
    """x:[B,T,C] f32, x_mask:[B,T] {0,1}, c:[B,cond] f32 -> [B,T,C] f32."""
    B, T, C = x.shape
    f32 = jnp.float32

    # Whole batch in one grid step by default (per-step pipeline overhead ~0.35us
    # dominates at small shapes).  On v7x (2 TensorCores) pass
    # batch_block=ceil(B/2) so the "parallel" axis keeps both cores busy.
    if batch_block is None:
        batch_block = B
    assert B % batch_block == 0, "batch must be divisible by batch_block"
    nb = B // batch_block

    # ---- adaLN modulation hoisted out of the kernel (depends only on c) ----
    h = c.astype(f32) @ prep["ada_w1"] + prep["ada_b1"]
    h = h * jax.nn.sigmoid(h)                                    # SiLU
    mods = (h @ prep["ada_w2"] + prep["ada_b2"]).reshape(B, 6, C).astype(f32)

    mrow = x_mask.astype(f32)[:, :, None]      # [B, T, 1]
    mcol = x_mask.astype(f32)[:, None, :]      # [B, 1, T]

    weights = (prep["wqkv"], prep["bqkv"], prep["wo"], prep["bo"],
               prep["c1w"], prep["c1b"], prep["c2w"], prep["c2b"])

    def rep(shape):
        # constant index_map -> fetched once; single-buffer to halve weight VMEM.
        zeros = (0,) * len(shape)
        return pl.BlockSpec(shape, lambda i, _z=zeros: _z,
                            pipeline_mode=pl.Buffered(1))

    in_specs = [
        pl.BlockSpec((batch_block, T, C), lambda i: (i, 0, 0)),
        pl.BlockSpec((batch_block, T, 1), lambda i: (i, 0, 0)),
        pl.BlockSpec((batch_block, 1, T), lambda i: (i, 0, 0)),
        pl.BlockSpec((batch_block, 6, C), lambda i: (i, 0, 0)),
    ] + [rep(w.shape) for w in weights]

    scratch_shapes = [pltpu.VMEM((T, C), jnp.bfloat16)]          # per-head PV slab

    # VMEM budget derived from actual resident blocks (+headroom), capped at
    # ~80% of physical VMEM (v7x: 64 MiB per TC; v5e/v6e: 128 MiB).
    def nbytes(shape, dtype):
        sz = 1
        for d in shape:
            sz *= d
        return sz * jnp.dtype(dtype).itemsize

    resident = (
        2 * (nbytes((batch_block, T, C), x.dtype)                # x (double-buffered)
             + nbytes((batch_block, T, 1), f32)
             + nbytes((batch_block, 1, T), f32)
             + nbytes((batch_block, 6, C), f32)
             + nbytes((batch_block, T, C), x.dtype))             # output
        + sum(int(w.size) * w.dtype.itemsize for w in weights)   # single-buffered
        + nbytes((T, C), jnp.bfloat16)
    )
    try:
        phys = int(pltpu.get_tpu_info().vmem_capacity_bytes)
    except Exception:
        phys = 64 * 1024 * 1024                                  # conservative (v7x)
    vmem_limit = max(32 * 1024 * 1024,
                     min(int(resident * 1.5) + (8 << 20), int(phys * 0.8)))

    kernel = functools.partial(
        _dit_conv_kernel, batch_block=batch_block, num_heads=num_heads,
        eps=eps, approx_recip=approx_softmax_recip)

    # NOTE: for production widths (C~1024, F~4C, long T) add a flash-style
    # q-tile grid axis for attention and an F-reduction grid axis for the conv
    # weights instead of keeping everything whole-[T,C]/whole-weight resident.
    return pl.pallas_call(
        kernel,
        out_shape=jax.ShapeDtypeStruct((B, T, C), x.dtype),
        grid_spec=pltpu.PrefetchScalarGridSpec(
            num_scalar_prefetch=0,
            grid=(nb,),
            in_specs=in_specs,
            out_specs=pl.BlockSpec((batch_block, T, C), lambda i: (i, 0, 0)),
            scratch_shapes=scratch_shapes,
        ),
        compiler_params=pltpu.CompilerParams(
            dimension_semantics=("parallel",),
            vmem_limit_bytes=vmem_limit,
        ),
    )(x, mrow, mcol, mods, *weights)


# ----------------------------- pure-JAX reference -----------------------------
def dit_conv_ref(x, x_mask, c, p, *, num_heads=4, eps=1e-5):
    B, T, C = x.shape
    H = num_heads
    Dh = C // H
    m = x_mask[:, :, None].astype(x.dtype)
    xm = x * m

    h = c @ p["ada_w1"] + p["ada_b1"]
    h = h * jax.nn.sigmoid(h)
    mods = (h @ p["ada_w2"] + p["ada_b2"]).reshape(B, 6, C)
    shift_msa, scale_msa, gate_msa, shift_mlp, scale_mlp, gate_mlp = [
        mods[:, i, None, :] for i in range(6)]

    mu = xm.mean(-1, keepdims=True)
    var = ((xm - mu) ** 2).mean(-1, keepdims=True)
    z = (xm - mu) / jnp.sqrt(var + eps)

    s = z * (1 + scale_msa) + shift_msa
    qh = (s @ p["wq"] + p["bq"]).reshape(B, T, H, Dh)
    kh = (s @ p["wk"] + p["bk"]).reshape(B, T, H, Dh)
    vh = (s @ p["wv"] + p["bv"]).reshape(B, T, H, Dh)
    sc = jnp.einsum("bqhd,bkhd->bhqk", qh, kh) / jnp.sqrt(jnp.float32(Dh))
    amask = (x_mask[:, None, :, None] * x_mask[:, None, None, :]) > 0
    sc = jnp.where(amask, sc, -1e9)
    pa = jax.nn.softmax(sc, axis=-1)
    oh = jnp.einsum("bhqk,bkhd->bqhd", pa, vh).reshape(B, T, C)
    attn = oh @ p["wo"] + p["bo"]
    x1 = xm + (gate_msa * attn) * m

    u = (z * (1 + scale_mlp) + shift_mlp) * m

    def conv3(hin, w, b):
        hp = jnp.pad(hin, ((0, 0), (1, 1), (0, 0)))
        return hp[:, :-2] @ w[0] + hp[:, 1:-1] @ w[1] + hp[:, 2:] @ w[2] + b

    y1 = jnp.maximum(conv3(u, p["conv1_w"], p["conv1_b"]), 0.0) * m
    y2 = conv3(y1, p["conv2_w"], p["conv2_b"]) * m
    return x1 + gate_mlp * y2


def init_params(key, C, cond, F, H):
    keys = jax.random.split(key, 16)

    def w(k, shape, fan_in, scale=1.0):
        return (scale * jax.random.normal(k, shape, jnp.float32)
                / jnp.sqrt(jnp.float32(fan_in)))

    return {
        "ada_w1": w(keys[0], (cond, C), cond),
        "ada_b1": w(keys[1], (C,), C, 0.1),
        # adaLN-Zero layer: nonzero deterministic init (see header note).
        "ada_w2": w(keys[2], (C, 6 * C), C, 0.1),
        "ada_b2": w(keys[3], (6 * C,), C, 0.1),
        "wq": w(keys[4], (C, C), C), "bq": w(keys[5], (C,), C, 0.1),
        "wk": w(keys[6], (C, C), C), "bk": w(keys[7], (C,), C, 0.1),
        "wv": w(keys[8], (C, C), C), "bv": w(keys[9], (C,), C, 0.1),
        "wo": w(keys[10], (C, C), C), "bo": w(keys[11], (C,), C, 0.1),
        "conv1_w": w(keys[12], (3, C, F), 3 * C), "conv1_b": w(keys[13], (F,), F, 0.1),
        "conv2_w": w(keys[14], (3, F, C), 3 * F), "conv2_b": w(keys[15], (C,), C, 0.1),
    }


if __name__ == "__main__":
    B, T, C = 2, 16, 128         # batch, time, content_dim (lane-dense: C % 128 == 0)
    COND, F, H = 64, 256, 4      # conditional_dim, filter_channels, num_heads

    key = jax.random.PRNGKey(0)
    kx, kc, kp = jax.random.split(key, 3)
    x = jax.random.normal(kx, (B, T, C), jnp.float32)
    c = jax.random.normal(kc, (B, COND), jnp.float32)
    lengths = jnp.array([T, 11])
    x_mask = (jnp.arange(T)[None, :] < lengths[:, None]).astype(jnp.float32)
    params = init_params(kp, C, COND, F, H)

    # One-time weight preparation (fusion / bf16 casts) hoisted out of forward.
    prep = prepare_params(params, num_heads=H)

    out = jax.block_until_ready(dit_conv_forward(x, x_mask, c, prep, num_heads=H))
    ref = dit_conv_ref(x, x_mask, c, params, num_heads=H)

    assert out.shape == x.shape and out.dtype == x.dtype
    max_err = float(jnp.max(jnp.abs(out - ref)))
    if max_err > 5e-2:   # kernel runs bf16 MXU operands + approx recip vs f32 reference
        raise AssertionError(f"kernel/reference mismatch: max abs err = {max_err}")
    print("KERNEL_OK")
</pallas_src>

<mosaic_0001>
module attributes {stable_mosaic.version = 11 : i64} {
  func.func @_dit_conv_kernel(%arg0: i32, %arg1: memref<2x16x128xf32, #tpu.memory_space<vmem>>, %arg2: memref<2x16x1xf32, #tpu.memory_space<vmem>>, %arg3: memref<2x1x16xf32, #tpu.memory_space<vmem>>, %arg4: memref<2x6x128xf32, #tpu.memory_space<vmem>>, %arg5: memref<128x384xbf16, #tpu.memory_space<vmem>>, %arg6: memref<1x384xf32, #tpu.memory_space<vmem>>, %arg7: memref<128x128xbf16, #tpu.memory_space<vmem>>, %arg8: memref<1x128xf32, #tpu.memory_space<vmem>>, %arg9: memref<384x256xbf16, #tpu.memory_space<vmem>>, %arg10: memref<1x256xf32, #tpu.memory_space<vmem>>, %arg11: memref<768x128xbf16, #tpu.memory_space<vmem>>, %arg12: memref<1x128xf32, #tpu.memory_space<vmem>>, %arg13: memref<2x16x128xf32, #tpu.memory_space<vmem>>, %arg14: memref<16x128xbf16, #tpu.memory_space<vmem>>) attributes {dimension_semantics = [#tpu.dimension_semantics<parallel>], iteration_bounds = array<i64: 1>, scalar_prefetch = 0 : i64, scratch_operands = 1 : i64, tpu.core_type = #tpu.core_type<tc>, window_params = [{transform_indices = @transform_0, window_bounds = array<i64: 2, 16, 128>}, {transform_indices = @transform_1, window_bounds = array<i64: 2, 16, 1>}, {transform_indices = @transform_2, window_bounds = array<i64: 2, 1, 16>}, {transform_indices = @transform_3, window_bounds = array<i64: 2, 6, 128>}, {pipeline_mode = #tpu.pipeline_mode<synchronous>, transform_indices = @transform_4, window_bounds = array<i64: 128, 384>}, {pipeline_mode = #tpu.pipeline_mode<synchronous>, transform_indices = @transform_5, window_bounds = array<i64: 1, 384>}, {pipeline_mode = #tpu.pipeline_mode<synchronous>, transform_indices = @transform_6, window_bounds = array<i64: 128, 128>}, {pipeline_mode = #tpu.pipeline_mode<synchronous>, transform_indices = @transform_7, window_bounds = array<i64: 1, 128>}, {pipeline_mode = #tpu.pipeline_mode<synchronous>, transform_indices = @transform_8, window_bounds = array<i64: 384, 256>}, {pipeline_mode = #tpu.pipeline_mode<synchronous>, transform_indices = @transform_9, window_bounds = array<i64: 1, 256>}, {pipeline_mode = #tpu.pipeline_mode<synchronous>, transform_indices = @transform_10, window_bounds = array<i64: 768, 128>}, {pipeline_mode = #tpu.pipeline_mode<synchronous>, transform_indices = @transform_11, window_bounds = array<i64: 1, 128>}, {transform_indices = @transform_12, window_bounds = array<i64: 2, 16, 128>}]} {
    %0 = tpu.iota {dimensions = array<i32: 0>} : vector<16x1xi32>
    %c0_i32 = arith.constant 0 : i32
    %1 = vector.broadcast %c0_i32 : i32 to vector<16x1xi32>
    %2 = arith.cmpi sgt, %0, %1 : vector<16x1xi32>
    %3 = arith.extui %2 : vector<16x1xi1> to vector<16x1xi32>
    %4 = arith.sitofp %3 : vector<16x1xi32> to vector<16x1xf32>
    %c15_i32 = arith.constant 15 : i32
    %5 = vector.broadcast %c15_i32 : i32 to vector<16x1xi32>
    %6 = arith.cmpi slt, %0, %5 : vector<16x1xi32>
    %7 = arith.extui %6 : vector<16x1xi1> to vector<16x1xi32>
    %8 = arith.sitofp %7 : vector<16x1xi32> to vector<16x1xf32>
    %c0 = arith.constant 0 : index
    %c0_0 = arith.constant 0 : index
    %c0_1 = arith.constant 0 : index
    %9 = vector.load %arg1[%c0, %c0_0, %c0_1] : memref<2x16x128xf32, #tpu.memory_space<vmem>>, vector<1x16x128xf32>
    %10 = vector.shape_cast %9 : vector<1x16x128xf32> to vector<16x128xf32>
    %c0_2 = arith.constant 0 : index
    %c0_3 = arith.constant 0 : index
    %c0_4 = arith.constant 0 : index
    %11 = vector.load %arg2[%c0_2, %c0_3, %c0_4] : memref<2x16x1xf32, #tpu.memory_space<vmem>>, vector<1x16x1xf32>
    %12 = vector.shape_cast %11 : vector<1x16x1xf32> to vector<16x1xf32>
    %c0_5 = arith.constant 0 : index
    %c0_6 = arith.constant 0 : index
    %c0_7 = arith.constant 0 : index
    %13 = vector.load %arg3[%c0_5, %c0_6, %c0_7] : memref<2x1x16xf32, #tpu.memory_space<vmem>>, vector<1x1x16xf32>
    %14 = vector.shape_cast %13 : vector<1x1x16xf32> to vector<1x16xf32>
    %c0_8 = arith.constant 0 : index
    %c0_9 = arith.constant 0 : index
    %c0_10 = arith.constant 0 : index
    %15 = vector.load %arg4[%c0_8, %c0_9, %c0_10] : memref<2x6x128xf32, #tpu.memory_space<vmem>>, vector<1x6x128xf32>
    %16 = vector.shape_cast %15 : vector<1x6x128xf32> to vector<6x128xf32>
    %17 = vector.extract_strided_slice %16 {offsets = [0, 0], sizes = [1, 128], strides = [1, 1]} : vector<6x128xf32> to vector<1x128xf32>
    %18 = vector.extract_strided_slice %16 {offsets = [1, 0], sizes = [1, 128], strides = [1, 1]} : vector<6x128xf32> to vector<1x128xf32>
    %19 = vector.extract_strided_slice %16 {offsets = [2, 0], sizes = [1, 128], strides = [1, 1]} : vector<6x128xf32> to vector<1x128xf32>
    %20 = vector.extract_strided_slice %16 {offsets = [3, 0], sizes = [1, 128], strides = [1, 1]} : vector<6x128xf32> to vector<1x128xf32>
    %21 = vector.extract_strided_slice %16 {offsets = [4, 0], sizes = [1, 128], strides = [1, 1]} : vector<6x128xf32> to vector<1x128xf32>
    %22 = vector.extract_strided_slice %16 {offsets = [5, 0], sizes = [1, 128], strides = [1, 1]} : vector<6x128xf32> to vector<1x128xf32>
    %23 = vector.broadcast %12 : vector<16x1xf32> to vector<16x128xf32>
    %24 = arith.mulf %10, %23 : vector<16x128xf32>
    %cst = arith.constant dense<0.000000e+00> : vector<16xf32>
    %25 = vector.multi_reduction <add>, %24, %cst [1] : vector<16x128xf32> to vector<16xf32>
    %26 = vector.shape_cast %25 : vector<16xf32> to vector<16x1xf32>
    %cst_11 = arith.constant 1.280000e+02 : f32
    %27 = vector.broadcast %cst_11 : f32 to vector<16x1xf32>
    %28 = arith.divf %26, %27 : vector<16x1xf32>
    %29 = vector.broadcast %28 : vector<16x1xf32> to vector<16x128xf32>
    %30 = arith.subf %24, %29 : vector<16x128xf32>
    %31 = arith.mulf %30, %30 : vector<16x128xf32>
    %cst_12 = arith.constant dense<0.000000e+00> : vector<16xf32>
    %32 = vector.multi_reduction <add>, %31, %cst_12 [1] : vector<16x128xf32> to vector<16xf32>
    %33 = vector.shape_cast %32 : vector<16xf32> to vector<16x1xf32>
    %cst_13 = arith.constant 1.280000e+02 : f32
    %34 = vector.broadcast %cst_13 : f32 to vector<16x1xf32>
    %35 = arith.divf %33, %34 : vector<16x1xf32>
    %36 = vector.broadcast %28 : vector<16x1xf32> to vector<16x128xf32>
    %37 = arith.subf %24, %36 : vector<16x128xf32>
    %cst_14 = arith.constant 9.99999974E-6 : f32
    %38 = vector.broadcast %cst_14 : f32 to vector<16x1xf32>
    %39 = arith.addf %35, %38 : vector<16x1xf32>
    %40 = math.rsqrt %39 : vector<16x1xf32>
    %41 = vector.broadcast %40 : vector<16x1xf32> to vector<16x128xf32>
    %42 = arith.mulf %37, %41 : vector<16x128xf32>
    %cst_15 = arith.constant 1.000000e+00 : f32
    %43 = vector.broadcast %cst_15 : f32 to vector<1x128xf32>
    %44 = arith.addf %43, %18 : vector<1x128xf32>
    %45 = vector.broadcast %44 : vector<1x128xf32> to vector<16x128xf32>
    %46 = arith.mulf %42, %45 : vector<16x128xf32>
    %47 = vector.broadcast %17 : vector<1x128xf32> to vector<16x128xf32>
    %48 = arith.addf %46, %47 : vector<16x128xf32>
    %49 = arith.truncf %48 : vector<16x128xf32> to vector<16x128xbf16>
    %c0_16 = arith.constant 0 : index
    %c0_17 = arith.constant 0 : index
    %50 = vector.load %arg5[%c0_16, %c0_17] : memref<128x384xbf16, #tpu.memory_space<vmem>>, vector<128x384xbf16>
    %cst_18 = arith.constant dense<0.000000e+00> : vector<16x384xf32>
    %51 = tpu.matmul %49, %50, %cst_18 {dimension_numbers = #tpu.dot_dimension_numbers<[1], [0], [0], [1], [0, 0, 1, 1], [], []>} : vector<16x128xbf16>, vector<128x384xbf16>, vector<16x384xf32> -> vector<16x384xf32>
    %c0_19 = arith.constant 0 : index
    %c0_20 = arith.constant 0 : index
    %52 = vector.load %arg6[%c0_19, %c0_20] : memref<1x384xf32, #tpu.memory_space<vmem>>, vector<1x384xf32>
    %53 = vector.broadcast %52 : vector<1x384xf32> to vector<16x384xf32>
    %54 = arith.addf %51, %53 : vector<16x384xf32>
    %55 = vector.extract_strided_slice %54 {offsets = [0, 0], sizes = [16, 128], strides = [1, 1]} : vector<16x384xf32> to vector<16x128xf32>
    %56 = arith.truncf %55 : vector<16x128xf32> to vector<16x128xbf16>
    %57 = vector.extract_strided_slice %54 {offsets = [0, 128], sizes = [16, 128], strides = [1, 1]} : vector<16x384xf32> to vector<16x128xf32>
    %58 = tpu.transpose %57, [1, 0] : vector<16x128xf32> -> vector<128x16xf32>
    %59 = arith.truncf %58 : vector<128x16xf32> to vector<128x16xbf16>
    %60 = vector.extract_strided_slice %54 {offsets = [0, 256], sizes = [16, 128], strides = [1, 1]} : vector<16x384xf32> to vector<16x128xf32>
    %61 = arith.truncf %60 : vector<16x128xf32> to vector<16x128xbf16>
    %62 = vector.broadcast %12 : vector<16x1xf32> to vector<16x16xf32>
    %63 = vector.broadcast %14 : vector<1x16xf32> to vector<16x16xf32>
    %64 = arith.mulf %62, %63 : vector<16x16xf32>
    %cst_21 = arith.constant 1.000000e+00 : f32
    %65 = vector.broadcast %cst_21 : f32 to vector<16x16xf32>
    %66 = arith.subf %64, %65 : vector<16x16xf32>
    %cst_22 = arith.constant 1.000000e+09 : f32
    %67 = vector.broadcast %cst_22 : f32 to vector<16x16xf32>
    %68 = arith.mulf %66, %67 : vector<16x16xf32>
    %69 = vector.extract_strided_slice %56 {offsets = [0, 0], sizes = [16, 32], strides = [1, 1]} : vector<16x128xbf16> to vector<16x32xbf16>
    %70 = vector.extract_strided_slice %59 {offsets = [0, 0], sizes = [32, 16], strides = [1, 1]} : vector<128x16xbf16> to vector<32x16xbf16>
    %71 = vector.extract_strided_slice %61 {offsets = [0, 0], sizes = [16, 32], strides = [1, 1]} : vector<16x128xbf16> to vector<16x32xbf16>
    %cst_23 = arith.constant dense<0.000000e+00> : vector<16x16xf32>
    %72 = tpu.matmul %69, %70, %cst_23 {dimension_numbers = #tpu.dot_dimension_numbers<[1], [0], [0], [1], [0, 0, 1, 1], [], []>} : vector<16x32xbf16>, vector<32x16xbf16>, vector<16x16xf32> -> vector<16x16xf32>
    %73 = arith.addf %72, %68 : vector<16x16xf32>
    %cst_24 = arith.constant dense<0xFF800000> : vector<16xf32>
    %74 = vector.multi_reduction <maximumf>, %73, %cst_24 [1] : vector<16x16xf32> to vector<16xf32>
    %75 = vector.shape_cast %74 : vector<16xf32> to vector<16x1xf32>
    %76 = vector.broadcast %75 : vector<16x1xf32> to vector<16x16xf32>
    %77 = arith.subf %73, %76 : vector<16x16xf32>
    %78 = math.exp %77 : vector<16x16xf32>
    %cst_25 = arith.constant dense<0.000000e+00> : vector<16xf32>
    %79 = vector.multi_reduction <add>, %78, %cst_25 [1] : vector<16x16xf32> to vector<16xf32>
    %80 = vector.shape_cast %79 : vector<16xf32> to vector<16x1xf32>
    %81 = tpu.reciprocal %80 {approx = true} : vector<16x1xf32> -> vector<16x1xf32>
    %82 = vector.broadcast %81 : vector<16x1xf32> to vector<16x16xf32>
    %83 = arith.mulf %78, %82 : vector<16x16xf32>
    %84 = arith.truncf %83 : vector<16x16xf32> to vector<16x16xbf16>
    %cst_26 = arith.constant dense<0.000000e+00> : vector<16x32xf32>
    %85 = tpu.matmul %84, %71, %cst_26 {dimension_numbers = #tpu.dot_dimension_numbers<[1], [0], [0], [1], [0, 0, 1, 1], [], []>} : vector<16x16xbf16>, vector<16x32xbf16>, vector<16x32xf32> -> vector<16x32xf32>
    %86 = arith.truncf %85 : vector<16x32xf32> to vector<16x32xbf16>
    %c0_27 = arith.constant 0 : index
    %c0_28 = arith.constant 0 : index
    %87 = vector.load %arg14[%c0_27, %c0_28] : memref<16x128xbf16, #tpu.memory_space<vmem>>, vector<16x32xbf16>
    tpu.vector_store %arg14[%c0_27, %c0_28], %86 {strides = array<i32>} : memref<16x128xbf16, #tpu.memory_space<vmem>>, vector<16x32xbf16>,
    %88 = vector.extract_strided_slice %56 {offsets = [0, 32], sizes = [16, 32], strides = [1, 1]} : vector<16x128xbf16> to vector<16x32xbf16>
    %89 = vector.extract_strided_slice %59 {offsets = [32, 0], sizes = [32, 16], strides = [1, 1]} : vector<128x16xbf16> to vector<32x16xbf16>
    %90 = vector.extract_strided_slice %61 {offsets = [0, 32], sizes = [16, 32], strides = [1, 1]} : vector<16x128xbf16> to vector<16x32xbf16>
    %cst_29 = arith.constant dense<0.000000e+00> : vector<16x16xf32>
    %91 = tpu.matmul %88, %89, %cst_29 {dimension_numbers = #tpu.dot_dimension_numbers<[1], [0], [0], [1], [0, 0, 1, 1], [], []>} : vector<16x32xbf16>, vector<32x16xbf16>, vector<16x16xf32> -> vector<16x16xf32>
    %92 = arith.addf %91, %68 : vector<16x16xf32>
    %cst_30 = arith.constant dense<0xFF800000> : vector<16xf32>
    %93 = vector.multi_reduction <maximumf>, %92, %cst_30 [1] : vector<16x16xf32> to vector<16xf32>
    %94 = vector.shape_cast %93 : vector<16xf32> to vector<16x1xf32>
    %95 = vector.broadcast %94 : vector<16x1xf32> to vector<16x16xf32>
    %96 = arith.subf %92, %95 : vector<16x16xf32>
    %97 = math.exp %96 : vector<16x16xf32>
    %cst_31 = arith.constant dense<0.000000e+00> : vector<16xf32>
    %98 = vector.multi_reduction <add>, %97, %cst_31 [1] : vector<16x16xf32> to vector<16xf32>
    %99 = vector.shape_cast %98 : vector<16xf32> to vector<16x1xf32>
    %100 = tpu.reciprocal %99 {approx = true} : vector<16x1xf32> -> vector<16x1xf32>
    %101 = vector.broadcast %100 : vector<16x1xf32> to vector<16x16xf32>
    %102 = arith.mulf %97, %101 : vector<16x16xf32>
    %103 = arith.truncf %102 : vector<16x16xf32> to vector<16x16xbf16>
    %cst_32 = arith.constant dense<0.000000e+00> : vector<16x32xf32>
    %104 = tpu.matmul %103, %90, %cst_32 {dimension_numbers = #tpu.dot_dimension_numbers<[1], [0], [0], [1], [0, 0, 1, 1], [], []>} : vector<16x16xbf16>, vector<16x32xbf16>, vector<16x32xf32> -> vector<16x32xf32>
    %105 = arith.truncf %104 : vector<16x32xf32> to vector<16x32xbf16>
    %c0_33 = arith.constant 0 : index
    %c32 = arith.constant 32 : index
    %106 = vector.load %arg14[%c0_33, %c32] : memref<16x128xbf16, #tpu.memory_space<vmem>>, vector<16x32xbf16>
    tpu.vector_store %arg14[%c0_33, %c32], %105 {strides = array<i32>} : memref<16x128xbf16, #tpu.memory_space<vmem>>, vector<16x32xbf16>,
    %107 = vector.extract_strided_slice %56 {offsets = [0, 64], sizes = [16, 32], strides = [1, 1]} : vector<16x128xbf16> to vector<16x32xbf16>
    %108 = vector.extract_strided_slice %59 {offsets = [64, 0], sizes = [32, 16], strides = [1, 1]} : vector<128x16xbf16> to vector<32x16xbf16>
    %109 = vector.extract_strided_slice %61 {offsets = [0, 64], sizes = [16, 32], strides = [1, 1]} : vector<16x128xbf16> to vector<16x32xbf16>
    %cst_34 = arith.constant dense<0.000000e+00> : vector<16x16xf32>
    %110 = tpu.matmul %107, %108, %cst_34 {dimension_numbers = #tpu.dot_dimension_numbers<[1], [0], [0], [1], [0, 0, 1, 1], [], []>} : vector<16x32xbf16>, vector<32x16xbf16>, vector<16x16xf32> -> vector<16x16xf32>
    %111 = arith.addf %110, %68 : vector<16x16xf32>
    %cst_35 = arith.constant dense<0xFF800000> : vector<16xf32>
    %112 = vector.multi_reduction <maximumf>, %111, %cst_35 [1] : vector<16x16xf32> to vector<16xf32>
    %113 = vector.shape_cast %112 : vector<16xf32> to vector<16x1xf32>
    %114 = vector.broadcast %113 : vector<16x1xf32> to vector<16x16xf32>
    %115 = arith.subf %111, %114 : vector<16x16xf32>
    %116 = math.exp %115 : vector<16x16xf32>
    %cst_36 = arith.constant dense<0.000000e+00> : vector<16xf32>
    %117 = vector.multi_reduction <add>, %116, %cst_36 [1] : vector<16x16xf32> to vector<16xf32>
    %118 = vector.shape_cast %117 : vector<16xf32> to vector<16x1xf32>
    %119 = tpu.reciprocal %118 {approx = true} : vector<16x1xf32> -> vector<16x1xf32>
    %120 = vector.broadcast %119 : vector<16x1xf32> to vector<16x16xf32>
    %121 = arith.mulf %116, %120 : vector<16x16xf32>
    %122 = arith.truncf %121 : vector<16x16xf32> to vector<16x16xbf16>
    %cst_37 = arith.constant dense<0.000000e+00> : vector<16x32xf32>
    %123 = tpu.matmul %122, %109, %cst_37 {dimension_numbers = #tpu.dot_dimension_numbers<[1], [0], [0], [1], [0, 0, 1, 1], [], []>} : vector<16x16xbf16>, vector<16x32xbf16>, vector<16x32xf32> -> vector<16x32xf32>
    %124 = arith.truncf %123 : vector<16x32xf32> to vector<16x32xbf16>
    %c0_38 = arith.constant 0 : index
    %c64 = arith.constant 64 : index
    %125 = vector.load %arg14[%c0_38, %c64] : memref<16x128xbf16, #tpu.memory_space<vmem>>, vector<16x32xbf16>
    tpu.vector_store %arg14[%c0_38, %c64], %124 {strides = array<i32>} : memref<16x128xbf16, #tpu.memory_space<vmem>>, vector<16x32xbf16>,
    %126 = vector.extract_strided_slice %56 {offsets = [0, 96], sizes = [16, 32], strides = [1, 1]} : vector<16x128xbf16> to vector<16x32xbf16>
    %127 = vector.extract_strided_slice %59 {offsets = [96, 0], sizes = [32, 16], strides = [1, 1]} : vector<128x16xbf16> to vector<32x16xbf16>
    %128 = vector.extract_strided_slice %61 {offsets = [0, 96], sizes = [16, 32], strides = [1, 1]} : vector<16x128xbf16> to vector<16x32xbf16>
    %cst_39 = arith.constant dense<0.000000e+00> : vector<16x16xf32>
    %129 = tpu.matmul %126, %127, %cst_39 {dimension_numbers = #tpu.dot_dimension_numbers<[1], [0], [0], [1], [0, 0, 1, 1], [], []>} : vector<16x32xbf16>, vector<32x16xbf16>, vector<16x16xf32> -> vector<16x16xf32>
    %130 = arith.addf %129, %68 : vector<16x16xf32>
    %cst_40 = arith.constant dense<0xFF800000> : vector<16xf32>
    %131 = vector.multi_reduction <maximumf>, %130, %cst_40 [1] : vector<16x16xf32> to vector<16xf32>
    %132 = vector.shape_cast %131 : vector<16xf32> to vector<16x1xf32>
    %133 = vector.broadcast %132 : vector<16x1xf32> to vector<16x16xf32>
    %134 = arith.subf %130, %133 : vector<16x16xf32>
    %135 = math.exp %134 : vector<16x16xf32>
    %cst_41 = arith.constant dense<0.000000e+00> : vector<16xf32>
    %136 = vector.multi_reduction <add>, %135, %cst_41 [1] : vector<16x16xf32> to vector<16xf32>
    %137 = vector.shape_cast %136 : vector<16xf32> to vector<16x1xf32>
    %138 = tpu.reciprocal %137 {approx = true} : vector<16x1xf32> -> vector<16x1xf32>
    %139 = vector.broadcast %138 : vector<16x1xf32> to vector<16x16xf32>
    %140 = arith.mulf %135, %139 : vector<16x16xf32>
    %141 = arith.truncf %140 : vector<16x16xf32> to vector<16x16xbf16>
    %cst_42 = arith.constant dense<0.000000e+00> : vector<16x32xf32>
    %142 = tpu.matmul %141, %128, %cst_42 {dimension_numbers = #tpu.dot_dimension_numbers<[1], [0], [0], [1], [0, 0, 1, 1], [], []>} : vector<16x16xbf16>, vector<16x32xbf16>, vector<16x32xf32> -> vector<16x32xf32>
    %143 = arith.truncf %142 : vector<16x32xf32> to vector<16x32xbf16>
    %c0_43 = arith.constant 0 : index
    %c96 = arith.constant 96 : index
    %144 = vector.load %arg14[%c0_43, %c96] : memref<16x128xbf16, #tpu.memory_space<vmem>>, vector<16x32xbf16>
    tpu.vector_store %arg14[%c0_43, %c96], %143 {strides = array<i32>} : memref<16x128xbf16, #tpu.memory_space<vmem>>, vector<16x32xbf16>,
    %c0_44 = arith.constant 0 : index
    %c0_45 = arith.constant 0 : index
    %145 = vector.load %arg14[%c0_44, %c0_45] : memref<16x128xbf16, #tpu.memory_space<vmem>>, vector<16x128xbf16>
    %c0_46 = arith.constant 0 : index
    %c0_47 = arith.constant 0 : index
    %146 = vector.load %arg7[%c0_46, %c0_47] : memref<128x128xbf16, #tpu.memory_space<vmem>>, vector<128x128xbf16>
    %cst_48 = arith.constant dense<0.000000e+00> : vector<16x128xf32>
    %147 = tpu.matmul %145, %146, %cst_48 {dimension_numbers = #tpu.dot_dimension_numbers<[1], [0], [0], [1], [0, 0, 1, 1], [], []>} : vector<16x128xbf16>, vector<128x128xbf16>, vector<16x128xf32> -> vector<16x128xf32>
    %c0_49 = arith.constant 0 : index
    %c0_50 = arith.constant 0 : index
    %148 = vector.load %arg8[%c0_49, %c0_50] : memref<1x128xf32, #tpu.memory_space<vmem>>, vector<1x128xf32>
    %149 = vector.broadcast %148 : vector<1x128xf32> to vector<16x128xf32>
    %150 = arith.addf %147, %149 : vector<16x128xf32>
    %151 = vector.broadcast %19 : vector<1x128xf32> to vector<16x128xf32>
    %152 = arith.mulf %151, %150 : vector<16x128xf32>
    %153 = vector.broadcast %12 : vector<16x1xf32> to vector<16x128xf32>
    %154 = arith.mulf %152, %153 : vector<16x128xf32>
    %155 = arith.addf %24, %154 : vector<16x128xf32>
    %cst_51 = arith.constant 1.000000e+00 : f32
    %156 = vector.broadcast %cst_51 : f32 to vector<1x128xf32>
    %157 = arith.addf %156, %21 : vector<1x128xf32>
    %158 = vector.broadcast %157 : vector<1x128xf32> to vector<16x128xf32>
    %159 = arith.mulf %42, %158 : vector<16x128xf32>
    %160 = vector.broadcast %20 : vector<1x128xf32> to vector<16x128xf32>
    %161 = arith.addf %159, %160 : vector<16x128xf32>
    %162 = vector.broadcast %12 : vector<16x1xf32> to vector<16x128xf32>
    %163 = arith.mulf %161, %162 : vector<16x128xf32>
    %c1_i32 = arith.constant 1 : i32
    %164 = tpu.dynamic_rotate %163 by %c1_i32 dim 0 : vector<16x128xf32>, i32 -> vector<16x128xf32>
    %165 = vector.broadcast %4 : vector<16x1xf32> to vector<16x128xf32>
    %166 = arith.mulf %164, %165 : vector<16x128xf32>
    %c15_i32_52 = arith.constant 15 : i32
    %167 = tpu.dynamic_rotate %163 by %c15_i32_52 dim 0 : vector<16x128xf32>, i32 -> vector<16x128xf32>
    %168 = vector.broadcast %8 : vector<16x1xf32> to vector<16x128xf32>
    %169 = arith.mulf %167, %168 : vector<16x128xf32>
    %170 = arith.truncf %166 : vector<16x128xf32> to vector<16x128xbf16>
    %171 = arith.truncf %163 : vector<16x128xf32> to vector<16x128xbf16>
    %172 = arith.truncf %169 : vector<16x128xf32> to vector<16x128xbf16>
    %173 = tpu.concatenate %170, %171, %172 in 1 : vector<16x128xbf16>, vector<16x128xbf16>, vector<16x128xbf16> -> vector<16x384xbf16>
    %c0_53 = arith.constant 0 : index
    %c0_54 = arith.constant 0 : index
    %174 = vector.load %arg9[%c0_53, %c0_54] : memref<384x256xbf16, #tpu.memory_space<vmem>>, vector<384x256xbf16>
    %cst_55 = arith.constant dense<0.000000e+00> : vector<16x256xf32>
    %175 = tpu.matmul %173, %174, %cst_55 {dimension_numbers = #tpu.dot_dimension_numbers<[1], [0], [0], [1], [0, 0, 1, 1], [], []>} : vector<16x384xbf16>, vector<384x256xbf16>, vector<16x256xf32> -> vector<16x256xf32>
    %c0_56 = arith.constant 0 : index
    %c0_57 = arith.constant 0 : index
    %176 = vector.load %arg10[%c0_56, %c0_57] : memref<1x256xf32, #tpu.memory_space<vmem>>, vector<1x256xf32>
    %177 = vector.broadcast %176 : vector<1x256xf32> to vector<16x256xf32>
    %178 = arith.addf %175, %177 : vector<16x256xf32>
    %cst_58 = arith.constant 0.000000e+00 : f32
    %179 = vector.broadcast %cst_58 : f32 to vector<16x256xf32>
    %180 = arith.maximumf %178, %179 : vector<16x256xf32>
    %181 = vector.broadcast %12 : vector<16x1xf32> to vector<16x256xf32>
    %182 = arith.mulf %180, %181 : vector<16x256xf32>
    %c1_i32_59 = arith.constant 1 : i32
    %183 = tpu.dynamic_rotate %182 by %c1_i32_59 dim 0 : vector<16x256xf32>, i32 -> vector<16x256xf32>
    %184 = vector.broadcast %4 : vector<16x1xf32> to vector<16x256xf32>
    %185 = arith.mulf %183, %184 : vector<16x256xf32>
    %c15_i32_60 = arith.constant 15 : i32
    %186 = tpu.dynamic_rotate %182 by %c15_i32_60 dim 0 : vector<16x256xf32>, i32 -> vector<16x256xf32>
    %187 = vector.broadcast %8 : vector<16x1xf32> to vector<16x256xf32>
    %188 = arith.mulf %186, %187 : vector<16x256xf32>
    %189 = arith.truncf %185 : vector<16x256xf32> to vector<16x256xbf16>
    %190 = arith.truncf %182 : vector<16x256xf32> to vector<16x256xbf16>
    %191 = arith.truncf %188 : vector<16x256xf32> to vector<16x256xbf16>
    %192 = tpu.concatenate %189, %190, %191 in 1 : vector<16x256xbf16>, vector<16x256xbf16>, vector<16x256xbf16> -> vector<16x768xbf16>
    %c0_61 = arith.constant 0 : index
    %c0_62 = arith.constant 0 : index
    %193 = vector.load %arg11[%c0_61, %c0_62] : memref<768x128xbf16, #tpu.memory_space<vmem>>, vector<768x128xbf16>
    %cst_63 = arith.constant dense<0.000000e+00> : vector<16x128xf32>
    %194 = tpu.matmul %192, %193, %cst_63 {dimension_numbers = #tpu.dot_dimension_numbers<[1], [0], [0], [1], [0, 0, 1, 1], [], []>} : vector<16x768xbf16>, vector<768x128xbf16>, vector<16x128xf32> -> vector<16x128xf32>
    %c0_64 = arith.constant 0 : index
    %c0_65 = arith.constant 0 : index
    %195 = vector.load %arg12[%c0_64, %c0_65] : memref<1x128xf32, #tpu.memory_space<vmem>>, vector<1x128xf32>
    %196 = vector.broadcast %195 : vector<1x128xf32> to vector<16x128xf32>
    %197 = arith.addf %194, %196 : vector<16x128xf32>
    %198 = vector.broadcast %12 : vector<16x1xf32> to vector<16x128xf32>
    %199 = arith.mulf %197, %198 : vector<16x128xf32>
    %200 = vector.broadcast %22 : vector<1x128xf32> to vector<16x128xf32>
    %201 = arith.mulf %200, %199 : vector<16x128xf32>
    %202 = arith.addf %155, %201 : vector<16x128xf32>
    %c0_66 = arith.constant 0 : index
    %c0_67 = arith.constant 0 : index
    %c0_68 = arith.constant 0 : index
    %203 = vector.load %arg13[%c0_66, %c0_67, %c0_68] : memref<2x16x128xf32, #tpu.memory_space<vmem>>, vector<1x16x128xf32>
    %204 = vector.shape_cast %203 : vector<1x16x128xf32> to vector<16x128xf32>
    %205 = vector.shape_cast %202 : vector<16x128xf32> to vector<1x16x128xf32>
    tpu.vector_store %arg13[%c0_66, %c0_67, %c0_68], %205 {strides = array<i32>} : memref<2x16x128xf32, #tpu.memory_space<vmem>>, vector<1x16x128xf32>,
    %c1 = arith.constant 1 : index
    %c0_69 = arith.constant 0 : index
    %c0_70 = arith.constant 0 : index
    %206 = vector.load %arg1[%c1, %c0_69, %c0_70] : memref<2x16x128xf32, #tpu.memory_space<vmem>>, vector<1x16x128xf32>
    %207 = vector.shape_cast %206 : vector<1x16x128xf32> to vector<16x128xf32>
    %c1_71 = arith.constant 1 : index
    %c0_72 = arith.constant 0 : index
    %c0_73 = arith.constant 0 : index
    %208 = vector.load %arg2[%c1_71, %c0_72, %c0_73] : memref<2x16x1xf32, #tpu.memory_space<vmem>>, vector<1x16x1xf32>
    %209 = vector.shape_cast %208 : vector<1x16x1xf32> to vector<16x1xf32>
    %c1_74 = arith.constant 1 : index
    %c0_75 = arith.constant 0 : index
    %c0_76 = arith.constant 0 : index
    %210 = vector.load %arg3[%c1_74, %c0_75, %c0_76] : memref<2x1x16xf32, #tpu.memory_space<vmem>>, vector<1x1x16xf32>
    %211 = vector.shape_cast %210 : vector<1x1x16xf32> to vector<1x16xf32>
    %c1_77 = arith.constant 1 : index
    %c0_78 = arith.constant 0 : index
    %c0_79 = arith.constant 0 : index
    %212 = vector.load %arg4[%c1_77, %c0_78, %c0_79] : memref<2x6x128xf32, #tpu.memory_space<vmem>>, vector<1x6x128xf32>
    %213 = vector.shape_cast %212 : vector<1x6x128xf32> to vector<6x128xf32>
    %214 = vector.extract_strided_slice %213 {offsets = [0, 0], sizes = [1, 128], strides = [1, 1]} : vector<6x128xf32> to vector<1x128xf32>
    %215 = vector.extract_strided_slice %213 {offsets = [1, 0], sizes = [1, 128], strides = [1, 1]} : vector<6x128xf32> to vector<1x128xf32>
    %216 = vector.extract_strided_slice %213 {offsets = [2, 0], sizes = [1, 128], strides = [1, 1]} : vector<6x128xf32> to vector<1x128xf32>
    %217 = vector.extract_strided_slice %213 {offsets = [3, 0], sizes = [1, 128], strides = [1, 1]} : vector<6x128xf32> to vector<1x128xf32>
    %218 = vector.extract_strided_slice %213 {offsets = [4, 0], sizes = [1, 128], strides = [1, 1]} : vector<6x128xf32> to vector<1x128xf32>
    %219 = vector.extract_strided_slice %213 {offsets = [5, 0], sizes = [1, 128], strides = [1, 1]} : vector<6x128xf32> to vector<1x128xf32>
    %220 = vector.broadcast %209 : vector<16x1xf32> to vector<16x128xf32>
    %221 = arith.mulf %207, %220 : vector<16x128xf32>
    %cst_80 = arith.constant dense<0.000000e+00> : vector<16xf32>
    %222 = vector.multi_reduction <add>, %221, %cst_80 [1] : vector<16x128xf32> to vector<16xf32>
    %223 = vector.shape_cast %222 : vector<16xf32> to vector<16x1xf32>
    %cst_81 = arith.constant 1.280000e+02 : f32
    %224 = vector.broadcast %cst_81 : f32 to vector<16x1xf32>
    %225 = arith.divf %223, %224 : vector<16x1xf32>
    %226 = vector.broadcast %225 : vector<16x1xf32> to vector<16x128xf32>
    %227 = arith.subf %221, %226 : vector<16x128xf32>
    %228 = arith.mulf %227, %227 : vector<16x128xf32>
    %cst_82 = arith.constant dense<0.000000e+00> : vector<16xf32>
    %229 = vector.multi_reduction <add>, %228, %cst_82 [1] : vector<16x128xf32> to vector<16xf32>
    %230 = vector.shape_cast %229 : vector<16xf32> to vector<16x1xf32>
    %cst_83 = arith.constant 1.280000e+02 : f32
    %231 = vector.broadcast %cst_83 : f32 to vector<16x1xf32>
    %232 = arith.divf %230, %231 : vector<16x1xf32>
    %233 = vector.broadcast %225 : vector<16x1xf32> to vector<16x128xf32>
    %234 = arith.subf %221, %233 : vector<16x128xf32>
    %cst_84 = arith.constant 9.99999974E-6 : f32
    %235 = vector.broadcast %cst_84 : f32 to vector<16x1xf32>
    %236 = arith.addf %232, %235 : vector<16x1xf32>
    %237 = math.rsqrt %236 : vector<16x1xf32>
    %238 = vector.broadcast %237 : vector<16x1xf32> to vector<16x128xf32>
    %239 = arith.mulf %234, %238 : vector<16x128xf32>
    %cst_85 = arith.constant 1.000000e+00 : f32
    %240 = vector.broadcast %cst_85 : f32 to vector<1x128xf32>
    %241 = arith.addf %240, %215 : vector<1x128xf32>
    %242 = vector.broadcast %241 : vector<1x128xf32> to vector<16x128xf32>
    %243 = arith.mulf %239, %242 : vector<16x128xf32>
    %244 = vector.broadcast %214 : vector<1x128xf32> to vector<16x128xf32>
    %245 = arith.addf %243, %244 : vector<16x128xf32>
    %246 = arith.truncf %245 : vector<16x128xf32> to vector<16x128xbf16>
    %c0_86 = arith.constant 0 : index
    %c0_87 = arith.constant 0 : index
    %247 = vector.load %arg5[%c0_86, %c0_87] : memref<128x384xbf16, #tpu.memory_space<vmem>>, vector<128x384xbf16>
    %cst_88 = arith.constant dense<0.000000e+00> : vector<16x384xf32>
    %248 = tpu.matmul %246, %247, %cst_88 {dimension_numbers = #tpu.dot_dimension_numbers<[1], [0], [0], [1], [0, 0, 1, 1], [], []>} : vector<16x128xbf16>, vector<128x384xbf16>, vector<16x384xf32> -> vector<16x384xf32>
    %c0_89 = arith.constant 0 : index
    %c0_90 = arith.constant 0 : index
    %249 = vector.load %arg6[%c0_89, %c0_90] : memref<1x384xf32, #tpu.memory_space<vmem>>, vector<1x384xf32>
    %250 = vector.broadcast %249 : vector<1x384xf32> to vector<16x384xf32>
    %251 = arith.addf %248, %250 : vector<16x384xf32>
    %252 = vector.extract_strided_slice %251 {offsets = [0, 0], sizes = [16, 128], strides = [1, 1]} : vector<16x384xf32> to vector<16x128xf32>
    %253 = arith.truncf %252 : vector<16x128xf32> to vector<16x128xbf16>
    %254 = vector.extract_strided_slice %251 {offsets = [0, 128], sizes = [16, 128], strides = [1, 1]} : vector<16x384xf32> to vector<16x128xf32>
    %255 = tpu.transpose %254, [1, 0] : vector<16x128xf32> -> vector<128x16xf32>
    %256 = arith.truncf %255 : vector<128x16xf32> to vector<128x16xbf16>
    %257 = vector.extract_strided_slice %251 {offsets = [0, 256], sizes = [16, 128], strides = [1, 1]} : vector<16x384xf32> to vector<16x128xf32>
    %258 = arith.truncf %257 : vector<16x128xf32> to vector<16x128xbf16>
    %259 = vector.broadcast %209 : vector<16x1xf32> to vector<16x16xf32>
    %260 = vector.broadcast %211 : vector<1x16xf32> to vector<16x16xf32>
    %261 = arith.mulf %259, %260 : vector<16x16xf32>
    %cst_91 = arith.constant 1.000000e+00 : f32
    %262 = vector.broadcast %cst_91 : f32 to vector<16x16xf32>
    %263 = arith.subf %261, %262 : vector<16x16xf32>
    %cst_92 = arith.constant 1.000000e+09 : f32
    %264 = vector.broadcast %cst_92 : f32 to vector<16x16xf32>
    %265 = arith.mulf %263, %264 : vector<16x16xf32>
    %266 = vector.extract_strided_slice %253 {offsets = [0, 0], sizes = [16, 32], strides = [1, 1]} : vector<16x128xbf16> to vector<16x32xbf16>
    %267 = vector.extract_strided_slice %256 {offsets = [0, 0], sizes = [32, 16], strides = [1, 1]} : vector<128x16xbf16> to vector<32x16xbf16>
    %268 = vector.extract_strided_slice %258 {offsets = [0, 0], sizes = [16, 32], strides = [1, 1]} : vector<16x128xbf16> to vector<16x32xbf16>
    %cst_93 = arith.constant dense<0.000000e+00> : vector<16x16xf32>
    %269 = tpu.matmul %266, %267, %cst_93 {dimension_numbers = #tpu.dot_dimension_numbers<[1], [0], [0], [1], [0, 0, 1, 1], [], []>} : vector<16x32xbf16>, vector<32x16xbf16>, vector<16x16xf32> -> vector<16x16xf32>
    %270 = arith.addf %269, %265 : vector<16x16xf32>
    %cst_94 = arith.constant dense<0xFF800000> : vector<16xf32>
    %271 = vector.multi_reduction <maximumf>, %270, %cst_94 [1] : vector<16x16xf32> to vector<16xf32>
    %272 = vector.shape_cast %271 : vector<16xf32> to vector<16x1xf32>
    %273 = vector.broadcast %272 : vector<16x1xf32> to vector<16x16xf32>
    %274 = arith.subf %270, %273 : vector<16x16xf32>
    %275 = math.exp %274 : vector<16x16xf32>
    %cst_95 = arith.constant dense<0.000000e+00> : vector<16xf32>
    %276 = vector.multi_reduction <add>, %275, %cst_95 [1] : vector<16x16xf32> to vector<16xf32>
    %277 = vector.shape_cast %276 : vector<16xf32> to vector<16x1xf32>
    %278 = tpu.reciprocal %277 {approx = true} : vector<16x1xf32> -> vector<16x1xf32>
    %279 = vector.broadcast %278 : vector<16x1xf32> to vector<16x16xf32>
    %280 = arith.mulf %275, %279 : vector<16x16xf32>
    %281 = arith.truncf %280 : vector<16x16xf32> to vector<16x16xbf16>
    %cst_96 = arith.constant dense<0.000000e+00> : vector<16x32xf32>
    %282 = tpu.matmul %281, %268, %cst_96 {dimension_numbers = #tpu.dot_dimension_numbers<[1], [0], [0], [1], [0, 0, 1, 1], [], []>} : vector<16x16xbf16>, vector<16x32xbf16>, vector<16x32xf32> -> vector<16x32xf32>
    %283 = arith.truncf %282 : vector<16x32xf32> to vector<16x32xbf16>
    %c0_97 = arith.constant 0 : index
    %c0_98 = arith.constant 0 : index
    %284 = vector.load %arg14[%c0_97, %c0_98] : memref<16x128xbf16, #tpu.memory_space<vmem>>, vector<16x32xbf16>
    tpu.vector_store %arg14[%c0_97, %c0_98], %283 {strides = array<i32>} : memref<16x128xbf16, #tpu.memory_space<vmem>>, vector<16x32xbf16>,
    %285 = vector.extract_strided_slice %253 {offsets = [0, 32], sizes = [16, 32], strides = [1, 1]} : vector<16x128xbf16> to vector<16x32xbf16>
    %286 = vector.extract_strided_slice %256 {offsets = [32, 0], sizes = [32, 16], strides = [1, 1]} : vector<128x16xbf16> to vector<32x16xbf16>
    %287 = vector.extract_strided_slice %258 {offsets = [0, 32], sizes = [16, 32], strides = [1, 1]} : vector<16x128xbf16> to vector<16x32xbf16>
    %cst_99 = arith.constant dense<0.000000e+00> : vector<16x16xf32>
    %288 = tpu.matmul %285, %286, %cst_99 {dimension_numbers = #tpu.dot_dimension_numbers<[1], [0], [0], [1], [0, 0, 1, 1], [], []>} : vector<16x32xbf16>, vector<32x16xbf16>, vector<16x16xf32> -> vector<16x16xf32>
    %289 = arith.addf %288, %265 : vector<16x16xf32>
    %cst_100 = arith.constant dense<0xFF800000> : vector<16xf32>
    %290 = vector.multi_reduction <maximumf>, %289, %cst_100 [1] : vector<16x16xf32> to vector<16xf32>
    %291 = vector.shape_cast %290 : vector<16xf32> to vector<16x1xf32>
    %292 = vector.broadcast %291 : vector<16x1xf32> to vector<16x16xf32>
    %293 = arith.subf %289, %292 : vector<16x16xf32>
    %294 = math.exp %293 : vector<16x16xf32>
    %cst_101 = arith.constant dense<0.000000e+00> : vector<16xf32>
    %295 = vector.multi_reduction <add>, %294, %cst_101 [1] : vector<16x16xf32> to vector<16xf32>
    %296 = vector.shape_cast %295 : vector<16xf32> to vector<16x1xf32>
    %297 = tpu.reciprocal %296 {approx = true} : vector<16x1xf32> -> vector<16x1xf32>
    %298 = vector.broadcast %297 : vector<16x1xf32> to vector<16x16xf32>
    %299 = arith.mulf %294, %298 : vector<16x16xf32>
    %300 = arith.truncf %299 : vector<16x16xf32> to vector<16x16xbf16>
    %cst_102 = arith.constant dense<0.000000e+00> : vector<16x32xf32>
    %301 = tpu.matmul %300, %287, %cst_102 {dimension_numbers = #tpu.dot_dimension_numbers<[1], [0], [0], [1], [0, 0, 1, 1], [], []>} : vector<16x16xbf16>, vector<16x32xbf16>, vector<16x32xf32> -> vector<16x32xf32>
    %302 = arith.truncf %301 : vector<16x32xf32> to vector<16x32xbf16>
    %c0_103 = arith.constant 0 : index
    %c32_104 = arith.constant 32 : index
    %303 = vector.load %arg14[%c0_103, %c32_104] : memref<16x128xbf16, #tpu.memory_space<vmem>>, vector<16x32xbf16>
    tpu.vector_store %arg14[%c0_103, %c32_104], %302 {strides = array<i32>} : memref<16x128xbf16, #tpu.memory_space<vmem>>, vector<16x32xbf16>,
    %304 = vector.extract_strided_slice %253 {offsets = [0, 64], sizes = [16, 32], strides = [1, 1]} : vector<16x128xbf16> to vector<16x32xbf16>
    %305 = vector.extract_strided_slice %256 {offsets = [64, 0], sizes = [32, 16], strides = [1, 1]} : vector<128x16xbf16> to vector<32x16xbf16>
    %306 = vector.extract_strided_slice %258 {offsets = [0, 64], sizes = [16, 32], strides = [1, 1]} : vector<16x128xbf16> to vector<16x32xbf16>
    %cst_105 = arith.constant dense<0.000000e+00> : vector<16x16xf32>
    %307 = tpu.matmul %304, %305, %cst_105 {dimension_numbers = #tpu.dot_dimension_numbers<[1], [0], [0], [1], [0, 0, 1, 1], [], []>} : vector<16x32xbf16>, vector<32x16xbf16>, vector<16x16xf32> -> vector<16x16xf32>
    %308 = arith.addf %307, %265 : vector<16x16xf32>
    %cst_106 = arith.constant dense<0xFF800000> : vector<16xf32>
    %309 = vector.multi_reduction <maximumf>, %308, %cst_106 [1] : vector<16x16xf32> to vector<16xf32>
    %310 = vector.shape_cast %309 : vector<16xf32> to vector<16x1xf32>
    %311 = vector.broadcast %310 : vector<16x1xf32> to vector<16x16xf32>
    %312 = arith.subf %308, %311 : vector<16x16xf32>
    %313 = math.exp %312 : vector<16x16xf32>
    %cst_107 = arith.constant dense<0.000000e+00> : vector<16xf32>
    %314 = vector.multi_reduction <add>, %313, %cst_107 [1] : vector<16x16xf32> to vector<16xf32>
    %315 = vector.shape_cast %314 : vector<16xf32> to vector<16x1xf32>
    %316 = tpu.reciprocal %315 {approx = true} : vector<16x1xf32> -> vector<16x1xf32>
    %317 = vector.broadcast %316 : vector<16x1xf32> to vector<16x16xf32>
    %318 = arith.mulf %313, %317 : vector<16x16xf32>
    %319 = arith.truncf %318 : vector<16x16xf32> to vector<16x16xbf16>
    %cst_108 = arith.constant dense<0.000000e+00> : vector<16x32xf32>
    %320 = tpu.matmul %319, %306, %cst_108 {dimension_numbers = #tpu.dot_dimension_numbers<[1], [0], [0], [1], [0, 0, 1, 1], [], []>} : vector<16x16xbf16>, vector<16x32xbf16>, vector<16x32xf32> -> vector<16x32xf32>
    %321 = arith.truncf %320 : vector<16x32xf32> to vector<16x32xbf16>
    %c0_109 = arith.constant 0 : index
    %c64_110 = arith.constant 64 : index
    %322 = vector.load %arg14[%c0_109, %c64_110] : memref<16x128xbf16, #tpu.memory_space<vmem>>, vector<16x32xbf16>
    tpu.vector_store %arg14[%c0_109, %c64_110], %321 {strides = array<i32>} : memref<16x128xbf16, #tpu.memory_space<vmem>>, vector<16x32xbf16>,
    %323 = vector.extract_strided_slice %253 {offsets = [0, 96], sizes = [16, 32], strides = [1, 1]} : vector<16x128xbf16> to vector<16x32xbf16>
    %324 = vector.extract_strided_slice %256 {offsets = [96, 0], sizes = [32, 16], strides = [1, 1]} : vector<128x16xbf16> to vector<32x16xbf16>
    %325 = vector.extract_strided_slice %258 {offsets = [0, 96], sizes = [16, 32], strides = [1, 1]} : vector<16x128xbf16> to vector<16x32xbf16>
    %cst_111 = arith.constant dense<0.000000e+00> : vector<16x16xf32>
    %326 = tpu.matmul %323, %324, %cst_111 {dimension_numbers = #tpu.dot_dimension_numbers<[1], [0], [0], [1], [0, 0, 1, 1], [], []>} : vector<16x32xbf16>, vector<32x16xbf16>, vector<16x16xf32> -> vector<16x16xf32>
    %327 = arith.addf %326, %265 : vector<16x16xf32>
    %cst_112 = arith.constant dense<0xFF800000> : vector<16xf32>
    %328 = vector.multi_reduction <maximumf>, %327, %cst_112 [1] : vector<16x16xf32> to vector<16xf32>
    %329 = vector.shape_cast %328 : vector<16xf32> to vector<16x1xf32>
    %330 = vector.broadcast %329 : vector<16x1xf32> to vector<16x16xf32>
    %331 = arith.subf %327, %330 : vector<16x16xf32>
    %332 = math.exp %331 : vector<16x16xf32>
    %cst_113 = arith.constant dense<0.000000e+00> : vector<16xf32>
    %333 = vector.multi_reduction <add>, %332, %cst_113 [1] : vector<16x16xf32> to vector<16xf32>
    %334 = vector.shape_cast %333 : vector<16xf32> to vector<16x1xf32>
    %335 = tpu.reciprocal %334 {approx = true} : vector<16x1xf32> -> vector<16x1xf32>
    %336 = vector.broadcast %335 : vector<16x1xf32> to vector<16x16xf32>
    %337 = arith.mulf %332, %336 : vector<16x16xf32>
    %338 = arith.truncf %337 : vector<16x16xf32> to vector<16x16xbf16>
    %cst_114 = arith.constant dense<0.000000e+00> : vector<16x32xf32>
    %339 = tpu.matmul %338, %325, %cst_114 {dimension_numbers = #tpu.dot_dimension_numbers<[1], [0], [0], [1], [0, 0, 1, 1], [], []>} : vector<16x16xbf16>, vector<16x32xbf16>, vector<16x32xf32> -> vector<16x32xf32>
    %340 = arith.truncf %339 : vector<16x32xf32> to vector<16x32xbf16>
    %c0_115 = arith.constant 0 : index
    %c96_116 = arith.constant 96 : index
    %341 = vector.load %arg14[%c0_115, %c96_116] : memref<16x128xbf16, #tpu.memory_space<vmem>>, vector<16x32xbf16>
    tpu.vector_store %arg14[%c0_115, %c96_116], %340 {strides = array<i32>} : memref<16x128xbf16, #tpu.memory_space<vmem>>, vector<16x32xbf16>,
    %c0_117 = arith.constant 0 : index
    %c0_118 = arith.constant 0 : index
    %342 = vector.load %arg14[%c0_117, %c0_118] : memref<16x128xbf16, #tpu.memory_space<vmem>>, vector<16x128xbf16>
    %c0_119 = arith.constant 0 : index
    %c0_120 = arith.constant 0 : index
    %343 = vector.load %arg7[%c0_119, %c0_120] : memref<128x128xbf16, #tpu.memory_space<vmem>>, vector<128x128xbf16>
    %cst_121 = arith.constant dense<0.000000e+00> : vector<16x128xf32>
    %344 = tpu.matmul %342, %343, %cst_121 {dimension_numbers = #tpu.dot_dimension_numbers<[1], [0], [0], [1], [0, 0, 1, 1], [], []>} : vector<16x128xbf16>, vector<128x128xbf16>, vector<16x128xf32> -> vector<16x128xf32>
    %c0_122 = arith.constant 0 : index
    %c0_123 = arith.constant 0 : index
    %345 = vector.load %arg8[%c0_122, %c0_123] : memref<1x128xf32, #tpu.memory_space<vmem>>, vector<1x128xf32>
    %346 = vector.broadcast %345 : vector<1x128xf32> to vector<16x128xf32>
    %347 = arith.addf %344, %346 : vector<16x128xf32>
    %348 = vector.broadcast %216 : vector<1x128xf32> to vector<16x128xf32>
    %349 = arith.mulf %348, %347 : vector<16x128xf32>
    %350 = vector.broadcast %209 : vector<16x1xf32> to vector<16x128xf32>
    %351 = arith.mulf %349, %350 : vector<16x128xf32>
    %352 = arith.addf %221, %351 : vector<16x128xf32>
    %cst_124 = arith.constant 1.000000e+00 : f32
    %353 = vector.broadcast %cst_124 : f32 to vector<1x128xf32>
    %354 = arith.addf %353, %218 : vector<1x128xf32>
    %355 = vector.broadcast %354 : vector<1x128xf32> to vector<16x128xf32>
    %356 = arith.mulf %239, %355 : vector<16x128xf32>
    %357 = vector.broadcast %217 : vector<1x128xf32> to vector<16x128xf32>
    %358 = arith.addf %356, %357 : vector<16x128xf32>
    %359 = vector.broadcast %209 : vector<16x1xf32> to vector<16x128xf32>
    %360 = arith.mulf %358, %359 : vector<16x128xf32>
    %c1_i32_125 = arith.constant 1 : i32
    %361 = tpu.dynamic_rotate %360 by %c1_i32_125 dim 0 : vector<16x128xf32>, i32 -> vector<16x128xf32>
    %362 = vector.broadcast %4 : vector<16x1xf32> to vector<16x128xf32>
    %363 = arith.mulf %361, %362 : vector<16x128xf32>
    %c15_i32_126 = arith.constant 15 : i32
    %364 = tpu.dynamic_rotate %360 by %c15_i32_126 dim 0 : vector<16x128xf32>, i32 -> vector<16x128xf32>
    %365 = vector.broadcast %8 : vector<16x1xf32> to vector<16x128xf32>
    %366 = arith.mulf %364, %365 : vector<16x128xf32>
    %367 = arith.truncf %363 : vector<16x128xf32> to vector<16x128xbf16>
    %368 = arith.truncf %360 : vector<16x128xf32> to vector<16x128xbf16>
    %369 = arith.truncf %366 : vector<16x128xf32> to vector<16x128xbf16>
    %370 = tpu.concatenate %367, %368, %369 in 1 : vector<16x128xbf16>, vector<16x128xbf16>, vector<16x128xbf16> -> vector<16x384xbf16>
    %c0_127 = arith.constant 0 : index
    %c0_128 = arith.constant 0 : index
    %371 = vector.load %arg9[%c0_127, %c0_128] : memref<384x256xbf16, #tpu.memory_space<vmem>>, vector<384x256xbf16>
    %cst_129 = arith.constant dense<0.000000e+00> : vector<16x256xf32>
    %372 = tpu.matmul %370, %371, %cst_129 {dimension_numbers = #tpu.dot_dimension_numbers<[1], [0], [0], [1], [0, 0, 1, 1], [], []>} : vector<16x384xbf16>, vector<384x256xbf16>, vector<16x256xf32> -> vector<16x256xf32>
    %c0_130 = arith.constant 0 : index
    %c0_131 = arith.constant 0 : index
    %373 = vector.load %arg10[%c0_130, %c0_131] : memref<1x256xf32, #tpu.memory_space<vmem>>, vector<1x256xf32>
    %374 = vector.broadcast %373 : vector<1x256xf32> to vector<16x256xf32>
    %375 = arith.addf %372, %374 : vector<16x256xf32>
    %cst_132 = arith.constant 0.000000e+00 : f32
    %376 = vector.broadcast %cst_132 : f32 to vector<16x256xf32>
    %377 = arith.maximumf %375, %376 : vector<16x256xf32>
    %378 = vector.broadcast %209 : vector<16x1xf32> to vector<16x256xf32>
    %379 = arith.mulf %377, %378 : vector<16x256xf32>
    %c1_i32_133 = arith.constant 1 : i32
    %380 = tpu.dynamic_rotate %379 by %c1_i32_133 dim 0 : vector<16x256xf32>, i32 -> vector<16x256xf32>
    %381 = vector.broadcast %4 : vector<16x1xf32> to vector<16x256xf32>
    %382 = arith.mulf %380, %381 : vector<16x256xf32>
    %c15_i32_134 = arith.constant 15 : i32
    %383 = tpu.dynamic_rotate %379 by %c15_i32_134 dim 0 : vector<16x256xf32>, i32 -> vector<16x256xf32>
    %384 = vector.broadcast %8 : vector<16x1xf32> to vector<16x256xf32>
    %385 = arith.mulf %383, %384 : vector<16x256xf32>
    %386 = arith.truncf %382 : vector<16x256xf32> to vector<16x256xbf16>
    %387 = arith.truncf %379 : vector<16x256xf32> to vector<16x256xbf16>
    %388 = arith.truncf %385 : vector<16x256xf32> to vector<16x256xbf16>
    %389 = tpu.concatenate %386, %387, %388 in 1 : vector<16x256xbf16>, vector<16x256xbf16>, vector<16x256xbf16> -> vector<16x768xbf16>
    %c0_135 = arith.constant 0 : index
    %c0_136 = arith.constant 0 : index
    %390 = vector.load %arg11[%c0_135, %c0_136] : memref<768x128xbf16, #tpu.memory_space<vmem>>, vector<768x128xbf16>
    %cst_137 = arith.constant dense<0.000000e+00> : vector<16x128xf32>
    %391 = tpu.matmul %389, %390, %cst_137 {dimension_numbers = #tpu.dot_dimension_numbers<[1], [0], [0], [1], [0, 0, 1, 1], [], []>} : vector<16x768xbf16>, vector<768x128xbf16>, vector<16x128xf32> -> vector<16x128xf32>
    %c0_138 = arith.constant 0 : index
    %c0_139 = arith.constant 0 : index
    %392 = vector.load %arg12[%c0_138, %c0_139] : memref<1x128xf32, #tpu.memory_space<vmem>>, vector<1x128xf32>
    %393 = vector.broadcast %392 : vector<1x128xf32> to vector<16x128xf32>
    %394 = arith.addf %391, %393 : vector<16x128xf32>
    %395 = vector.broadcast %209 : vector<16x1xf32> to vector<16x128xf32>
    %396 = arith.mulf %394, %395 : vector<16x128xf32>
    %397 = vector.broadcast %219 : vector<1x128xf32> to vector<16x128xf32>
    %398 = arith.mulf %397, %396 : vector<16x128xf32>
    %399 = arith.addf %352, %398 : vector<16x128xf32>
    %c1_140 = arith.constant 1 : index
    %c0_141 = arith.constant 0 : index
    %c0_142 = arith.constant 0 : index
    %400 = vector.load %arg13[%c1_140, %c0_141, %c0_142] : memref<2x16x128xf32, #tpu.memory_space<vmem>>, vector<1x16x128xf32>
    %401 = vector.shape_cast %400 : vector<1x16x128xf32> to vector<16x128xf32>
    %402 = vector.shape_cast %399 : vector<16x128xf32> to vector<1x16x128xf32>
    tpu.vector_store %arg13[%c1_140, %c0_141, %c0_142], %402 {strides = array<i32>} : memref<2x16x128xf32, #tpu.memory_space<vmem>>, vector<1x16x128xf32>,
    return
  }
  func.func @transform_0(%arg0: i32) -> (i32, i32, i32) {
    %c0_i32 = arith.constant 0 : i32
    %c0_i32_0 = arith.constant 0 : i32
    %c0_i32_1 = arith.constant 0 : i32
    return %arg0, %c0_i32, %c0_i32_0 : i32, i32, i32
  }
  func.func @transform_1(%arg0: i32) -> (i32, i32, i32) {
    %c0_i32 = arith.constant 0 : i32
    %c0_i32_0 = arith.constant 0 : i32
    %c0_i32_1 = arith.constant 0 : i32
    return %arg0, %c0_i32, %c0_i32_0 : i32, i32, i32
  }
  func.func @transform_2(%arg0: i32) -> (i32, i32, i32) {
    %c0_i32 = arith.constant 0 : i32
    %c0_i32_0 = arith.constant 0 : i32
    %c0_i32_1 = arith.constant 0 : i32
    return %arg0, %c0_i32, %c0_i32_0 : i32, i32, i32
  }
  func.func @transform_3(%arg0: i32) -> (i32, i32, i32) {
    %c0_i32 = arith.constant 0 : i32
    %c0_i32_0 = arith.constant 0 : i32
    %c0_i32_1 = arith.constant 0 : i32
    return %arg0, %c0_i32, %c0_i32_0 : i32, i32, i32
  }
  func.func @transform_4(%arg0: i32) -> (i32, i32) {
    %c0_i32 = arith.constant 0 : i32
    %c0_i32_0 = arith.constant 0 : i32
    %c0_i32_1 = arith.constant 0 : i32
    return %c0_i32, %c0_i32_0 : i32, i32
  }
  func.func @transform_5(%arg0: i32) -> (i32, i32) {
    %c0_i32 = arith.constant 0 : i32
    %c0_i32_0 = arith.constant 0 : i32
    %c0_i32_1 = arith.constant 0 : i32
    return %c0_i32, %c0_i32_0 : i32, i32
  }
  func.func @transform_6(%arg0: i32) -> (i32, i32) {
    %c0_i32 = arith.constant 0 : i32
    %c0_i32_0 = arith.constant 0 : i32
    %c0_i32_1 = arith.constant 0 : i32
    return %c0_i32, %c0_i32_0 : i32, i32
  }
  func.func @transform_7(%arg0: i32) -> (i32, i32) {
    %c0_i32 = arith.constant 0 : i32
    %c0_i32_0 = arith.constant 0 : i32
    %c0_i32_1 = arith.constant 0 : i32
    return %c0_i32, %c0_i32_0 : i32, i32
  }
  func.func @transform_8(%arg0: i32) -> (i32, i32) {
    %c0_i32 = arith.constant 0 : i32
    %c0_i32_0 = arith.constant 0 : i32
    %c0_i32_1 = arith.constant 0 : i32
    return %c0_i32, %c0_i32_0 : i32, i32
  }
  func.func @transform_9(%arg0: i32) -> (i32, i32) {
    %c0_i32 = arith.constant 0 : i32
    %c0_i32_0 = arith.constant 0 : i32
    %c0_i32_1 = arith.constant 0 : i32
    return %c0_i32, %c0_i32_0 : i32, i32
  }
  func.func @transform_10(%arg0: i32) -> (i32, i32) {
    %c0_i32 = arith.constant 0 : i32
    %c0_i32_0 = arith.constant 0 : i32
    %c0_i32_1 = arith.constant 0 : i32
    return %c0_i32, %c0_i32_0 : i32, i32
  }
  func.func @transform_11(%arg0: i32) -> (i32, i32) {
    %c0_i32 = arith.constant 0 : i32
    %c0_i32_0 = arith.constant 0 : i32
    %c0_i32_1 = arith.constant 0 : i32
    return %c0_i32, %c0_i32_0 : i32, i32
  }
  func.func @transform_12(%arg0: i32) -> (i32, i32, i32) {
    %c0_i32 = arith.constant 0 : i32
    %c0_i32_0 = arith.constant 0 : i32
    %c0_i32_1 = arith.constant 0 : i32
    return %arg0, %c0_i32, %c0_i32_0 : i32, i32, i32
  }
}

</mosaic_0001>

<bundles_post_ra>
// kernel: tpu_custom_call.1
= control target key start
LH: loop header
LB: loop body
LE: loop exit
PB: predicated region body
PF: predicated region fallthrough
CT: control target
= control target key end

     0   :  { %17 = vsyncpa [#allocation4], 0  ;;  %s5704_s0 = inlined_call_operand.vmem [shape: f32[2,16,128], index: 0, kind: input, shape index: {}]   ;;  %s5705_s1 = inlined_call_operand.vmem [shape: f32[2,16,1], index: 1, kind: input, shape index: {}]   ;;  %s5706_s2 = inlined_call_operand.vmem [shape: f32[2,1,16], index: 2, kind: input, shape index: {}]   ;;  %s5707_s3 = inlined_call_operand.vmem [shape: f32[2,6,128], index: 3, kind: input, shape index: {}]   ;;  %s5708_s4 = inlined_call_operand.hbm [shape: bf16[128,384], index: 4, kind: input, shape index: {}]   ;;  %s5709_s5 = inlined_call_operand.vmem [shape: f32[1,384], index: 5, kind: input, shape index: {}]   ;;  %s5710_s6 = inlined_call_operand.hbm [shape: bf16[128,128], index: 6, kind: input, shape index: {}]   ;;  %s5711_s7 = inlined_call_operand.vmem [shape: f32[1,128], index: 7, kind: input, shape index: {}]   ;;  %s5712_s8 = inlined_call_operand.hbm [shape: bf16[384,256], index: 8, kind: input, shape index: {}]   ;;  %s5713_s9 = inlined_call_operand.vmem [shape: f32[1,256], index: 9, kind: input, shape index: {}]   ;;  %s5714_s10 = inlined_call_operand.hbm [shape: bf16[768,128], index: 10, kind: input, shape index: {}]   ;;  %s5715_s11 = inlined_call_operand.vmem [shape: f32[1,128], index: 11, kind: input, shape index: {}]   ;;  %s5716_s12 = inlined_call_operand.hbm [shape: f32[2,16,128], index: 12, kind: output, shape index: {}]  }
   0x1   :  { %18 = vsyncpa [#allocation7], 0 }
   0x2   :  { %19 = vsyncpa [#allocation10], 0  ;;  %s48_s23 = sshll.u32 %s5710_s6, 4  ;;  %s49_s23 = int_to_ptr.hbm [resolvable:$true] %s48_s23 }
   0x3   :  { %20 = vsyncpa [#allocation5], 0  ;;  %s5203_s24 = smov [#allocation6]   ;;  %s33_s28 = sshll.u32 %s5708_s4, 4  ;;  %s34_s28 = int_to_ptr.hbm [resolvable:$true] %s33_s28 }
   0x4   :  { %s50_s25 = sshll.u32 %s5203_s24, 4  ;;  %s5204_s29 = smov 64   ;;  %s51_s25 = int_to_ptr.vmem [resolvable:$true] %s50_s25 }
   0x5   :  { %s5205_s30 = smov 4   ;;  %s5206_s13 = smov [#allocation3]  }
   0x6   :  { %56 = dma.hbm_to_vmem [thread:$0]  %s49_s23, 1024, %s51_s25, [#allocation7], %s5204_s29, %s5204_s29, %s5205_s30  }
   0x7   :  { %s35_s14 = sshll.u32 %s5206_s13, 4  ;;  %s5207_s15 = smov 192   ;;  %s36_s14 = int_to_ptr.vmem [resolvable:$true] %s35_s14 }
   0x8   :  { %s5208_s6 = smov 12   ;;  %s63_s18 = sshll.u32 %s5712_s8, 4  ;;  %s64_s18 = int_to_ptr.hbm [resolvable:$true] %s63_s18 }
   0x9   :  { %41 = dma.hbm_to_vmem [thread:$0]  %s34_s28, 3072, %s36_s14, [#allocation4], %s5207_s15, %s5207_s15, %s5208_s6  }
   0xa   :  { %s5209_s19 = smov [#allocation8]   ;;  %s78_s22 = sshll.u32 %s5714_s10, 4  ;;  %s79_s22 = int_to_ptr.hbm [resolvable:$true] %s78_s22 }
   0xb   :  { %s65_s20 = sshll.u32 %s5209_s19, 4  ;;  %s5210_s23 = smov 128   ;;  %s66_s20 = int_to_ptr.vmem [resolvable:$true] %s65_s20 }
   0xc   :  { %s5211_s24 = smov 8   ;;  %s5212_s25 = smov [#allocation9]  }
   0xd   :  { %71 = dma.hbm_to_vmem [thread:$0]  %s64_s18, 6144, %s66_s20, [#allocation7], %s5210_s23, %s5210_s23, %s5211_s24  }
   0xe   :  { %s80_s26 = sshll.u32 %s5212_s25, 4  ;;  %s81_s26 = int_to_ptr.vmem [resolvable:$true] %s80_s26 }
   0xf   :  { %86 = dma.hbm_to_vmem [thread:$0]  %s79_s22, 6144, %s81_s26, [#allocation10], %s5204_s29, %s5204_s29, %s5205_s30  }
  0x10   :  { %5195 = dma.done.wait [#allocation4], 3072  }
  0x11   :  { %5196 = vsyncadd [#allocation4], 4294964224 }
  0x12   :  { %5197 = dma.done.wait [#allocation7], 7168  }
  0x13   :  { %5198 = vsyncadd [#allocation7], 4294960128 }
  0x14   :  { %5199 = dma.done.wait [#allocation10], 6144  }
  0x15   :  { %5200 = vsyncadd [#allocation10], 4294961152  ;;  %v5213_v0 = vmov 0   ;;  %v123_v1 = vld [vmem:[%s5705_s1] sm:$0xff]  ;;  %v124_v2 = vld [vmem:[%s5705_s1 + $0x8] sm:$0xff]  ;;  %v5214_v9 = vmov 128.0  }
  0x16   :  { %4990 = vset.pattern.permute.xlu0 %v5213_v0  ;;  %4991 = vset.pattern.permute.xlu1 %v5213_v0  ;;  %v121_v3 = vld [vmem:[%s5704_s0] sm:$0xff]  ;;  %v122_v6 = vld [vmem:[%s5704_s0 + $0x8] sm:$0xff]  ;;  %4999 = vrcp.f32 %v5214_v9  ;;  %v3744_v24 = vld [vmem:[#allocation3 + $0xa8] sm:$0xf]  ;;  %vm482_vm11 = vcmask 261120   ;;  %vm500_vm12 = vcmask 130048  }
  0x17   :  { %4992 = vset.pattern.permute.xlu2 %v5213_v0  ;;  %129 = vperm.xlu0 %4990, %v123_v1   ;;  %v4738_v25 = vld [vmem:[#allocation3 + $0xb0] sm:$0xf0]  ;;  %v4737_v26 = vld [vmem:[#allocation3 + $0xac] sm:$0xf]  ;;  %v3746_v28 = vld [vmem:[#allocation3 + $0xb4] sm:$0xf0] }
  0x18   :  { %v3745_v27 = vor.u32 %v4738_v25, %v3744_v24  ;;  %v3752_v29 = vld [vmem:[#allocation3 + $0xb0] sm:$0xf]  ;;  %v4739_v30 = vld [vmem:[#allocation3 + $0xb8] sm:$0xf0]  ;;  %v3749_v31 = vor.u32 %v4737_v26, %v3746_v28  ;;  %v4734_v35 = vld [vmem:[#allocation3 + $0x94] sm:$0xf] }
  0x19   :  { %v3753_v32 = vor.u32 %v4739_v30, %v3752_v29  ;;  %v3732_v33 = vld [vmem:[#allocation3 + $0x90] sm:$0xf]  ;;  %v4735_v34 = vld [vmem:[#allocation3 + $0x98] sm:$0xf0]  ;;  %v3734_v37 = vld [vmem:[#allocation3 + $0x9c] sm:$0xf0] }
  0x1a   :  { %362 = vmatpush.bf16.msra.mxu0 %v3745_v27  ;;  %376 = vmatpush.bf16.msra.mxu1 %v3749_v31  ;;  %v3733_v36 = vor.u32 %v4735_v34, %v3732_v33  ;;  %v3740_v38 = vld [vmem:[#allocation3 + $0x98] sm:$0xf]  ;;  %v4736_v39 = vld [vmem:[#allocation3 + $0xa0] sm:$0xf0]  ;;  %v3737_v40 = vor.u32 %v4734_v35, %v3734_v37  ;;  %v4731_v44 = vld [vmem:[#allocation3 + $0x7c] sm:$0xf] }
  0x1b   :  { %390 = vmatpush.bf16.msra.mxu2 %v3753_v32  ;;  %v3741_v41 = vor.u32 %v4736_v39, %v3740_v38  ;;  %v3720_v42 = vld [vmem:[#allocation3 + $0x78] sm:$0xf]  ;;  %v4732_v43 = vld [vmem:[#allocation3 + $0x80] sm:$0xf0]  ;;  %v3722_v46 = vld [vmem:[#allocation3 + $0x84] sm:$0xf0] }
  0x1c   :  { %v5000_v10 = vpop.eup %4999  ;;  %v3721_v45 = vor.u32 %v4732_v43, %v3720_v42  ;;  %v3728_v47 = vld [vmem:[#allocation3 + $0x80] sm:$0xf]  ;;  %v4733_v48 = vld [vmem:[#allocation3 + $0x88] sm:$0xf0]  ;;  %v3725_v49 = vor.u32 %v4731_v44, %v3722_v46  ;;  %v4728_v53 = vld [vmem:[#allocation3 + $0x64] sm:$0xf]  ;;  %v106_v42 = vlaneseq }
  0x1d   :  { %v144_v11 = vmul.f32 128.0, %v5000_v10  ;;  %vm148_vm0 = vweird.f32 %v5000_v10  ;;  %v3729_v50 = vor.u32 %v4733_v48, %v3728_v47  ;;  %v3708_v51 = vld [vmem:[#allocation3 + $0x60] sm:$0xf]  ;;  %v4729_v52 = vld [vmem:[#allocation3 + $0x68] sm:$0xf0]  ;;  %v5215_v48 = vmov 0.0  }
  0x1e   :  { %363 = vmatpush.bf16.msra.mxu0 %v3733_v36  ;;  %377 = vmatpush.bf16.msra.mxu1 %v3737_v40  ;;  %v3709_v54 = vor.u32 %v4729_v52, %v3708_v51  ;;  %v3710_v55 = vld [vmem:[#allocation3 + $0x6c] sm:$0xf0]  ;;  %v3716_v56 = vld [vmem:[#allocation3 + $0x68] sm:$0xf]  ;;  %v4730_v57 = vld [vmem:[#allocation3 + $0x70] sm:$0xf0] }
  0x1f   :  { %134 = vperm.xlu0 %4990, %v124_v2   ;;  %v145_v12 = vsub.f32 1.0, %v144_v11  ;;  %391 = vmatpush.bf16.msra.mxu2 %v3741_v41  ;;  %v3713_v58 = vor.u32 %v4728_v53, %v3710_v55  ;;  %v3717_v59 = vor.u32 %v4730_v57, %v3716_v56  ;;  %v3696_v60 = vld [vmem:[#allocation3 + $0x48] sm:$0xf]  ;;  %v4726_v61 = vld [vmem:[#allocation3 + $0x50] sm:$0xf0]  ;;  %v5342_v44 = vshrl.u32 %v106_v42, 7 }
  0x20   :  { %v4725_v62 = vld [vmem:[#allocation3 + $0x4c] sm:$0xf]  ;;  %v3697_v63 = vor.u32 %v4726_v61, %v3696_v60  ;;  %v3698_v0 = vld [vmem:[#allocation3 + $0x54] sm:$0xf0]  ;;  %v3704_v1 = vld [vmem:[#allocation3 + $0x50] sm:$0xf] }
  0x21   :  { %v146_v13 = vmul.f32 %v5000_v10, %v145_v12  ;;  %v4727_v2 = vld [vmem:[#allocation3 + $0x58] sm:$0xf0]  ;;  %v3684_v9 = vld [vmem:[#allocation3 + $0x30] sm:$0xf]  ;;  %v4722_v11 = vld [vmem:[#allocation3 + $0x34] sm:$0xf] }
  0x22   :  { %364 = vmatpush.bf16.msra.mxu0 %v3721_v45  ;;  %378 = vmatpush.bf16.msra.mxu1 %v3725_v49  ;;  %v3674_v25 = vld [vmem:[#allocation3 + $0x24] sm:$0xf0]  ;;  %v3680_v26 = vld [vmem:[#allocation3 + $0x20] sm:$0xf]  ;;  %v4721_v27 = vld [vmem:[#allocation3 + $0x28] sm:$0xf0] }
  0x23   :  { %v147_v14 = vadd.f32 %v5000_v10, %v146_v13  ;;  %392 = vmatpush.bf16.msra.mxu2 %v3729_v50  ;;  %v3686_v13 = vld [vmem:[#allocation3 + $0x3c] sm:$0xf0]  ;;  %v3681_v29 = vor.u32 %v4721_v27, %v3680_v26  ;;  %v4717_v33 = vld [vmem:[#allocation3 + $0x8] sm:$0xf0]  ;;  %v4716_v34 = vld [vmem:[#allocation3 + $0x4] sm:$0xf] }
  0x24   :  { %v3660_v32 = vld [vmem:[#allocation3] sm:$0xf]  ;;  %v3662_v36 = vld [vmem:[#allocation3 + $0xc] sm:$0xf0]  ;;  %v3668_v37 = vld [vmem:[#allocation3 + $0x8] sm:$0xf] }
  0x25   :  { %v5327_v15 = vsel %vm148_vm0, %v5000_v10, %v147_v14  ;;  %v4723_v10 = vld [vmem:[#allocation3 + $0x38] sm:$0xf0]  ;;  %v3692_v14 = vld [vmem:[#allocation3 + $0x38] sm:$0xf]  ;;  %v3661_v35 = vor.u32 %v4717_v33, %v3660_v32  ;;  %v4718_v38 = vld [vmem:[#allocation3 + $0x10] sm:$0xf0]  ;;  %v3665_v40 = vor.u32 %v4716_v34, %v3662_v36 }
  0x26   :  { %365 = vmatpush.bf16.msra.mxu0 %v3709_v54  ;;  %379 = vmatpush.bf16.msra.mxu1 %v3713_v58  ;;  %v3685_v12 = vor.u32 %v4723_v10, %v3684_v9  ;;  %v3669_v41 = vor.u32 %v4718_v38, %v3668_v37  ;;  %vm109_vm1 = vcmp.gt.s32.totalorder %v5342_v44, 0  ;;  %v126_v51 = vld [vmem:[%s5707_s3] sm:$0x3f]  ;;  %vm920_vm9 = vcmp.lt.s32.totalorder %v5342_v44, 1  ;;  %s5216_s4 = smov 96   ;;  %s5217_s21 = smov 32  }
  0x27   :  { %393 = vmatpush.bf16.msra.mxu2 %v3717_v59  ;;  %v5346_v49 = vsel %vm109_vm1, 1.0, %v5215_v48  ;;  %v186_v54 = vadd.f32 1.0, %v126_v51  ;;  %vm927_vm10 = vcmp.lt.s32.totalorder %v5342_v44, 7  ;;  %vm549_vm13 = vcmask 257024   ;;  %s3641_s27 = sshll.u32 %s5716_s12, 4  ;;  %s3642_s27 = int_to_ptr.hbm [resolvable:$true] %s3641_s27 }
  0x28   :  { %vm636_vm14 = vcmask 519424   ;;  %vm723_vm15 = vcmask 781824   ;;  %vm810_vm0 = vcmask 1044224  }
  0x29   :  { %v910_v59 = vperm.slane %v186_v54, 4 }
  0x2a   :  { %366 = vmatpush.bf16.msra.mxu0 %v3697_v63  ;;  %v913_v63 = vperm.slane %v126_v51, 3 }
  0x2e   :  { %367 = vmatpush.bf16.msra.mxu0 %v3685_v12 }
  0x89   :  { %v5312_v4 = vpop.permute.xlu0 %129 }
  0x8a   :  { %v5315_v5 = vmul.f32 %v5312_v4, %v121_v3  ;;  %v3701_v3 = vor.u32 %v4725_v62, %v3698_v0 }
  0x8c   :  { %139 = vadd.xlane.f32.xlu1 %v5315_v5  ;;  %380 = vmatpush.bf16.msra.mxu1 %v3701_v3  ;;  %v187_v3 = vperm.slane %v186_v54, 1 }
  0x91   :  { %v5321_v7 = vpop.permute.xlu0 %134 }
  0x92   :  { %v5324_v8 = vmul.f32 %v5321_v7, %v122_v6  ;;  %v3705_v6 = vor.u32 %v4727_v2, %v3704_v1 }
  0x94   :  { %141 = vadd.xlane.f32.xlu1 %v5324_v8  ;;  %394 = vmatpush.bf16.msra.mxu2 %v3705_v6 }
  0xff   :  { %v140_v16 = vpop.xlane.xlu1 %139 }
 0x100   :  { %v150_v17 = vmul.f32 %v5327_v15, %v140_v16  ;;  %v4724_v16 = vld [vmem:[#allocation3 + $0x40] sm:$0xf0] }
 0x102   :  { %v5331_v18 = vsub.f32 %v5315_v5, %v150_v17  ;;  %v3689_v17 = vor.u32 %v4722_v11, %v3686_v13  ;;  %v190_v13 = vperm.slane %v126_v51, 0 }
 0x104   :  { %v154_v19 = vmul.f32 %v5331_v18, %v5331_v18  ;;  %381 = vmatpush.bf16.msra.mxu1 %v3689_v17 }
 0x106   :  { %156 = vadd.xlane.f32.xlu2 %v154_v19  ;;  %v3693_v19 = vor.u32 %v4724_v16, %v3692_v14  ;;  %v108_v14 = vadd.s32 8, %v5342_v44  ;;  %v4997_v44 = vld [vmem:[%s5711_s7] ss:$0 sm:$0xff] }
 0x107   :  { %v142_v20 = vpop.xlane.xlu1 %141 }
 0x108   :  { %v151_v21 = vmul.f32 %v5327_v15, %v142_v20  ;;  %395 = vmatpush.bf16.msra.mxu2 %v3693_v19  ;;  %v3672_v20 = vld [vmem:[#allocation3 + $0x18] sm:$0xf]  ;;  %vm116_vm8 = vcmp.lt.s32.totalorder %v108_v14, 15 }
 0x109   :  { %v5356_v26 = vsel %vm116_vm8, 1.0, %v5215_v48 }
 0x10a   :  { %v5337_v22 = vsub.f32 %v5324_v8, %v151_v21  ;;  %v4720_v21 = vld [vmem:[#allocation3 + $0x20] sm:$0xf0] }
 0x10b   :  { %v3673_v24 = vor.u32 %v4720_v21, %v3672_v20 }
 0x10c   :  { %v155_v23 = vmul.f32 %v5337_v22, %v5337_v22  ;;  %396 = vmatpush.bf16.msra.mxu2 %v3681_v29 }
 0x10d   :  { %368 = vmatpush.bf16.msra.mxu0 %v3673_v24 }
 0x10e   :  { %158 = vadd.xlane.f32.xlu2 %v155_v23  ;;  %v4719_v23 = vld [vmem:[#allocation3 + $0x1c] sm:$0xf] }
 0x10f   :  { %v3677_v28 = vor.u32 %v4719_v23, %v3674_v25 }
 0x110   :  { %397 = vmatpush.bf16.msra.mxu2 %v3669_v41 }
 0x111   :  { %382 = vmatpush.bf16.msra.mxu1 %v3677_v28  ;;  %369 = vmatpush.bf16.msra.mxu0 %v3661_v35 }
 0x115   :  { %383 = vmatpush.bf16.msra.mxu1 %v3665_v40 }
 0x179   :  { %v157_v30 = vpop.xlane.xlu2 %156 }
 0x17a   :  { %v160_v31 = vmul.f32 %v157_v30, %v5327_v15 }
 0x17c   :  { %v162_v39 = vadd.f32 1e-05, %v160_v31 }
 0x17e   :  { %5001 = vrsqrt.f32 %v162_v39  ;;  %vm170_vm3 = vweird.f32 %v162_v39 }
 0x181   :  { %v159_v43 = vpop.xlane.xlu2 %158 }
 0x182   :  { %v161_v45 = vmul.f32 %v159_v43, %v5327_v15 }
 0x184   :  { %v5002_v46 = vpop.eup %5001  ;;  %v163_v47 = vadd.f32 1e-05, %v161_v45 }
 0x185   :  { %v165_v50 = vmul.f32 %v5002_v46, %v162_v39  ;;  %vm171_vm2 = vweird.f32 %v5002_v46 }
 0x186   :  { %5003 = vrsqrt.f32 %v163_v47  ;;  %vm172_vm4 = vmor %vm170_vm3, %vm171_vm2  ;;  %vm180_vm6 = vweird.f32 %v163_v47 }
 0x187   :  { %v166_v52 = vmul.f32 %v5002_v46, %v165_v50 }
 0x189   :  { %v167_v53 = vmul.f32 0.5, %v166_v52  ;;  %v226_v52 = vld [vmem:[%s5709_s5] sm:$0x7] }
 0x18b   :  { %v168_v55 = vsub.f32 1.5, %v167_v53  ;;  %v229_v53 = vperm.slane %v226_v52, 1 }
 0x18c   :  { %v5004_v56 = vpop.eup %5003 }
 0x18d   :  { %v169_v57 = vmul.f32 %v5002_v46, %v168_v55  ;;  %v175_v58 = vmul.f32 %v5004_v56, %v163_v47  ;;  %vm181_vm5 = vweird.f32 %v5004_v56 }
 0x18e   :  { %vm182_vm7 = vmor %vm180_vm6, %vm181_vm5 }
 0x18f   :  { %v173_v60 = vsel %vm172_vm4, %v5002_v46, %v169_v57  ;;  %v176_v61 = vmul.f32 %v5004_v56, %v175_v58 }
 0x190   :  { %v184_v62 = vmul.f32 %v173_v60, %v5331_v18 }
 0x191   :  { %v177_v0 = vmul.f32 0.5, %v176_v61 }
 0x192   :  { %v911_v1 = vmul.f32 %v910_v59, %v184_v62  ;;  %v188_v12 = vmul.f32 %v187_v3, %v184_v62 }
 0x193   :  { %v178_v2 = vsub.f32 1.5, %v177_v0  ;;  %v230_v0 = vperm.slane %v226_v52, 2 }
 0x194   :  { %v914_v6 = vadd.f32 %v913_v63, %v911_v1  ;;  %v191_v20 = vadd.f32 %v190_v13, %v188_v12 }
 0x195   :  { %v179_v9 = vmul.f32 %v5004_v56, %v178_v2  ;;  %v228_v2 = vperm.slane %v226_v52, 0 }
 0x196   :  { %v916_v16 = vmul.f32 %v914_v6, %v5312_v4 }
 0x197   :  { %v183_v10 = vsel %vm182_vm7, %v5004_v56, %v179_v9 }
 0x198   :  { %v185_v11 = vmul.f32 %v183_v10, %v5337_v22  ;;  %v934_v23 = vpack.c.bf16 %v916_v16, %v916_v16  ;;  %v925_v22 = vrot.slane %v916_v16, 1  ;;  %v918_v29 = vrot.slane %v916_v16, 7 }
 0x19a   :  { %v912_v18 = vmul.f32 %v910_v59, %v185_v11  ;;  %v189_v17 = vmul.f32 %v187_v3, %v185_v11  ;;  %v946_v31 = vunpack.c.l.b16 %v934_v23 }
 0x19c   :  { %v915_v19 = vadd.f32 %v913_v63, %v912_v18  ;;  %v192_v21 = vadd.f32 %v190_v13, %v189_v17 }
 0x19e   :  { %v193_v24 = vpack.c.bf16 %v192_v21, %v191_v20  ;;  %v917_v25 = vmul.f32 %v915_v19, %v5321_v7 }
 0x1a0   :  { %370 = vmatmul.bf16.vlgmr.msra.gmra.mxu0 %v193_v24  ;;  %384 = vmatmul.bf16.vlgmr.msra.gmra.mxu1 %v193_v24  ;;  %v935_v27 = vpack.c.bf16 %v917_v25, %v917_v25  ;;  %v926_v28 = vrot.slane %v917_v25, 1  ;;  %v919_v30 = vrot.slane %v917_v25, 7 }
 0x1a1   :  { %398 = vmatmul.bf16.vlgmr.msra.gmra.mxu2 %v193_v24 }
 0x1a2   :  { %v947_v32 = vunpack.c.l.b16 %v935_v27  ;;  %v928_v33 = vsel %vm927_vm10, %v925_v22, %v926_v28  ;;  %v929_v34 = vsel %vm927_vm10, %v926_v28, %v925_v22  ;;  %v921_v35 = vsel %vm920_vm9, %v918_v29, %v919_v30 }
 0x1a3   :  { %v931_v36 = vmul.f32 %v5356_v26, %v929_v34  ;;  %v936_v37 = vpack.c.bf16 %v928_v33, %v928_v33  ;;  %v922_v38 = vsel %vm920_vm9, %v919_v30, %v918_v29  ;;  %v933_v41 = vpack.c.bf16 %v921_v35, %v921_v35  ;;  %v4993_v34 = vld [vmem:[%s5706_s2] ss:$0 sm:$0xff] }
 0x1a4   :  { %v5369_v39 = vpack.c.b16 %v947_v32, %v946_v31  ;;  %v923_v40 = vmul.f32 %v5346_v49, %v922_v38  ;;  %v459_v35 = vmul.f32 %v4993_v34, %v5312_v4  ;;  %v460_v38 = vmul.f32 %v4993_v34, %v5321_v7 }
 0x1a5   :  { %v937_v42 = vpack.c.bf16 %v931_v36, %v931_v36  ;;  %v952_v45 = vunpack.c.l.b16 %v936_v37  ;;  %v941_v48 = vunpack.c.l.b16 %v933_v41 }
 0x1a6   :  { %v932_v43 = vpack.c.bf16 %v923_v40, %v923_v40  ;;  %v3754_v36 = vadd.f32 -1.0, %v459_v35 }
 0x1a7   :  { %v953_v46 = vunpack.c.l.b16 %v937_v42 }
 0x1a8   :  { %v940_v47 = vunpack.c.l.b16 %v932_v43  ;;  %v5387_v37 = vmul.f32 1e+09, %v3754_v36  ;;  %v3755_v43 = vadd.f32 -1.0, %v460_v38 }
 0x1a9   :  { %v5372_v50 = vpack.c.b16 %v953_v46, %v952_v45 }
 0x1aa   :  { %v5374_v51 = vpack.c.b16 %v941_v48, %v940_v47  ;;  %v5392_v45 = vmul.f32 1e+09, %v3755_v43 }
 0x21d   :  { %v385_v54 = vpop.f32.mrf.mxu1  ;;  %v371_v61 = vpop.f32.mrf.mxu0 }
 0x21e   :  { %v386_v55 = vadd.f32 %v385_v54, %v229_v53  ;;  %v372_v14 = vadd.f32 %v371_v61, %v228_v2 }
 0x220   :  { %406 = vxpose.xlu0.b32.start [1/2] (short) %v386_v55, 128  ;;  %v404_v25 = vpack.c.bf16 %v372_v14, %v372_v14 }
 0x222   :  { %v467_v31 = vunpack.c.l.b16 %v404_v25 }
 0x224   :  { %v399_v60 = vpop.f32.mrf.mxu2 }
 0x225   :  { %v387_v56 = vpop.f32.mrf.mxu1  ;;  %v373_v1 = vpop.f32.mrf.mxu0  ;;  %v400_v9 = vadd.f32 %v399_v60, %v230_v0 }
 0x226   :  { %v388_v57 = vadd.f32 %v387_v56, %v229_v53  ;;  %v374_v10 = vadd.f32 %v373_v1, %v228_v2 }
 0x227   :  { %v454_v20 = vpack.c.bf16 %v400_v9, %v400_v9 }
 0x228   :  { %407 = vxpose.xlu0.b32.end [2/2] (short) %v388_v57, 128  ;;  %v405_v21 = vpack.c.bf16 %v374_v10, %v374_v10 }
 0x229   :  { %v526_v28 = vunpack.c.l.b16 %v454_v20 }
 0x22a   :  { %v468_v29 = vunpack.c.l.b16 %v405_v21 }
 0x22c   :  { %v401_v63 = vpop.f32.mrf.mxu2  ;;  %v469_v33 = vpack.c.b16 %v468_v29, %v467_v31 }
 0x22d   :  { %v402_v3 = vadd.f32 %v401_v63, %v230_v0 }
 0x22f   :  { %v455_v16 = vpack.c.bf16 %v402_v3, %v402_v3 }
 0x231   :  { %v527_v22 = vunpack.c.l.b16 %v455_v16 }
 0x233   :  { %v5379_v32 = vpack.c.b16 %v527_v22, %v526_v28 }
 0x2c4   :  { %v422_v58 = vpop.trf.xlu0 }
 0x2c5   :  { %v438_v18 = vpack.c.bf16 %v422_v58, %v422_v58 }
 0x2c7   :  { %v474_v27 = vunpack.c.l.b16 %v438_v18 }
 0x2cc   :  { %v423_v59 = vpop.trf.xlu0 }
 0x2cd   :  { %v439_v12 = vpack.c.bf16 %v423_v59, %v423_v59 }
 0x2cf   :  { %v475_v23 = vunpack.c.l.b16 %v439_v12 }
 0x2d1   :  { %v478_v30 = vpack.c.b16 %v475_v23, %v474_v27 }
 0x2d4   :  { %v424_v62 = vpop.trf.xlu0 }
 0x2d5   :  { %v440_v6 = vpack.c.bf16 %v424_v62, %v424_v62 }
 0x2d7   :  { %v476_v17 = vunpack.c.l.b16 %v440_v6 }
 0x2dc   :  { %v425_v11 = vpop.trf.xlu0 }
 0x2dd   :  { %v441_v13 = vpack.c.bf16 %v425_v11, %v425_v11 }
 0x2df   :  { %v477_v19 = vunpack.c.l.b16 %v441_v13 }
 0x2e1   :  { %v479_v24 = vpack.c.b16 %v477_v19, %v476_v17 }
 0x2e3   :  { %492 = vmatpush.bf16.msra.mxu3 %v479_v24 }
 0x2e4   :  { %v426_v62 = vpop.trf.xlu0 }
 0x2e5   :  { %v442_v2 = vpack.c.bf16 %v426_v62, %v426_v62 }
 0x2e7   :  { %493 = vmatpush.bf16.msra.mxu3 %v478_v30  ;;  %v558_v11 = vunpack.c.l.b16 %v442_v2 }
 0x2ea   :  { %3756 = vmatmul.msk.bf16.vlgmr.msra.gmra.mxu3 %vm482_vm11, %v469_v33 }
 0x2eb   :  { %540 = vmatpush.bf16.msrb.mxu3 %v5379_v32 }
 0x2ec   :  { %v427_v63 = vpop.trf.xlu0 }
 0x2ed   :  { %v443_v3 = vpack.c.bf16 %v427_v63, %v427_v63 }
 0x2ef   :  { %v559_v12 = vunpack.c.l.b16 %v443_v3  ;;  %v3914_v3 = vld [vmem:[#allocation8 + $0xe0] sm:$0xf] }
 0x2f1   :  { %v562_v16 = vpack.c.b16 %v559_v12, %v558_v11  ;;  %v3898_v12 = vld [vmem:[#allocation8 + $0xc0] sm:$0xf] }
 0x2f4   :  { %v428_v0 = vpop.trf.xlu0 }
 0x2f5   :  { %v444_v1 = vpack.c.bf16 %v428_v0, %v428_v0  ;;  %v3922_v0 = vld [vmem:[#allocation8 + $0xf0] sm:$0xf] }
 0x2f7   :  { %v560_v9 = vunpack.c.l.b16 %v444_v1  ;;  %v4780_v1 = vld [vmem:[#allocation8 + $0xf4] sm:$0xf0] }
 0x2f8   :  { %v3923_v2 = vor.u32 %v4780_v1, %v3922_v0 }
 0x2fc   :  { %v429_v6 = vpop.trf.xlu0 }
 0x2fd   :  { %v445_v10 = vpack.c.bf16 %v429_v6, %v429_v6  ;;  %v4778_v6 = vld [vmem:[#allocation8 + $0xe4] sm:$0xf0] }
 0x2ff   :  { %v561_v13 = vunpack.c.l.b16 %v445_v10  ;;  %v4776_v10 = vld [vmem:[#allocation8 + $0xd4] sm:$0xf0] }
 0x301   :  { %v563_v14 = vpack.c.b16 %v561_v13, %v560_v9  ;;  %v4774_v13 = vld [vmem:[#allocation8 + $0xc4] sm:$0xf0] }
 0x303   :  { %575 = vmatpush.bf16.msra.mxu3 %v563_v14  ;;  %v3899_v14 = vor.u32 %v4774_v13, %v3898_v12 }
 0x304   :  { %v430_v18 = vpop.trf.xlu0 }
 0x305   :  { %v446_v21 = vpack.c.bf16 %v430_v18, %v430_v18  ;;  %v4772_v18 = vld [vmem:[#allocation8 + $0xb4] sm:$0xf0] }
 0x307   :  { %576 = vmatpush.bf16.msra.mxu3 %v562_v16  ;;  %v645_v27 = vunpack.c.l.b16 %v446_v21  ;;  %v3890_v16 = vld [vmem:[#allocation8 + $0xb0] sm:$0xf] }
 0x30c   :  { %v431_v17 = vpop.trf.xlu0 }
 0x30d   :  { %v447_v23 = vpack.c.bf16 %v431_v17, %v431_v17  ;;  %v3891_v17 = vor.u32 %v4772_v18, %v3890_v16 }
 0x30f   :  { %v646_v28 = vunpack.c.l.b16 %v447_v23 }
 0x311   :  { %v649_v31 = vpack.c.b16 %v646_v28, %v645_v27  ;;  %v3866_v27 = vld [vmem:[#allocation8 + $0x80] sm:$0xf]  ;;  %v4766_v28 = vld [vmem:[#allocation8 + $0x84] sm:$0xf0] }
 0x314   :  { %v432_v19 = vpop.trf.xlu0 }
 0x315   :  { %v448_v20 = vpack.c.bf16 %v432_v19, %v432_v19  ;;  %v3882_v19 = vld [vmem:[#allocation8 + $0xa0] sm:$0xf] }
 0x317   :  { %v647_v25 = vunpack.c.l.b16 %v448_v20  ;;  %v4770_v20 = vld [vmem:[#allocation8 + $0xa4] sm:$0xf0] }
 0x318   :  { %v3883_v23 = vor.u32 %v4770_v20, %v3882_v19 }
 0x31c   :  { %v433_v24 = vpop.trf.xlu0 }
 0x31d   :  { %v449_v22 = vpack.c.bf16 %v433_v24, %v433_v24  ;;  %v3874_v24 = vld [vmem:[#allocation8 + $0x90] sm:$0xf] }
 0x31f   :  { %v648_v29 = vunpack.c.l.b16 %v449_v22 }
 0x321   :  { %v650_v30 = vpack.c.b16 %v648_v29, %v647_v25  ;;  %v4768_v25 = vld [vmem:[#allocation8 + $0x94] sm:$0xf0]  ;;  %v4795_v29 = vld [vmem:[#allocation8 + $0x174] sm:$0xf] }
 0x322   :  { %v3875_v22 = vor.u32 %v4768_v25, %v3874_v24 }
 0x323   :  { %662 = vmatpush.bf16.msrb.mxu2 %v650_v30  ;;  %v3988_v30 = vld [vmem:[#allocation8 + $0x178] sm:$0xf0] }
 0x324   :  { %v434_v34 = vpop.trf.xlu0 }
 0x327   :  { %663 = vmatpush.bf16.msrb.mxu2 %v649_v31  ;;  %v3867_v31 = vor.u32 %v4766_v28, %v3866_v27 }
 0x32c   :  { %v435_v35 = vpop.trf.xlu0 }
 0x36d   :  { %v495_v40 = vpop.f32.mrf.mxu3 }
 0x36e   :  { %v496_v41 = vadd.f32 %v495_v40, %v5387_v37 }
 0x370   :  { %v501_v42 = vsel %vm500_vm12, %v496_v41, -inf }
 0x371   :  { %502 = vmax.xlane.f32.xlu1 %v501_v42 }
 0x375   :  { %v497_v46 = vpop.f32.mrf.mxu3 }
 0x376   :  { %v498_v47 = vadd.f32 %v497_v46, %v5392_v45  ;;  %v450_v46 = vpack.c.bf16 %v434_v34, %v434_v34  ;;  %v3991_v34 = vor.u32 %v4795_v29, %v3988_v30 }
 0x378   :  { %v504_v48 = vsel %vm500_vm12, %v498_v47, -inf }
 0x379   :  { %505 = vmax.xlane.f32.xlu2 %v504_v48 }
 0x3e4   :  { %v503_v52 = vpop.xlane.xlu1 %502 }
 0x3e5   :  { %v507_v53 = vsub.f32 %v496_v41, %v503_v52 }
 0x3e7   :  { %v509_v54 = vmul.f32 1.442695, %v507_v53 }
 0x3e9   :  { %5005 = vpow2.f32 %v509_v54 }
 0x3ec   :  { %v506_v55 = vpop.xlane.xlu2 %505 }
 0x3ed   :  { %v508_v56 = vsub.f32 %v498_v47, %v506_v55  ;;  %v451_v47 = vpack.c.bf16 %v435_v35, %v435_v35  ;;  %v4793_v35 = vld [vmem:[#allocation8 + $0x164] sm:$0xf] }
 0x3ef   :  { %v5006_v57 = vpop.eup %5005  ;;  %v511_v58 = vmul.f32 1.442695, %v508_v56 }
 0x3f0   :  { %v513_v59 = vsel %vm500_vm12, %v5006_v57, 0.0 }
 0x3f1   :  { %5007 = vpow2.f32 %v511_v58  ;;  %514 = vadd.xlane.f32.xlu1 %v513_v59  ;;  %v732_v58 = vunpack.c.l.b16 %v450_v46  ;;  %v733_v59 = vunpack.c.l.b16 %v451_v47  ;;  %v4787_v47 = vld [vmem:[#allocation8 + $0x134] sm:$0xf] }
 0x3f3   :  { %v736_v63 = vpack.c.b16 %v733_v59, %v732_v58  ;;  %v3940_v58 = vld [vmem:[#allocation8 + $0x118] sm:$0xf0] }
 0x3f7   :  { %v5008_v60 = vpop.eup %5007 }
 0x3f8   :  { %v516_v61 = vsel %vm500_vm12, %v5008_v60, 0.0 }
 0x3f9   :  { %517 = vadd.xlane.f32.xlu2 %v516_v61 }
 0x40a   :  { %552 = vrot.lane.b32.xlu1 %v469_v33, %s5216_s4 }
 0x411   :  { %639 = vrot.lane.b32.xlu2 %v469_v33, %s5204_s29 }
 0x419   :  { %726 = vrot.lane.b32.xlu2 %v469_v33, %s5217_s21  ;;  %v436_v33 = vpop.trf.xlu0 }
 0x41a   :  { %v452_v41 = vpack.c.bf16 %v436_v33, %v436_v33  ;;  %v3980_v33 = vld [vmem:[#allocation8 + $0x168] sm:$0xf0] }
 0x41c   :  { %v734_v48 = vunpack.c.l.b16 %v452_v41 }
 0x421   :  { %v437_v38 = vpop.trf.xlu0 }
 0x422   :  { %v453_v42 = vpack.c.bf16 %v437_v38, %v437_v38  ;;  %v4791_v38 = vld [vmem:[#allocation8 + $0x154] sm:$0xf] }
 0x424   :  { %v735_v52 = vunpack.c.l.b16 %v453_v42  ;;  %v4789_v42 = vld [vmem:[#allocation8 + $0x144] sm:$0xf] }
 0x426   :  { %v737_v61 = vpack.c.b16 %v735_v52, %v734_v48  ;;  %v3956_v48 = vld [vmem:[#allocation8 + $0x138] sm:$0xf0] }
 0x427   :  { %v3959_v52 = vor.u32 %v4787_v47, %v3956_v48 }
 0x464   :  { %v515_v36 = vpop.xlane.xlu1 %514 }
 0x465   :  { %5009 = vrcp.f32 %v515_v36  ;;  %v3983_v36 = vor.u32 %v4793_v35, %v3980_v33 }
 0x46b   :  { %v5010_v43 = vpop.eup %5009 }
 0x46c   :  { %v518_v40 = vpop.xlane.xlu2 %517  ;;  %v521_v54 = vmul.f32 %v5010_v43, %v5006_v57  ;;  %v3915_v57 = vor.u32 %v4778_v6, %v3914_v3  ;;  %v3964_v43 = vld [vmem:[#allocation8 + $0x148] sm:$0xf0] }
 0x46d   :  { %5011 = vrcp.f32 %v518_v40  ;;  %v3972_v40 = vld [vmem:[#allocation8 + $0x158] sm:$0xf0]  ;;  %v3967_v46 = vor.u32 %v4789_v42, %v3964_v43 }
 0x46e   :  { %v3975_v41 = vor.u32 %v4791_v38, %v3972_v40 }
 0x473   :  { %v5012_v53 = vpop.eup %5011 }
 0x474   :  { %v522_v55 = vmul.f32 %v5012_v53, %v5008_v60  ;;  %v640_v56 = vpop.permute.xlu2 %639  ;;  %v3906_v60 = vld [vmem:[#allocation8 + $0xd0] sm:$0xf]  ;;  %v4785_v53 = vld [vmem:[#allocation8 + $0x124] sm:$0xf] }
 0x475   :  { %3760 = vmatmul.msk.bf16.vlgmr.msrb.gmra.mxu2 %vm482_vm11, %v640_v56  ;;  %v3907_v11 = vor.u32 %v4776_v10, %v3906_v60  ;;  %v4783_v56 = vld [vmem:[#allocation8 + $0x114] sm:$0xf] }
 0x476   :  { %v523_v62 = vpack.c.bf16 %v522_v55, %v521_v54  ;;  %v3948_v54 = vld [vmem:[#allocation8 + $0x128] sm:$0xf0]  ;;  %v3943_v59 = vor.u32 %v4783_v56, %v3940_v58 }
 0x477   :  { %v3951_v55 = vor.u32 %v4785_v53, %v3948_v54 }
 0x478   :  { %3757 = vmatmul.msk.bf16.vlgmr.msrb.gmra.mxu3 %vm500_vm12, %v523_v62  ;;  %v3932_v62 = vld [vmem:[#allocation8 + $0x108] sm:$0xf0] }
 0x479   :  { %749 = vmatpush.bf16.msrb.mxu3 %v737_v61  ;;  %v4781_v61 = vld [vmem:[#allocation8 + $0x104] sm:$0xf] }
 0x47c   :  { %v553_v9 = vpop.permute.xlu1 %552  ;;  %v727_v21 = vpop.permute.xlu2 %726 }
 0x47d   :  { %750 = vmatpush.bf16.msrb.mxu3 %v736_v63  ;;  %v3935_v63 = vor.u32 %v4781_v61, %v3932_v62 }
 0x488   :  { %3758 = vmatmul.msk.bf16.vlgmr.msra.gmra.mxu3 %vm482_vm11, %v553_v9 }
 0x489   :  { %1264 = vmatpush.bf16.msra.mxu3 %v3923_v2 }
 0x48d   :  { %1265 = vmatpush.bf16.msra.mxu3 %v3915_v57 }
 0x491   :  { %1266 = vmatpush.bf16.msra.mxu3 %v3907_v11 }
 0x495   :  { %1267 = vmatpush.bf16.msra.mxu3 %v3899_v14 }
 0x498   :  { %3762 = vmatmul.msk.bf16.vlgmr.msrb.gmra.mxu3 %vm482_vm11, %v727_v21 }
 0x499   :  { %1268 = vmatpush.bf16.msra.mxu3 %v3891_v17 }
 0x49d   :  { %1269 = vmatpush.bf16.msra.mxu3 %v3883_v23 }
 0x4a1   :  { %1270 = vmatpush.bf16.msra.mxu3 %v3875_v22 }
 0x4a5   :  { %1271 = vmatpush.bf16.msra.mxu3 %v3867_v31 }
 0x4a8   :  { %1272 = vmatmul.bf16.vlgmr.msra.gmra.mxu3 %v5369_v39 }
 0x4a9   :  { %1320 = vmatpush.bf16.msrb.mxu3 %v3991_v34 }
 0x4ad   :  { %1321 = vmatpush.bf16.msrb.mxu3 %v3983_v36 }
 0x4b1   :  { %1322 = vmatpush.bf16.msrb.mxu3 %v3975_v41 }
 0x4b5   :  { %1323 = vmatpush.bf16.msrb.mxu3 %v3967_v46 }
 0x4b9   :  { %1324 = vmatpush.bf16.msrb.mxu3 %v3959_v52 }
 0x4bd   :  { %1325 = vmatpush.bf16.msrb.mxu3 %v3951_v55 }
 0x4c1   :  { %1326 = vmatpush.bf16.msrb.mxu3 %v3943_v59 }
 0x4c5   :  { %1327 = vmatpush.bf16.msrb.mxu3 %v3935_v63 }
 0x4c8   :  { %1328 = vmatmul.bf16.vlgmr.msrb.gmra.mxu3 %v5372_v50 }
 0x4f8   :  { %v665_v0 = vpop.f32.mrf.mxu2 }
 0x4f9   :  { %v666_v1 = vadd.f32 %v665_v0, %v5387_v37 }
 0x4fb   :  { %v542_v2 = vpop.f32.mrf.mxu3  ;;  %v670_v3 = vsel %vm500_vm12, %v666_v1, -inf }
 0x4fc   :  { %v547_v6 = vpack.c.bf16 %v542_v2, %v542_v2  ;;  %671 = vmax.xlane.f32.xlu2 %v670_v3 }
 0x4fe   :  { %550 = vst.msk [vmem:[#allocation2] sm:$0xf] %vm549_vm13, %v547_v6 }
 0x500   :  { %v667_v12 = vpop.f32.mrf.mxu2 }
 0x501   :  { %v668_v13 = vadd.f32 %v667_v12, %v5392_v45 }
 0x503   :  { %v544_v9 = vpop.f32.mrf.mxu3  ;;  %v673_v17 = vsel %vm500_vm12, %v668_v13, -inf }
 0x504   :  { %v548_v57 = vpack.c.bf16 %v544_v9, %v544_v9 }
 0x506   :  { %551 = vst.msk [vmem:[#allocation2 + $0x4] sm:$0xf] %vm549_vm13, %v548_v57 }
 0x50b   :  { %v578_v60 = vpop.f32.mrf.mxu3 }
 0x50c   :  { %v579_v10 = vadd.f32 %v578_v60, %v5387_v37 }
 0x50e   :  { %v583_v11 = vsel %vm500_vm12, %v579_v10, -inf }
 0x50f   :  { %584 = vmax.xlane.f32.xlu1 %v583_v11 }
 0x513   :  { %v580_v14 = vpop.f32.mrf.mxu3 }
 0x514   :  { %v581_v16 = vadd.f32 %v580_v14, %v5392_v45  ;;  %v4764_v14 = vld [vmem:[#allocation8 + $0x74] sm:$0xf0] }
 0x516   :  { %v586_v18 = vsel %vm500_vm12, %v581_v16, -inf }
 0x517   :  { %587 = vmax.xlane.f32.xlu0 %v586_v18  ;;  %674 = vmax.xlane.f32.xlu1 %v673_v17 }
 0x51b   :  { %v752_v19 = vpop.f32.mrf.mxu3 }
 0x51c   :  { %v753_v20 = vadd.f32 %v752_v19, %v5387_v37  ;;  %v3850_v19 = vld [vmem:[#allocation8 + $0x60] sm:$0xf] }
 0x51e   :  { %v757_v21 = vsel %vm500_vm12, %v753_v20, -inf }
 0x51f   :  { %758 = vmax.xlane.f32.xlu2 %v757_v21 }
 0x523   :  { %v754_v23 = vpop.f32.mrf.mxu3 }
 0x524   :  { %v755_v24 = vadd.f32 %v754_v23, %v5392_v45 }
 0x526   :  { %v760_v25 = vsel %vm500_vm12, %v755_v24, -inf }
 0x527   :  { %761 = vmax.xlane.f32.xlu1 %v760_v25 }
 0x56f   :  { %v672_v22 = vpop.xlane.xlu2 %671 }
 0x570   :  { %v676_v27 = vsub.f32 %v666_v1, %v672_v22  ;;  %v3842_v22 = vld [vmem:[#allocation8 + $0x50] sm:$0xf] }
 0x572   :  { %v678_v28 = vmul.f32 1.442695, %v676_v27  ;;  %v4760_v27 = vld [vmem:[#allocation8 + $0x54] sm:$0xf0] }
 0x574   :  { %5013 = vpow2.f32 %v678_v28  ;;  %v3986_v28 = vld [vmem:[#allocation8 + $0x170] sm:$0xf] }
 0x57a   :  { %v5421_v29 = vpop.eup %5013 }
 0x57b   :  { %v682_v30 = vsel %vm500_vm12, %v5421_v29, 0.0 }
 0x57c   :  { %683 = vadd.xlane.f32.xlu1 %v682_v30  ;;  %v4796_v30 = vld [vmem:[#allocation8 + $0x174] sm:$0xf0] }
 0x582   :  { %v585_v37 = vpop.xlane.xlu1 %584 }
 0x583   :  { %v589_v31 = vsub.f32 %v579_v10, %v585_v37  ;;  %v3843_v37 = vor.u32 %v4760_v27, %v3842_v22  ;;  %v4782_v22 = vld [vmem:[#allocation8 + $0x104] sm:$0xf0]  ;;  %v4775_v27 = vld [vmem:[#allocation8 + $0xd4] sm:$0xf] }
 0x585   :  { %v591_v34 = vmul.f32 1.442695, %v589_v31  ;;  %v3834_v31 = vld [vmem:[#allocation8 + $0x40] sm:$0xf] }
 0x587   :  { %5015 = vpow2.f32 %v591_v34  ;;  %v3987_v34 = vor.u32 %v4796_v30, %v3986_v28  ;;  %v3908_v28 = vld [vmem:[#allocation8 + $0xd8] sm:$0xf0] }
 0x58a   :  { %v675_v35 = vpop.xlane.xlu1 %674  ;;  %v588_v33 = vpop.xlane.xlu0 %587 }
 0x58b   :  { %v677_v45 = vsub.f32 %v668_v13, %v675_v35  ;;  %v590_v40 = vsub.f32 %v581_v16, %v588_v33  ;;  %v3858_v13 = vld [vmem:[#allocation8 + $0x70] sm:$0xf]  ;;  %v4758_v35 = vld [vmem:[#allocation8 + $0x44] sm:$0xf0]  ;;  %v3978_v33 = vld [vmem:[#allocation8 + $0x160] sm:$0xf] }
 0x58c   :  { %v3859_v17 = vor.u32 %v4764_v14, %v3858_v13  ;;  %v4779_v13 = vld [vmem:[#allocation8 + $0xf4] sm:$0xf]  ;;  %v3924_v14 = vld [vmem:[#allocation8 + $0xf8] sm:$0xf0] }
 0x58d   :  { %v5016_v36 = vpop.eup %5015  ;;  %v680_v38 = vmul.f32 1.442695, %v677_v45  ;;  %v593_v42 = vmul.f32 1.442695, %v590_v40  ;;  %v4794_v45 = vld [vmem:[#allocation8 + $0x164] sm:$0xf0] }
 0x58e   :  { %v595_v41 = vsel %vm500_vm12, %v5016_v36, 0.0  ;;  %v3979_v40 = vor.u32 %v4794_v45, %v3978_v33  ;;  %v4771_v33 = vld [vmem:[#allocation8 + $0xb4] sm:$0xf]  ;;  %v3892_v45 = vld [vmem:[#allocation8 + $0xb8] sm:$0xf0] }
 0x58f   :  { %596 = vadd.xlane.f32.xlu2 %v595_v41  ;;  %5017 = vpow2.f32 %v680_v38  ;;  %v3826_v38 = vld [vmem:[#allocation8 + $0x30] sm:$0xf]  ;;  %v4756_v41 = vld [vmem:[#allocation8 + $0x34] sm:$0xf0] }
 0x590   :  { %5019 = vpow2.f32 %v593_v42  ;;  %v3970_v42 = vld [vmem:[#allocation8 + $0x150] sm:$0xf] }
 0x592   :  { %v759_v43 = vpop.xlane.xlu2 %758 }
 0x593   :  { %v763_v47 = vsub.f32 %v753_v20, %v759_v43  ;;  %v4762_v20 = vld [vmem:[#allocation8 + $0x64] sm:$0xf0]  ;;  %v4792_v43 = vld [vmem:[#allocation8 + $0x154] sm:$0xf0] }
 0x594   :  { %v3851_v25 = vor.u32 %v4762_v20, %v3850_v19  ;;  %v3927_v19 = vor.u32 %v4779_v13, %v3924_v14  ;;  %v3938_v20 = vld [vmem:[#allocation8 + $0x110] sm:$0xf]  ;;  %v4741_v13 = vld [vmem:[#allocation6] sm:$0xff]  ;;  %v4763_v14 = vld [vmem:[#allocation8 + $0x74] sm:$0xf] }
 0x595   :  { %v5018_v46 = vpop.eup %5017  ;;  %v765_v52 = vmul.f32 1.442695, %v763_v47  ;;  %v3818_v47 = vld [vmem:[#allocation8 + $0x20] sm:$0xf] }
 0x596   :  { %v685_v48 = vsel %vm500_vm12, %v5018_v46, 0.0  ;;  %v5020_v53 = vpop.eup %5019 }
 0x597   :  { %686 = vadd.xlane.f32.xlu1 %v685_v48  ;;  %5021 = vpow2.f32 %v765_v52  ;;  %v598_v54 = vsel %vm500_vm12, %v5020_v53, 0.0  ;;  %v3971_v48 = vor.u32 %v4792_v43, %v3970_v42  ;;  %v4754_v52 = vld [vmem:[#allocation8 + $0x24] sm:$0xf0]  ;;  %v3876_v42 = vld [vmem:[#allocation8 + $0x98] sm:$0xf0] }
 0x59a   :  { %v762_v58 = vpop.xlane.xlu1 %761 }
 0x59b   :  { %v764_v59 = vsub.f32 %v755_v24, %v762_v58  ;;  %v3819_v58 = vor.u32 %v4754_v52, %v3818_v47  ;;  %v3868_v47 = vld [vmem:[#allocation8 + $0x88] sm:$0xf0] }
 0x59d   :  { %v5428_v55 = vpop.eup %5021  ;;  %v767_v61 = vmul.f32 1.442695, %v764_v59  ;;  %v3810_v59 = vld [vmem:[#allocation8 + $0x10] sm:$0xf] }
 0x59e   :  { %v769_v56 = vsel %vm500_vm12, %v5428_v55, 0.0 }
 0x59f   :  { %599 = vadd.xlane.f32.xlu1 %v598_v54  ;;  %5023 = vpow2.f32 %v767_v61  ;;  %v4790_v54 = vld [vmem:[#allocation8 + $0x144] sm:$0xf0] }
 0x5a5   :  { %v5438_v62 = vpop.eup %5023 }
 0x5a6   :  { %v772_v63 = vsel %vm500_vm12, %v5438_v62, 0.0 }
 0x5a7   :  { %606 = vrot.lane.b32.xlu2 %v5379_v32, %s5216_s4  ;;  %770 = vadd.xlane.f32.xlu1 %v769_v56 }
 0x5c0   :  { %693 = vrot.lane.b32.xlu1 %v5379_v32, %s5204_s29 }
 0x5c8   :  { %780 = vrot.lane.b32.xlu1 %v5379_v32, %s5217_s21 }
 0x5d0   :  { %773 = vadd.xlane.f32.xlu2 %v772_v63  ;;  %v4752_v63 = vld [vmem:[#allocation8 + $0x14] sm:$0xf0] }
 0x5ef   :  { %v684_v1 = vpop.xlane.xlu1 %683 }
 0x602   :  { %v597_v0 = vpop.xlane.xlu2 %596 }
 0x603   :  { %5025 = vrcp.f32 %v597_v0  ;;  %v3954_v0 = vld [vmem:[#allocation8 + $0x130] sm:$0xf] }
 0x609   :  { %v5026_v9 = vpop.eup %5025 }
 0x60a   :  { %v607_v2 = vpop.permute.xlu2 %606  ;;  %v687_v3 = vpop.xlane.xlu1 %686  ;;  %v603_v60 = vmul.f32 %v5026_v9, %v5016_v36 }
 0x60b   :  { %619 = vmatpush.bf16.msrb.mxu0 %v607_v2 }
 0x612   :  { %v600_v6 = vpop.xlane.xlu1 %599 }
 0x613   :  { %5027 = vrcp.f32 %v600_v6  ;;  %v3802_v6 = vld [vmem:[#allocation8] sm:$0xf] }
 0x614   :  { %5029 = vrcp.f32 %v687_v3  ;;  %v3811_v3 = vor.u32 %v4752_v63, %v3810_v59 }
 0x615   :  { %5031 = vrcp.f32 %v684_v1  ;;  %v4788_v1 = vld [vmem:[#allocation8 + $0x134] sm:$0xf0] }
 0x616   :  { %v3955_v9 = vor.u32 %v4788_v1, %v3954_v0 }
 0x619   :  { %v5028_v57 = vpop.eup %5027 }
 0x61a   :  { %v604_v10 = vmul.f32 %v5028_v57, %v5020_v53  ;;  %v771_v32 = vpop.xlane.xlu1 %770  ;;  %v5030_v12 = vpop.eup %5029  ;;  %v3962_v53 = vld [vmem:[#allocation8 + $0x140] sm:$0xf] }
 0x61b   :  { %v5032_v16 = vpop.eup %5031  ;;  %v691_v18 = vmul.f32 %v5030_v12, %v5018_v46  ;;  %v3827_v46 = vor.u32 %v4756_v41, %v3826_v38  ;;  %5033 = vrcp.f32 %v771_v32  ;;  %v3963_v61 = vor.u32 %v4790_v54, %v3962_v53  ;;  %v3884_v38 = vld [vmem:[#allocation8 + $0xa8] sm:$0xf0]  ;;  %v4767_v41 = vld [vmem:[#allocation8 + $0x94] sm:$0xf] }
 0x61c   :  { %v605_v11 = vpack.c.bf16 %v604_v10, %v603_v60  ;;  %v690_v21 = vmul.f32 %v5032_v16, %v5421_v29  ;;  %v3835_v29 = vor.u32 %v4758_v35, %v3834_v31  ;;  %v4750_v60 = vld [vmem:[#allocation8 + $0x4] sm:$0xf0]  ;;  %v3946_v10 = vld [vmem:[#allocation8 + $0x120] sm:$0xf]  ;;  %v4773_v31 = vld [vmem:[#allocation8 + $0xc4] sm:$0xf]  ;;  %v3879_v43 = vor.u32 %v4767_v41, %v3876_v42 }
 0x61d   :  { %v3804_v41 = vld [vmem:[#allocation8 + $0x8] sm:$0xf0] }
 0x61e   :  { %3759 = vmatmul.msk.bf16.vlgmr.msrb.gmra.mxu0 %vm500_vm12, %v605_v11  ;;  %v692_v24 = vpack.c.bf16 %v691_v18, %v690_v21  ;;  %v4786_v11 = vld [vmem:[#allocation8 + $0x124] sm:$0xf0]  ;;  %v3803_v18 = vor.u32 %v4750_v60, %v3802_v6  ;;  %v4784_v21 = vld [vmem:[#allocation8 + $0x114] sm:$0xf0] }
 0x61f   :  { %v4748_v6 = vld [vmem:[#allocation6 + $0x38] sm:$0xff] }
 0x620   :  { %889 = vmatpush.bf16.msrb.mxu1 %v4748_v6  ;;  %v4828_v6 = vld [vmem:[#allocation9 + $0xf8] sm:$0xff] }
 0x621   :  { %v5034_v2 = vpop.eup %5033  ;;  %1832 = vmatpush.bf16.msra.mxu3 %v4828_v6 }
 0x622   :  { %v777_v32 = vmul.f32 %v5034_v2, %v5428_v55  ;;  %v4186_v2 = vld [vmem:[%s5705_s1 + $0x10] sm:$0xff] }
 0x632   :  { %v694_v23 = vpop.permute.xlu1 %693 }
 0x633   :  { %706 = vmatpush.bf16.msra.mxu2 %v694_v23  ;;  %v4777_v23 = vld [vmem:[#allocation8 + $0xe4] sm:$0xf] }
 0x636   :  { %3761 = vmatmul.msk.bf16.vlgmr.msra.gmra.mxu2 %vm500_vm12, %v692_v24  ;;  %v3916_v24 = vld [vmem:[#allocation8 + $0xe8] sm:$0xf0] }
 0x637   :  { %1250 = vmatpush.bf16.msrb.mxu2 %v3859_v17  ;;  %v3947_v17 = vor.u32 %v4786_v11, %v3946_v10  ;;  %v3919_v55 = vor.u32 %v4777_v23, %v3916_v24  ;;  %v4745_v10 = vld [vmem:[#allocation6 + $0x20] sm:$0xff]  ;;  %v4744_v11 = vld [vmem:[#allocation6 + $0x18] sm:$0xff] }
 0x638   :  { %v3844_v23 = vld [vmem:[#allocation8 + $0x58] sm:$0xf0] }
 0x63a   :  { %v781_v36 = vpop.permute.xlu1 %780 }
 0x63b   :  { %1251 = vmatpush.bf16.msrb.mxu2 %v3851_v25  ;;  %793 = vmatpush.bf16.msra.mxu0 %v781_v36  ;;  %v3939_v25 = vor.u32 %v4784_v21, %v3938_v20  ;;  %v3895_v36 = vor.u32 %v4771_v33, %v3892_v45  ;;  %v4759_v21 = vld [vmem:[#allocation8 + $0x54] sm:$0xf]  ;;  %v3812_v45 = vld [vmem:[#allocation8 + $0x18] sm:$0xf0] }
 0x63c   :  { %v3847_v24 = vor.u32 %v4759_v21, %v3844_v23  ;;  %v4751_v33 = vld [vmem:[#allocation8 + $0x14] sm:$0xf]  ;;  %v4798_v21 = vld [vmem:[#allocation9 + $0x8] sm:$0xff] }
 0x63d   :  { %v4806_v23 = vld [vmem:[#allocation9 + $0x48] sm:$0xff] }
 0x63f   :  { %1252 = vmatpush.bf16.msrb.mxu2 %v3843_v37  ;;  %1278 = vmatpush.bf16.msrb.mxu0 %v3987_v34  ;;  %v3911_v37 = vor.u32 %v4775_v27, %v3908_v28  ;;  %v3900_v34 = vld [vmem:[#allocation8 + $0xc8] sm:$0xf0]  ;;  %v4755_v27 = vld [vmem:[#allocation8 + $0x34] sm:$0xf]  ;;  %v3828_v28 = vld [vmem:[#allocation8 + $0x38] sm:$0xf0] }
 0x640   :  { %v3903_v35 = vor.u32 %v4773_v31, %v3900_v34  ;;  %v4753_v31 = vld [vmem:[#allocation8 + $0x24] sm:$0xf]  ;;  %v3820_v34 = vld [vmem:[#allocation8 + $0x28] sm:$0xf0] }
 0x643   :  { %1253 = vmatpush.bf16.msrb.mxu2 %v3835_v29  ;;  %1279 = vmatpush.bf16.msrb.mxu0 %v3979_v40  ;;  %v774_v56 = vpop.xlane.xlu2 %773  ;;  %v4769_v29 = vld [vmem:[#allocation8 + $0xa4] sm:$0xf] }
 0x644   :  { %5035 = vrcp.f32 %v774_v56  ;;  %v3887_v40 = vor.u32 %v4769_v29, %v3884_v38  ;;  %v4185_v38 = vld [vmem:[%s5704_s0 + $0x18] sm:$0xff] }
 0x647   :  { %1254 = vmatpush.bf16.msrb.mxu2 %v3827_v46  ;;  %1280 = vmatpush.bf16.msrb.mxu0 %v3971_v48  ;;  %v4765_v46 = vld [vmem:[#allocation8 + $0x84] sm:$0xf] }
 0x648   :  { %v3871_v48 = vor.u32 %v4765_v46, %v3868_v47 }
 0x64a   :  { %v5036_v57 = vpop.eup %5035 }
 0x64b   :  { %1255 = vmatpush.bf16.msrb.mxu2 %v3819_v58  ;;  %1281 = vmatpush.bf16.msrb.mxu0 %v3963_v61  ;;  %v778_v12 = vmul.f32 %v5036_v57, %v5438_v62  ;;  %v3930_v62 = vld [vmem:[#allocation8 + $0x100] sm:$0xf]  ;;  %v4746_v57 = vld [vmem:[#allocation6 + $0x28] sm:$0xff] }
 0x64c   :  { %v3931_v30 = vor.u32 %v4782_v22, %v3930_v62 }
 0x64d   :  { %v779_v16 = vpack.c.bf16 %v778_v12, %v777_v32  ;;  %v4743_v32 = vld [vmem:[#allocation6 + $0x10] sm:$0xff]  ;;  %v4742_v12 = vld [vmem:[#allocation6 + $0x8] sm:$0xff] }
 0x64f   :  { %1256 = vmatpush.bf16.msrb.mxu2 %v3811_v3  ;;  %1282 = vmatpush.bf16.msrb.mxu0 %v3955_v9  ;;  %v4187_v3 = vld [vmem:[%s5705_s1 + $0x18] sm:$0xff] }
 0x650   :  { %3763 = vmatmul.msk.bf16.vlgmr.msra.gmra.mxu0 %vm500_vm12, %v779_v16  ;;  %v4747_v9 = vld [vmem:[#allocation6 + $0x30] sm:$0xff]  ;;  %v3860_v16 = vld [vmem:[#allocation8 + $0x78] sm:$0xf0] }
 0x651   :  { %890 = vmatpush.bf16.msrb.mxu1 %v4747_v9  ;;  %v4801_v9 = vld [vmem:[#allocation9 + $0x20] sm:$0xff] }
 0x653   :  { %1257 = vmatpush.bf16.msrb.mxu2 %v3803_v18  ;;  %1283 = vmatpush.bf16.msrb.mxu0 %v3947_v17  ;;  %v3863_v18 = vor.u32 %v4763_v14, %v3860_v16  ;;  %v4761_v17 = vld [vmem:[#allocation8 + $0x64] sm:$0xf]  ;;  %v4799_v14 = vld [vmem:[#allocation9 + $0x10] sm:$0xff] }
 0x654   :  { %v4807_v16 = vld [vmem:[#allocation9 + $0x50] sm:$0xff] }
 0x655   :  { %891 = vmatpush.bf16.msrb.mxu1 %v4746_v57  ;;  %v4809_v57 = vld [vmem:[#allocation9 + $0x60] sm:$0xff] }
 0x656   :  { %1258 = vmatmul.bf16.vlgmr.msrb.gmra.mxu2 %v5374_v51 }
 0x657   :  { %1306 = vmatpush.bf16.msra.mxu2 %v3927_v19  ;;  %1284 = vmatpush.bf16.msrb.mxu0 %v3939_v25  ;;  %v3852_v19 = vld [vmem:[#allocation8 + $0x68] sm:$0xf0]  ;;  %v4757_v25 = vld [vmem:[#allocation8 + $0x44] sm:$0xf] }
 0x658   :  { %v3855_v20 = vor.u32 %v4761_v17, %v3852_v19  ;;  %v4825_v17 = vld [vmem:[#allocation9 + $0xe0] sm:$0xff] }
 0x659   :  { %892 = vmatpush.bf16.msrb.mxu1 %v4745_v10  ;;  %v4827_v10 = vld [vmem:[#allocation9 + $0xf0] sm:$0xff] }
 0x65a   :  { %1833 = vmatpush.bf16.msra.mxu3 %v4827_v10 }
 0x65b   :  { %1307 = vmatpush.bf16.msra.mxu2 %v3919_v55  ;;  %1285 = vmatpush.bf16.msrb.mxu0 %v3931_v30  ;;  %v3836_v55 = vld [vmem:[#allocation8 + $0x48] sm:$0xf0]  ;;  %v3831_v30 = vor.u32 %v4755_v27, %v3828_v28  ;;  %v4805_v27 = vld [vmem:[#allocation9 + $0x40] sm:$0xff]  ;;  %v4815_v28 = vld [vmem:[#allocation9 + $0x90] sm:$0xff] }
 0x65c   :  { %v3839_v62 = vor.u32 %v4757_v25, %v3836_v55  ;;  %v4824_v25 = vld [vmem:[#allocation9 + $0xd8] sm:$0xff] }
 0x65d   :  { %893 = vmatpush.bf16.msrb.mxu1 %v4744_v11  ;;  %v4800_v11 = vld [vmem:[#allocation9 + $0x18] sm:$0xff] }
 0x65f   :  { %1308 = vmatpush.bf16.msra.mxu2 %v3911_v37 }
 0x660   :  { %1286 = vmatmul.bf16.vlgmr.msrb.gmra.mxu0 %v5372_v50 }
 0x661   :  { %894 = vmatpush.bf16.msrb.mxu1 %v4743_v32  ;;  %v4808_v32 = vld [vmem:[#allocation9 + $0x58] sm:$0xff] }
 0x663   :  { %1309 = vmatpush.bf16.msra.mxu2 %v3903_v35  ;;  %v3823_v35 = vor.u32 %v4753_v31, %v3820_v34  ;;  %v4844_v31 = vld [vmem:[#allocation9 + $0x178] sm:$0xff] }
 0x665   :  { %895 = vmatpush.bf16.msrb.mxu1 %v4742_v12  ;;  %v4818_v12 = vld [vmem:[#allocation9 + $0xa8] sm:$0xff] }
 0x667   :  { %1310 = vmatpush.bf16.msra.mxu2 %v3895_v36  ;;  %v3815_v36 = vor.u32 %v4751_v33, %v3812_v45  ;;  %v4814_v45 = vld [vmem:[#allocation9 + $0x88] sm:$0xff] }
 0x669   :  { %896 = vmatpush.bf16.msrb.mxu1 %v4741_v13  ;;  %v4826_v13 = vld [vmem:[#allocation9 + $0xe8] sm:$0xff] }
 0x66a   :  { %1834 = vmatpush.bf16.msra.mxu3 %v4826_v13 }
 0x66b   :  { %1311 = vmatpush.bf16.msra.mxu2 %v3887_v40  ;;  %v4749_v40 = vld [vmem:[#allocation8 + $0x4] sm:$0xf] }
 0x66c   :  { %v3807_v46 = vor.u32 %v4749_v40, %v3804_v41  ;;  %v4813_v40 = vld [vmem:[#allocation9 + $0x80] sm:$0xff] }
 0x66d   :  { %1292 = vmatpush.bf16.msra.mxu1 %v3863_v18  ;;  %v4817_v18 = vld [vmem:[#allocation9 + $0xa0] sm:$0xff] }
 0x66e   :  { %1835 = vmatpush.bf16.msra.mxu3 %v4825_v17  ;;  %v4821_v41 = vld [vmem:[#allocation9 + $0xc0] sm:$0xff] }
 0x66f   :  { %1312 = vmatpush.bf16.msra.mxu2 %v3879_v43 }
 0x671   :  { %1293 = vmatpush.bf16.msra.mxu1 %v3855_v20 }
 0x672   :  { %1836 = vmatpush.bf16.msra.mxu3 %v4824_v25  ;;  %v4829_v25 = vld [vmem:[#allocation9 + $0x100] sm:$0xff] }
 0x673   :  { %1313 = vmatpush.bf16.msra.mxu2 %v3871_v48 }
 0x675   :  { %1294 = vmatpush.bf16.msra.mxu1 %v3847_v24  ;;  %v4816_v24 = vld [vmem:[#allocation9 + $0x98] sm:$0xff] }
 0x676   :  { %1314 = vmatmul.bf16.vlgmr.msra.gmra.mxu2 %v5369_v39 }
 0x679   :  { %1295 = vmatpush.bf16.msra.mxu1 %v3839_v62 }
 0x67d   :  { %1296 = vmatpush.bf16.msra.mxu1 %v3831_v30  ;;  %v4823_v30 = vld [vmem:[#allocation9 + $0xd0] sm:$0xff] }
 0x67e   :  { %1837 = vmatpush.bf16.msra.mxu3 %v4823_v30 }
 0x681   :  { %1297 = vmatpush.bf16.msra.mxu1 %v3823_v35  ;;  %v1273_v35 = vpop.f32.mrf.mxu3 }
 0x685   :  { %1298 = vmatpush.bf16.msra.mxu1 %v3815_v36  ;;  %v4822_v36 = vld [vmem:[#allocation9 + $0xc8] sm:$0xff] }
 0x686   :  { %1838 = vmatpush.bf16.msra.mxu3 %v4822_v36 }
 0x689   :  { %1299 = vmatpush.bf16.msra.mxu1 %v3807_v46  ;;  %v4834_v46 = vld [vmem:[#allocation9 + $0x128] sm:$0xff] }
 0x68a   :  { %1839 = vmatpush.bf16.msra.mxu3 %v4821_v41 }
 0x69b   :  { %v621_v52 = vpop.f32.mrf.mxu0 }
 0x69c   :  { %v626_v61 = vpack.c.bf16 %v621_v52, %v621_v52  ;;  %v4184_v52 = vld [vmem:[%s5704_s0 + $0x10] sm:$0xff] }
 0x6a3   :  { %v623_v53 = vpop.f32.mrf.mxu0 }
 0x6a4   :  { %v627_v54 = vpack.c.bf16 %v623_v53, %v623_v53 }
 0x6a6   :  { %632 = vrot.lane.b32.xlu2 %v627_v54, %s5217_s21 }
 0x6b9   :  { %v708_v50 = vpop.f32.mrf.mxu2 }
 0x6ba   :  { %v713_v56 = vpack.c.bf16 %v708_v50, %v708_v50 }
 0x6bc   :  { %717 = vrot.lane.b32.xlu1 %v713_v56, %s5204_s29  ;;  %v4804_v56 = vld [vmem:[#allocation9 + $0x38] sm:$0xff] }
 0x6bd   :  { %1790 = vmatpush.bf16.msra.mxu0 %v4804_v56 }
 0x6c1   :  { %v710_v58 = vpop.f32.mrf.mxu2 }
 0x6c2   :  { %v714_v59 = vpack.c.bf16 %v710_v58, %v710_v58  ;;  %v4812_v58 = vld [vmem:[#allocation9 + $0x78] sm:$0xff] }
 0x6c4   :  { %719 = vrot.lane.b32.xlu1 %v714_v59, %s5204_s29 }
 0x6cc   :  { %630 = vrot.lane.b32.xlu1 %v626_v61, %s5217_s21 }
 0x6cd   :  { %v795_v63 = vpop.f32.mrf.mxu0 }
 0x6ce   :  { %v800_v0 = vpack.c.bf16 %v795_v63, %v795_v63 }
 0x6d4   :  { %804 = vrot.lane.b32.xlu1 %v800_v0, %s5216_s4  ;;  %v4803_v0 = vld [vmem:[#allocation9 + $0x30] sm:$0xff] }
 0x6d5   :  { %v797_v1 = vpop.f32.mrf.mxu0  ;;  %1791 = vmatpush.bf16.msra.mxu0 %v4803_v0 }
 0x6d6   :  { %v801_v39 = vpack.c.bf16 %v797_v1, %v797_v1  ;;  %v4811_v1 = vld [vmem:[#allocation9 + $0x70] sm:$0xff] }
 0x6d8   :  { %806 = vrot.lane.b32.xlu2 %v801_v39, %s5216_s4 }
 0x6d9   :  { %v1259_v34 = vpop.f32.mrf.mxu2 }
 0x6dc   :  { %1895 = vperm.xlu1 %4991, %v4186_v2   ;;  %v4802_v2 = vld [vmem:[#allocation9 + $0x28] sm:$0xff] }
 0x6dd   :  { %1792 = vmatpush.bf16.msra.mxu0 %v4802_v2  ;;  %v4832_v2 = vld [vmem:[#allocation9 + $0x118] sm:$0xff] }
 0x6e0   :  { %1900 = vperm.xlu2 %4992, %v4187_v3   ;;  %v4820_v3 = vld [vmem:[#allocation9 + $0xb8] sm:$0xff] }
 0x6e1   :  { %1818 = vmatpush.bf16.msrb.mxu2 %v4820_v3  ;;  %1793 = vmatpush.bf16.msra.mxu0 %v4801_v9 }
 0x6e5   :  { %1794 = vmatpush.bf16.msra.mxu0 %v4800_v11 }
 0x6e9   :  { %1795 = vmatpush.bf16.msra.mxu0 %v4799_v14 }
 0x6ed   :  { %1796 = vmatpush.bf16.msra.mxu0 %v4798_v21 }
 0x700   :  { %v633_v60 = vpop.permute.xlu2 %632 }
 0x701   :  { %638 = vst.msk [vmem:[#allocation2 + $0x4] sm:$0xf] %vm636_vm14, %v633_v60  ;;  %v4819_v60 = vld [vmem:[#allocation9 + $0xb0] sm:$0xff] }
 0x702   :  { %1819 = vmatpush.bf16.msrb.mxu2 %v4819_v60  ;;  %v4831_v60 = vld [vmem:[#allocation9 + $0x110] sm:$0xff] }
 0x706   :  { %1820 = vmatpush.bf16.msrb.mxu2 %v4818_v12 }
 0x70a   :  { %1821 = vmatpush.bf16.msrb.mxu2 %v4817_v18  ;;  %v4830_v18 = vld [vmem:[#allocation9 + $0x108] sm:$0xff] }
 0x70e   :  { %1822 = vmatpush.bf16.msrb.mxu2 %v4816_v24 }
 0x712   :  { %1823 = vmatpush.bf16.msrb.mxu2 %v4815_v28 }
 0x716   :  { %1824 = vmatpush.bf16.msrb.mxu2 %v4814_v45 }
 0x71a   :  { %1825 = vmatpush.bf16.msrb.mxu2 %v4813_v40 }
 0x72e   :  { %v718_v22 = vpop.permute.xlu1 %717 }
 0x732   :  { %v807_v37 = vpop.permute.xlu2 %806 }
 0x736   :  { %v720_v29 = vpop.permute.xlu1 %719 }
 0x737   :  { %725 = vst.msk [vmem:[#allocation2 + $0x4] sm:$0xf] %vm723_vm15, %v720_v29  ;;  %v4835_v29 = vld [vmem:[#allocation9 + $0x130] sm:$0xff] }
 0x738   :  { %812 = vst.msk [vmem:[#allocation2 + $0x4] sm:$0xf] %vm810_vm0, %v807_v37  ;;  %v4836_v37 = vld [vmem:[#allocation9 + $0x138] sm:$0xff] }
 0x73a   :  { %v5469_v42 = vpop.permute.xlu2 %1900 }
 0x73b   :  { %v5472_v43 = vmul.f32 %v4185_v38, %v5469_v42  ;;  %v4843_v38 = vld [vmem:[#allocation9 + $0x170] sm:$0xff] }
 0x73d   :  { %1907 = vadd.xlane.f32.xlu2 %v5472_v43 }
 0x73e   :  { %v631_v47 = vpop.permute.xlu1 %630 }
 0x73f   :  { %637 = vst.msk [vmem:[#allocation2] sm:$0xf] %vm636_vm14, %v631_v47  ;;  %v1287_v47 = vpop.f32.mrf.mxu0 }
 0x740   :  { %724 = vst.msk [vmem:[#allocation2] sm:$0xf] %vm723_vm15, %v718_v22  ;;  %v4797_v22 = vld [vmem:[#allocation9] sm:$0xff] }
 0x741   :  { %1797 = vmatpush.bf16.msra.mxu0 %v4797_v22 }
 0x745   :  { %1846 = vmatpush.bf16.msrb.mxu0 %v4836_v37 }
 0x746   :  { %v805_v48 = vpop.permute.xlu1 %804 }
 0x747   :  { %811 = vst.msk [vmem:[#allocation2] sm:$0xf] %vm810_vm0, %v805_v48  ;;  %v4842_v48 = vld [vmem:[#allocation9 + $0x168] sm:$0xff]  ;;  %v1289_v6 = vpop.f32.mrf.mxu0 }
 0x749   :  { %1847 = vmatpush.bf16.msrb.mxu0 %v4835_v29 }
 0x74d   :  { %1848 = vmatpush.bf16.msrb.mxu0 %v4834_v46 }
 0x74e   :  { %v5481_v53 = vpop.permute.xlu1 %1895  ;;  %v4740_v54 = vld [vmem:[#allocation2] sm:$0xff] }
 0x74f   :  { %v5484_v50 = vmul.f32 %v4184_v52, %v5481_v53  ;;  %897 = vmatmul.bf16.vlgmr.msrb.gmra.mxu1 %v4740_v54  ;;  %v1004_v52 = vld [vmem:[%s5713_s9] sm:$0x3]  ;;  %v1261_v54 = vpop.f32.mrf.mxu2 }
 0x750   :  { %1804 = vmatpush.bf16.msrb.mxu1 %v4812_v58  ;;  %v4833_v58 = vld [vmem:[#allocation9 + $0x120] sm:$0xff]  ;;  %v1006_v0 = vperm.slane %v1004_v52, 0 }
 0x751   :  { %1905 = vadd.xlane.f32.xlu1 %v5484_v50  ;;  %1849 = vmatpush.bf16.msrb.mxu0 %v4833_v58 }
 0x752   :  { %v1260_v3 = vadd.f32 %v1259_v34, %v1006_v0 }
 0x754   :  { %1805 = vmatpush.bf16.msrb.mxu1 %v4811_v1  ;;  %v1262_v1 = vadd.f32 %v1261_v54, %v1006_v0  ;;  %v1274_v13 = vadd.f32 %v1273_v35, %v1260_v3 }
 0x755   :  { %1850 = vmatpush.bf16.msrb.mxu0 %v4832_v2 }
 0x756   :  { %v1288_v17 = vadd.f32 %v1287_v47, %v1274_v13 }
 0x757   :  { %v1315_v9 = vpop.f32.mrf.mxu2 }
 0x759   :  { %1851 = vmatpush.bf16.msrb.mxu0 %v4831_v60 }
 0x75d   :  { %1852 = vmatpush.bf16.msrb.mxu0 %v4830_v18 }
 0x75f   :  { %1300 = vmatmul.bf16.vlgmr.msra.gmra.mxu1 %v5374_v51  ;;  %v4810_v51 = vld [vmem:[#allocation9 + $0x68] sm:$0xff]  ;;  %v1317_v28 = vpop.f32.mrf.mxu2 }
 0x760   :  { %1806 = vmatpush.bf16.msrb.mxu1 %v4810_v51  ;;  %v4840_v51 = vld [vmem:[#allocation9 + $0x158] sm:$0xff] }
 0x761   :  { %1853 = vmatpush.bf16.msrb.mxu0 %v4829_v25 }
 0x764   :  { %1807 = vmatpush.bf16.msrb.mxu1 %v4809_v57 }
 0x768   :  { %1808 = vmatpush.bf16.msrb.mxu1 %v4808_v32  ;;  %v4839_v32 = vld [vmem:[#allocation9 + $0x150] sm:$0xff] }
 0x76c   :  { %1809 = vmatpush.bf16.msrb.mxu1 %v4807_v16 }
 0x770   :  { %1810 = vmatpush.bf16.msrb.mxu1 %v4806_v23 }
 0x774   :  { %1811 = vmatpush.bf16.msrb.mxu1 %v4805_v27  ;;  %v4837_v27 = vld [vmem:[#allocation9 + $0x140] sm:$0xff] }
 0x778   :  { %1860 = vmatpush.bf16.msra.mxu1 %v4844_v31 }
 0x77c   :  { %1861 = vmatpush.bf16.msra.mxu1 %v4843_v38 }
 0x780   :  { %1862 = vmatpush.bf16.msra.mxu1 %v4842_v48 }
 0x7b0   :  { %v1908_v59 = vpop.xlane.xlu2 %1907 }
 0x7b1   :  { %v1910_v61 = vmul.f32 %v1908_v59, %v5327_v15  ;;  %v4841_v59 = vld [vmem:[#allocation9 + $0x160] sm:$0xff] }
 0x7b2   :  { %1863 = vmatpush.bf16.msra.mxu1 %v4841_v59 }
 0x7b3   :  { %v5490_v63 = vsub.f32 %v5472_v43, %v1910_v61  ;;  %v1275_v61 = vpop.f32.mrf.mxu3 }
 0x7b4   :  { %v1276_v10 = vadd.f32 %v1275_v61, %v1262_v1 }
 0x7b5   :  { %v1914_v39 = vmul.f32 %v5490_v63, %v5490_v63 }
 0x7b6   :  { %1864 = vmatpush.bf16.msra.mxu1 %v4840_v51  ;;  %v1290_v14 = vadd.f32 %v1289_v6, %v1276_v10 }
 0x7b7   :  { %1917 = vadd.xlane.f32.xlu2 %v1914_v39  ;;  %v1007_v39 = vperm.slane %v1004_v52, 1 }
 0x7b8   :  { %v1336_v21 = vmax.f32 %v1290_v14, 0.0 }
 0x7ba   :  { %1865 = vmatpush.bf16.msra.mxu1 %v4839_v32  ;;  %v1340_v30 = vmul.f32 %v1336_v21, %v5321_v7 }
 0x7bb   :  { %v1329_v12 = vpop.f32.mrf.mxu3 }
 0x7bc   :  { %v1344_v36 = vrot.slane %v1340_v30, 7  ;;  %v1356_v13 = vrot.slane %v1340_v30, 1 }
 0x7c3   :  { %v1331_v31 = vpop.f32.mrf.mxu3 }
 0x7c4   :  { %v1906_v19 = vpop.xlane.xlu1 %1905 }
 0x7c5   :  { %v1909_v20 = vmul.f32 %v1906_v19, %v5327_v15 }
 0x7c7   :  { %v5496_v55 = vsub.f32 %v5484_v50, %v1909_v20  ;;  %v4838_v20 = vld [vmem:[#allocation9 + $0x148] sm:$0xff] }
 0x7c8   :  { %1866 = vmatpush.bf16.msra.mxu1 %v4838_v20 }
 0x7c9   :  { %v1913_v62 = vmul.f32 %v5496_v55, %v5496_v55 }
 0x7cb   :  { %1915 = vadd.xlane.f32.xlu1 %v1913_v62  ;;  %v1334_v62 = vmax.f32 %v1288_v17, 0.0 }
 0x7cc   :  { %v5500_v33 = vpop.f32.mrf.mxu1  ;;  %1867 = vmatpush.bf16.msra.mxu1 %v4837_v27 }
 0x7cd   :  { %v1338_v35 = vmul.f32 %v1334_v62, %v5312_v4 }
 0x7cf   :  { %v1342_v40 = vrot.slane %v1338_v35, 7  ;;  %v1354_v17 = vrot.slane %v1338_v35, 1 }
 0x7d1   :  { %v1348_v46 = vsel %vm920_vm9, %v1344_v36, %v1342_v40  ;;  %v1346_v54 = vsel %vm920_vm9, %v1342_v40, %v1344_v36  ;;  %v1360_v20 = vsel %vm927_vm10, %v1356_v13, %v1354_v17  ;;  %v1358_v62 = vsel %vm927_vm10, %v1354_v17, %v1356_v13  ;;  %v4866_v36 = vld [vmem:[#allocation3 + $0xac] sm:$0xf]  ;;  %v4284_v40 = vld [vmem:[#allocation3 + $0xb0] sm:$0xf] }
 0x7d2   :  { %v1350_v2 = vmul.f32 %v5346_v49, %v1348_v46  ;;  %v4858_v13 = vld [vmem:[#allocation3 + $0x68] sm:$0xf0]  ;;  %v4242_v17 = vld [vmem:[#allocation3 + $0x6c] sm:$0xf0] }
 0x7d4   :  { %v5505_v56 = vpop.f32.mrf.mxu1 }
 0x7dc   :  { %v1301_v57 = vpop.f32.mrf.mxu1 }
 0x7dd   :  { %v1302_v11 = vadd.f32 %v1301_v57, %v1007_v39 }
 0x7df   :  { %v1316_v16 = vadd.f32 %v1315_v9, %v1302_v11 }
 0x7e1   :  { %v1330_v19 = vadd.f32 %v1329_v12, %v1316_v16 }
 0x7e3   :  { %v1335_v23 = vmax.f32 %v1330_v19, 0.0 }
 0x7e4   :  { %v1303_v24 = vpop.f32.mrf.mxu1 }
 0x7e5   :  { %v1304_v22 = vadd.f32 %v1303_v24, %v1007_v39  ;;  %v1339_v34 = vmul.f32 %v1335_v23, %v5312_v4  ;;  %v1364_v23 = vmul.f32 %v5356_v26, %v1360_v20  ;;  %v4859_v20 = vld [vmem:[#allocation3 + $0x70] sm:$0xf0] }
 0x7e7   :  { %v1318_v37 = vadd.f32 %v1317_v28, %v1304_v22  ;;  %v1368_v38 = vpack.c.bf16 %v1339_v34, %v1338_v35  ;;  %v1343_v47 = vrot.slane %v1339_v34, 7  ;;  %v1355_v14 = vrot.slane %v1339_v34, 1  ;;  %v4276_v35 = vld [vmem:[#allocation3 + $0xa8] sm:$0xf] }
 0x7e9   :  { %v1332_v45 = vadd.f32 %v1331_v31, %v1318_v37  ;;  %v1384_v58 = vunpack.c.l.b16 %v1368_v38  ;;  %v1385_v59 = vunpack.c.h.b16 %v1368_v38  ;;  %v4278_v38 = vld [vmem:[#allocation3 + $0xb4] sm:$0xf0] }
 0x7ea   :  { %v4281_v46 = vor.u32 %v4866_v36, %v4278_v38  ;;  %v4851_v36 = vld [vmem:[#allocation3 + $0x34] sm:$0xf]  ;;  %v4218_v38 = vld [vmem:[#allocation3 + $0x3c] sm:$0xf0] }
 0x7eb   :  { %v1337_v29 = vmax.f32 %v1332_v45, 0.0  ;;  %v4867_v45 = vld [vmem:[#allocation3 + $0xb0] sm:$0xf0] }
 0x7ec   :  { %2135 = vmatpush.bf16.msrb.mxu3 %v4281_v46  ;;  %v4221_v46 = vor.u32 %v4851_v36, %v4218_v38 }
 0x7ed   :  { %v1341_v41 = vmul.f32 %v1337_v29, %v5321_v7  ;;  %v4277_v29 = vor.u32 %v4867_v45, %v4276_v35  ;;  %v4216_v35 = vld [vmem:[#allocation3 + $0x30] sm:$0xf]  ;;  %v4852_v45 = vld [vmem:[#allocation3 + $0x38] sm:$0xf0] }
 0x7ef   :  { %v1345_v48 = vrot.slane %v1341_v41, 7  ;;  %v1369_v52 = vpack.c.bf16 %v1341_v41, %v1340_v30  ;;  %v1357_v60 = vrot.slane %v1341_v41, 1  ;;  %v4868_v41 = vld [vmem:[#allocation3 + $0xb8] sm:$0xf0]  ;;  %2121 = vmatpush.bf16.msra.mxu2 %v4277_v29  ;;  %v4217_v29 = vor.u32 %v4852_v45, %v4216_v35 }
 0x7f1   :  { %v1386_v61 = vunpack.c.l.b16 %v1369_v52  ;;  %v1387_v0 = vunpack.c.h.b16 %v1369_v52  ;;  %v1347_v1 = vsel %vm920_vm9, %v1343_v47, %v1345_v48  ;;  %v1349_v39 = vsel %vm920_vm9, %v1345_v48, %v1343_v47  ;;  %v4264_v48 = vld [vmem:[#allocation3 + $0x90] sm:$0xf]  ;;  %v4864_v52 = vld [vmem:[#allocation3 + $0x98] sm:$0xf0] }
 0x7f2   :  { %v1351_v51 = vmul.f32 %v5346_v49, %v1349_v39  ;;  %v1367_v3 = vpack.c.bf16 %v1347_v1, %v1346_v54  ;;  %v1361_v19 = vsel %vm927_vm10, %v1357_v60, %v1355_v14  ;;  %v1359_v24 = vsel %vm927_vm10, %v1355_v14, %v1357_v60  ;;  %v4863_v54 = vld [vmem:[#allocation3 + $0x94] sm:$0xf]  ;;  %v4862_v60 = vld [vmem:[#allocation3 + $0x88] sm:$0xf0]  ;;  %v4857_v14 = vld [vmem:[#allocation3 + $0x64] sm:$0xf] }
 0x7f3   :  { %v1388_v6 = vpack.c.b16 %v1386_v61, %v1384_v58  ;;  %v1389_v9 = vpack.c.b16 %v1387_v0, %v1385_v59  ;;  %v1365_v21 = vmul.f32 %v5356_v26, %v1361_v19  ;;  %v1370_v22 = vpack.c.bf16 %v1359_v24, %v1358_v62  ;;  %v4266_v59 = vld [vmem:[#allocation3 + $0x9c] sm:$0xf0]  ;;  %v4272_v61 = vld [vmem:[#allocation3 + $0x98] sm:$0xf]  ;;  %v4865_v0 = vld [vmem:[#allocation3 + $0xa0] sm:$0xf0] }
 0x7f4   :  { %v1366_v57 = vpack.c.bf16 %v1351_v51, %v1350_v2  ;;  %v1376_v11 = vunpack.c.l.b16 %v1367_v3  ;;  %v1377_v12 = vunpack.c.h.b16 %v1367_v3  ;;  %v4285_v47 = vor.u32 %v4868_v41, %v4284_v40  ;;  %v4252_v2 = vld [vmem:[#allocation3 + $0x78] sm:$0xf]  ;;  %v4861_v51 = vld [vmem:[#allocation3 + $0x80] sm:$0xf0]  ;;  %v4860_v3 = vld [vmem:[#allocation3 + $0x7c] sm:$0xf] }
 0x7f5   :  { %1826 = vmatmul.bf16.vlgmr.msrb.gmra.mxu2 %v1388_v6  ;;  %1840 = vmatmul.bf16.vlgmr.msra.gmra.mxu3 %v1389_v9  ;;  %v1371_v25 = vpack.c.bf16 %v1365_v21, %v1364_v23  ;;  %v1394_v30 = vunpack.c.l.b16 %v1370_v22  ;;  %v1395_v37 = vunpack.c.h.b16 %v1370_v22  ;;  %v4265_v58 = vor.u32 %v4864_v52, %v4264_v48  ;;  %v4254_v9 = vld [vmem:[#allocation3 + $0x84] sm:$0xf0]  ;;  %v4855_v62 = vld [vmem:[#allocation3 + $0x50] sm:$0xf0]  ;;  %v4854_v22 = vld [vmem:[#allocation3 + $0x4c] sm:$0xf] }
 0x7f6   :  { %v1374_v10 = vunpack.c.l.b16 %v1366_v57  ;;  %v1375_v32 = vunpack.c.h.b16 %v1366_v57  ;;  %v4269_v1 = vor.u32 %v4863_v54, %v4266_v59  ;;  %v4273_v39 = vor.u32 %v4865_v0, %v4272_v61  ;;  %v4260_v57 = vld [vmem:[#allocation3 + $0x80] sm:$0xf]  ;;  %v4248_v19 = vld [vmem:[#allocation3 + $0x68] sm:$0xf]  ;;  %v4224_v40 = vld [vmem:[#allocation3 + $0x38] sm:$0xf] }
 0x7f7   :  { %v1396_v27 = vunpack.c.l.b16 %v1371_v25  ;;  %v1397_v28 = vunpack.c.h.b16 %v1371_v25  ;;  %2122 = vmatpush.bf16.msra.mxu2 %v4265_v58  ;;  %v4253_v6 = vor.u32 %v4861_v51, %v4252_v2  ;;  %v4245_v21 = vor.u32 %v4857_v14, %v4242_v17  ;;  %v4228_v25 = vld [vmem:[#allocation3 + $0x48] sm:$0xf]  ;;  %v4853_v41 = vld [vmem:[#allocation3 + $0x40] sm:$0xf0]  ;;  %v4204_v54 = vld [vmem:[#allocation3 + $0x18] sm:$0xf] }
 0x7f8   :  { %v1378_v16 = vpack.c.b16 %v1376_v11, %v1374_v10  ;;  %v1379_v18 = vpack.c.b16 %v1377_v12, %v1375_v32  ;;  %2136 = vmatpush.bf16.msrb.mxu3 %v4269_v1  ;;  %v4257_v10 = vor.u32 %v4860_v3, %v4254_v9  ;;  %v4261_v11 = vor.u32 %v4862_v60, %v4260_v57  ;;  %v4240_v12 = vld [vmem:[#allocation3 + $0x60] sm:$0xf]  ;;  %v4849_v58 = vld [vmem:[#allocation3 + $0x20] sm:$0xf0]  ;;  %v4848_v59 = vld [vmem:[#allocation3 + $0x1c] sm:$0xf] }
 0x7f9   :  { %v1398_v31 = vpack.c.b16 %v1396_v27, %v1394_v30  ;;  %v1399_v34 = vpack.c.b16 %v1397_v28, %v1395_v37  ;;  %v4249_v23 = vor.u32 %v4859_v20, %v4248_v19  ;;  %v4229_v27 = vor.u32 %v4855_v62, %v4228_v25  ;;  %v4230_v28 = vld [vmem:[#allocation3 + $0x54] sm:$0xf0]  ;;  %v4236_v30 = vld [vmem:[#allocation3 + $0x50] sm:$0xf]  ;;  %v4856_v37 = vld [vmem:[#allocation3 + $0x58] sm:$0xf0] }
 0x7fa   :  { %1798 = vmatmul.bf16.vlgmr.msra.gmra.mxu0 %v1378_v16  ;;  %1812 = vmatmul.bf16.vlgmr.msrb.gmra.mxu1 %v1379_v18  ;;  %v4241_v18 = vor.u32 %v4858_v13, %v4240_v12  ;;  %v4189_v61 = vld [vmem:[%s5707_s3 + $0x8] sm:$0x3f]  ;;  %v4205_v0 = vor.u32 %v4849_v58, %v4204_v54  ;;  %v4206_v1 = vld [vmem:[#allocation3 + $0x24] sm:$0xf0]  ;;  %v4850_v3 = vld [vmem:[#allocation3 + $0x28] sm:$0xf0] }
 0x7fb   :  { %2149 = vmatpush.bf16.msra.mxu0 %v4285_v47  ;;  %2123 = vmatpush.bf16.msra.mxu2 %v4253_v6  ;;  %v4225_v47 = vor.u32 %v4853_v41, %v4224_v40  ;;  %v4209_v51 = vor.u32 %v4848_v59, %v4206_v1  ;;  %v1945_v9 = vadd.f32 1.0, %v4189_v61  ;;  %v4192_v60 = vld [vmem:[#allocation3] sm:$0xf]  ;;  %v4194_v12 = vld [vmem:[#allocation3 + $0xc] sm:$0xf0] }
 0x7fc   :  { %2137 = vmatpush.bf16.msrb.mxu3 %v4257_v10  ;;  %v4846_v10 = vld [vmem:[#allocation3 + $0x8] sm:$0xf0]  ;;  %v4200_v13 = vld [vmem:[#allocation3 + $0x8] sm:$0xf] }
 0x7fd   :  { %v2663_v20 = vperm.slane %v1945_v9, 4 }
 0x7ff   :  { %2150 = vmatpush.bf16.msra.mxu0 %v4273_v39  ;;  %2124 = vmatpush.bf16.msra.mxu2 %v4241_v18  ;;  %v4212_v39 = vld [vmem:[#allocation3 + $0x20] sm:$0xf]  ;;  %v4847_v18 = vld [vmem:[#allocation3 + $0x10] sm:$0xf0] }
 0x800   :  { %2138 = vmatpush.bf16.msrb.mxu3 %v4245_v21  ;;  %v4213_v6 = vor.u32 %v4850_v3, %v4212_v39  ;;  %v4201_v17 = vor.u32 %v4847_v18, %v4200_v13 }
 0x803   :  { %2151 = vmatpush.bf16.msra.mxu0 %v4261_v11  ;;  %2125 = vmatpush.bf16.msra.mxu2 %v4229_v27  ;;  %v4193_v11 = vor.u32 %v4846_v10, %v4192_v60 }
 0x807   :  { %2152 = vmatpush.bf16.msra.mxu0 %v4249_v23  ;;  %2126 = vmatpush.bf16.msra.mxu2 %v4217_v29 }
 0x80a   :  { %1854 = vmatmul.bf16.vlgmr.msrb.gmra.mxu0 %v1398_v31  ;;  %1868 = vmatmul.bf16.vlgmr.msra.gmra.mxu1 %v1399_v34  ;;  %v4233_v31 = vor.u32 %v4854_v22, %v4230_v28  ;;  %v4237_v34 = vor.u32 %v4856_v37, %v4236_v30 }
 0x80b   :  { %2127 = vmatpush.bf16.msra.mxu2 %v4205_v0 }
 0x80c   :  { %2139 = vmatpush.bf16.msrb.mxu3 %v4233_v31  ;;  %2153 = vmatpush.bf16.msra.mxu0 %v4237_v34  ;;  %v2666_v31 = vperm.slane %v4189_v61, 3 }
 0x80f   :  { %2128 = vmatpush.bf16.msra.mxu2 %v4193_v11 }
 0x810   :  { %2140 = vmatpush.bf16.msrb.mxu3 %v4221_v46  ;;  %2154 = vmatpush.bf16.msra.mxu0 %v4225_v47 }
 0x814   :  { %2141 = vmatpush.bf16.msrb.mxu3 %v4209_v51  ;;  %2155 = vmatpush.bf16.msra.mxu0 %v4213_v6 }
 0x818   :  { %2156 = vmatpush.bf16.msra.mxu0 %v4201_v17 }
 0x82a   :  { %v1918_v32 = vpop.xlane.xlu2 %1917 }
 0x82b   :  { %v1920_v16 = vmul.f32 %v1918_v32, %v5327_v15  ;;  %v4845_v32 = vld [vmem:[#allocation3 + $0x4] sm:$0xf] }
 0x82d   :  { %v5532_v24 = vadd.f32 1e-05, %v1920_v16  ;;  %v4197_v16 = vor.u32 %v4845_v32, %v4194_v12 }
 0x82f   :  { %5037 = vrsqrt.f32 %v5532_v24  ;;  %vm1939_vm2 = vweird.f32 %v5532_v24  ;;  %2142 = vmatpush.bf16.msrb.mxu3 %v4197_v16 }
 0x835   :  { %v5038_v48 = vpop.eup %5037 }
 0x836   :  { %v1934_v52 = vmul.f32 %v5038_v48, %v5532_v24  ;;  %vm1940_vm1 = vweird.f32 %v5038_v48  ;;  %v1946_v24 = vperm.slane %v1945_v9, 1 }
 0x837   :  { %vm1941_vm3 = vmor %vm1939_vm2, %vm1940_vm1 }
 0x838   :  { %v1935_v2 = vmul.f32 %v5038_v48, %v1934_v52 }
 0x83a   :  { %v1936_v57 = vmul.f32 0.5, %v1935_v2 }
 0x83c   :  { %v1937_v14 = vsub.f32 1.5, %v1936_v57 }
 0x83e   :  { %v1938_v19 = vmul.f32 %v5038_v48, %v1937_v14  ;;  %v1916_v23 = vpop.xlane.xlu1 %1915 }
 0x83f   :  { %v1919_v62 = vmul.f32 %v1916_v23, %v5327_v15  ;;  %v1949_v15 = vperm.slane %v4189_v61, 0  ;;  %v4995_v23 = vld [vmem:[%s5715_s11] ss:$0 sm:$0xff] }
 0x840   :  { %v1942_v21 = vsel %vm1941_vm3, %v5038_v48, %v1938_v19 }
 0x841   :  { %v1944_v25 = vmul.f32 %v1942_v21, %v5490_v63  ;;  %v1921_v27 = vadd.f32 1e-05, %v1919_v62 }
 0x843   :  { %v2665_v22 = vmul.f32 %v2663_v20, %v1944_v25  ;;  %5039 = vrsqrt.f32 %v1921_v27  ;;  %vm1929_vm5 = vweird.f32 %v1921_v27  ;;  %v1948_v38 = vmul.f32 %v1946_v24, %v1944_v25 }
 0x845   :  { %v2668_v45 = vadd.f32 %v2666_v31, %v2665_v22  ;;  %v1951_v52 = vadd.f32 %v1949_v15, %v1948_v38 }
 0x847   :  { %v2670_v40 = vmul.f32 %v2668_v45, %v5469_v42 }
 0x849   :  { %v5040_v28 = vpop.eup %5039  ;;  %v2686_v54 = vpack.c.bf16 %v2670_v40, %v2670_v40  ;;  %v2678_v0 = vrot.slane %v2670_v40, 1 }
 0x84a   :  { %v1924_v30 = vmul.f32 %v5040_v28, %v1921_v27  ;;  %vm1930_vm4 = vweird.f32 %v5040_v28  ;;  %v4994_v27 = vld [vmem:[%s5711_s7] ss:$0 sm:$0xff] }
 0x84b   :  { %vm1931_vm6 = vmor %vm1929_vm5, %vm1930_vm4  ;;  %v2698_v61 = vunpack.c.l.b16 %v2686_v54 }
 0x84c   :  { %v1925_v37 = vmul.f32 %v5040_v28, %v1924_v30 }
 0x84e   :  { %v1926_v34 = vmul.f32 0.5, %v1925_v37 }
 0x850   :  { %v1927_v35 = vsub.f32 1.5, %v1926_v34  ;;  %v899_v34 = vadd.f32 %v4994_v27, %v5500_v33 }
 0x852   :  { %v1928_v36 = vmul.f32 %v5040_v28, %v1927_v35  ;;  %v5073_v35 = vld [vmem:[%s5707_s3] sm:$0x3f] }
 0x854   :  { %v1932_v29 = vsel %vm1931_vm6, %v5040_v28, %v1928_v36 }
 0x855   :  { %v1943_v63 = vmul.f32 %v1932_v29, %v5496_v55  ;;  %v2672_v55 = vrot.slane %v2670_v40, 7 }
 0x857   :  { %v2664_v41 = vmul.f32 %v2663_v20, %v1943_v63  ;;  %v1947_v46 = vmul.f32 %v1946_v24, %v1943_v63  ;;  %v903_v24 = vperm.slane %v5073_v35, 2 }
 0x859   :  { %v2667_v47 = vadd.f32 %v2666_v31, %v2664_v41  ;;  %v1950_v48 = vadd.f32 %v1949_v15, %v1947_v46  ;;  %v904_v63 = vmul.f32 %v903_v24, %v899_v34 }
 0x85b   :  { %v1952_v58 = vpack.c.bf16 %v1951_v52, %v1950_v48  ;;  %v2669_v59 = vmul.f32 %v2667_v47, %v5481_v53  ;;  %v906_v47 = vmul.f32 %v904_v63, %v5312_v4  ;;  %v901_v52 = vadd.f32 %v4994_v27, %v5505_v56 }
 0x85d   :  { %2129 = vmatmul.bf16.vlgmr.msra.gmra.mxu2 %v1952_v58  ;;  %2143 = vmatmul.bf16.vlgmr.msrb.gmra.mxu3 %v1952_v58  ;;  %v2685_v1 = vpack.c.bf16 %v2669_v59, %v2669_v59  ;;  %v2677_v39 = vrot.slane %v2669_v59, 1  ;;  %v2671_v2 = vrot.slane %v2669_v59, 7 }
 0x85e   :  { %2157 = vmatmul.bf16.vlgmr.msra.gmra.mxu0 %v1952_v58  ;;  %v1876_v58 = vperm.slane %v5073_v35, 5 }
 0x85f   :  { %v2697_v51 = vunpack.c.l.b16 %v2685_v1  ;;  %v2679_v3 = vsel %vm927_vm10, %v2677_v39, %v2678_v0  ;;  %v2680_v6 = vsel %vm927_vm10, %v2678_v0, %v2677_v39  ;;  %v2673_v9 = vsel %vm920_vm9, %v2671_v2, %v2672_v55 }
 0x860   :  { %v2682_v57 = vmul.f32 %v5356_v26, %v2680_v6  ;;  %v2687_v60 = vpack.c.bf16 %v2679_v3, %v2679_v3  ;;  %v2674_v10 = vsel %vm920_vm9, %v2672_v55, %v2671_v2  ;;  %v2684_v12 = vpack.c.bf16 %v2673_v9, %v2673_v9 }
 0x861   :  { %v5554_v11 = vpack.c.b16 %v2698_v61, %v2697_v51  ;;  %v2675_v32 = vmul.f32 %v5346_v49, %v2674_v10  ;;  %v908_v1 = vadd.f32 %v906_v47, %v5315_v5  ;;  %v905_v39 = vmul.f32 %v903_v24, %v901_v52  ;;  %v1985_v5 = vld [vmem:[%s5709_s5] sm:$0x7] }
 0x862   :  { %v2688_v13 = vpack.c.bf16 %v2682_v57, %v2682_v57  ;;  %v2703_v16 = vunpack.c.l.b16 %v2687_v60  ;;  %v2692_v19 = vunpack.c.l.b16 %v2684_v12  ;;  %v1989_v12 = vperm.slane %v1985_v5, 2 }
 0x863   :  { %v2683_v14 = vpack.c.bf16 %v2675_v32, %v2675_v32  ;;  %v907_v9 = vmul.f32 %v905_v39, %v5321_v7 }
 0x864   :  { %v2704_v18 = vunpack.c.l.b16 %v2688_v13  ;;  %v1988_v13 = vperm.slane %v1985_v5, 1 }
 0x865   :  { %v2691_v17 = vunpack.c.l.b16 %v2683_v14  ;;  %v909_v60 = vadd.f32 %v907_v9, %v5324_v8 }
 0x866   :  { %v5557_v20 = vpack.c.b16 %v2704_v18, %v2703_v16 }
 0x867   :  { %v5559_v21 = vpack.c.b16 %v2692_v19, %v2691_v17  ;;  %v1987_v17 = vperm.slane %v1985_v5, 0 }
 0x877   :  { %v1799_v25 = vpop.f32.mrf.mxu0  ;;  %v1813_v62 = vpop.f32.mrf.mxu1 }
 0x878   :  { %v1800_v22 = vadd.f32 %v4995_v23, %v1799_v25  ;;  %v1827_v30 = vpop.f32.mrf.mxu2  ;;  %v1841_v29 = vpop.f32.mrf.mxu3 }
 0x87a   :  { %v1814_v28 = vadd.f32 %v1813_v62, %v1800_v22 }
 0x87c   :  { %v1828_v45 = vadd.f32 %v1827_v30, %v1814_v28 }
 0x87e   :  { %v1842_v38 = vadd.f32 %v1841_v29, %v1828_v45 }
 0x87f   :  { %v1801_v37 = vpop.f32.mrf.mxu0  ;;  %v1815_v31 = vpop.f32.mrf.mxu1 }
 0x880   :  { %v1802_v36 = vadd.f32 %v4995_v23, %v1801_v37  ;;  %v1829_v48 = vpop.f32.mrf.mxu2  ;;  %v1843_v0 = vpop.f32.mrf.mxu3 }
 0x882   :  { %v1816_v15 = vadd.f32 %v1815_v31, %v1802_v36 }
 0x884   :  { %v1830_v33 = vadd.f32 %v1829_v48, %v1816_v15 }
 0x886   :  { %v1844_v2 = vadd.f32 %v1843_v0, %v1830_v33 }
 0x887   :  { %v1855_v40 = vpop.f32.mrf.mxu0  ;;  %v1869_v41 = vpop.f32.mrf.mxu1 }
 0x888   :  { %v1856_v46 = vadd.f32 %v1855_v40, %v1842_v38 }
 0x88a   :  { %v1870_v54 = vadd.f32 %v1869_v41, %v1856_v46 }
 0x88c   :  { %v1874_v59 = vmul.f32 %v1870_v54, %v5312_v4 }
 0x88e   :  { %v1877_v55 = vmul.f32 %v1876_v58, %v1874_v59 }
 0x88f   :  { %v1857_v61 = vpop.f32.mrf.mxu0  ;;  %v1871_v6 = vpop.f32.mrf.mxu1 }
 0x890   :  { %v1879_v51 = vadd.f32 %v1877_v55, %v908_v1  ;;  %v1858_v3 = vadd.f32 %v1857_v61, %v1844_v2 }
 0x892   :  { %1881 = vst [vmem:[#allocation11] sm:$0xff] %v1879_v51  ;;  %v1872_v57 = vadd.f32 %v1871_v6, %v1858_v3 }
 0x894   :  { %v1875_v56 = vmul.f32 %v1872_v57, %v5321_v7 }
 0x896   :  { %v1878_v10 = vmul.f32 %v1876_v58, %v1875_v56 }
 0x898   :  { %v1880_v4 = vadd.f32 %v1878_v10, %v909_v60 }
 0x89a   :  { %1882 = vst [vmem:[#allocation11 + $0x8] sm:$0xff] %v1880_v4 }
 0x8db   :  { %v2158_v32 = vpop.f32.mrf.mxu0 }
 0x8dc   :  { %v2159_v14 = vadd.f32 %v2158_v32, %v1989_v12 }
 0x8de   :  { %v2213_v7 = vpack.c.bf16 %v2159_v14, %v2159_v14 }
 0x8e0   :  { %v2130_v16 = vpop.f32.mrf.mxu2  ;;  %v2144_v18 = vpop.f32.mrf.mxu3  ;;  %v2283_v22 = vunpack.c.l.b16 %v2213_v7 }
 0x8e1   :  { %v2145_v19 = vadd.f32 %v2144_v18, %v1988_v13  ;;  %v2131_v8 = vadd.f32 %v2130_v16, %v1987_v17 }
 0x8e3   :  { %v2160_v23 = vpop.f32.mrf.mxu0  ;;  %2165 = vxpose.xlu1.b32.start [1/2] (short) %v2145_v19, 128  ;;  %v2163_v37 = vpack.c.bf16 %v2131_v8, %v2131_v8 }
 0x8e4   :  { %v2161_v25 = vadd.f32 %v2160_v23, %v1989_v12 }
 0x8e5   :  { %v2226_v45 = vunpack.c.l.b16 %v2163_v37 }
 0x8e6   :  { %v2214_v62 = vpack.c.bf16 %v2161_v25, %v2161_v25 }
 0x8e8   :  { %v2284_v27 = vunpack.c.l.b16 %v2214_v62  ;;  %v2132_v28 = vpop.f32.mrf.mxu2  ;;  %v2146_v30 = vpop.f32.mrf.mxu3 }
 0x8e9   :  { %v2133_v31 = vadd.f32 %v2132_v28, %v1987_v17  ;;  %v2147_v34 = vadd.f32 %v2146_v30, %v1988_v13 }
 0x8ea   :  { %v5581_v35 = vpack.c.b16 %v2284_v27, %v2283_v22 }
 0x8eb   :  { %v2164_v24 = vpack.c.bf16 %v2133_v31, %v2133_v31  ;;  %2166 = vxpose.xlu1.b32.end [2/2] (short) %v2147_v34, 128 }
 0x8ec   :  { %2297 = vmatpush.bf16.msrb.mxu2 %v5581_v35 }
 0x8ed   :  { %v2227_v36 = vunpack.c.l.b16 %v2164_v24 }
 0x8ef   :  { %v2228_v29 = vpack.c.b16 %v2227_v36, %v2226_v45 }
 0x8f1   :  { %2394 = vrot.lane.b32.xlu0 %v2228_v29, %s5204_s29  ;;  %2308 = vrot.lane.b32.xlu2 %v2228_v29, %s5216_s4 }
 0x8f9   :  { %2480 = vrot.lane.b32.xlu2 %v2228_v29, %s5217_s21 }
 0x94b   :  { %v2309_v32 = vpop.permute.xlu2 %2308 }
 0x963   :  { %v2395_v28 = vpop.permute.xlu0 %2394 }
 0x987   :  { %v2181_v63 = vpop.trf.xlu1 }
 0x988   :  { %v2197_v48 = vpack.c.bf16 %v2181_v63, %v2181_v63 }
 0x98a   :  { %v2233_v59 = vunpack.c.l.b16 %v2197_v48 }
 0x98f   :  { %v2182_v38 = vpop.trf.xlu1 }
 0x990   :  { %v2198_v46 = vpack.c.bf16 %v2182_v38, %v2182_v38 }
 0x992   :  { %v2234_v54 = vunpack.c.l.b16 %v2198_v46 }
 0x994   :  { %v2237_v1 = vpack.c.b16 %v2234_v54, %v2233_v59  ;;  %v4438_v59 = vld [vmem:[#allocation8 + $0xd0] sm:$0xf] }
 0x997   :  { %v2183_v15 = vpop.trf.xlu1 }
 0x998   :  { %v2199_v40 = vpack.c.bf16 %v2183_v15, %v2183_v15 }
 0x99a   :  { %v2235_v52 = vunpack.c.l.b16 %v2199_v40  ;;  %v4454_v40 = vld [vmem:[#allocation8 + $0xf0] sm:$0xf] }
 0x99f   :  { %v2184_v41 = vpop.trf.xlu1 }
 0x9a0   :  { %v2200_v47 = vpack.c.bf16 %v2184_v41, %v2184_v41  ;;  %v4909_v41 = vld [vmem:[#allocation8 + $0xf4] sm:$0xf0] }
 0x9a2   :  { %v2236_v33 = vunpack.c.l.b16 %v2200_v47  ;;  %v4455_v47 = vor.u32 %v4909_v41, %v4454_v40 }
 0x9a4   :  { %v2238_v58 = vpack.c.b16 %v2236_v33, %v2235_v52  ;;  %v4446_v52 = vld [vmem:[#allocation8 + $0xe0] sm:$0xf]  ;;  %v4907_v33 = vld [vmem:[#allocation8 + $0xe4] sm:$0xf0] }
 0x9a5   :  { %v4447_v54 = vor.u32 %v4907_v33, %v4446_v52  ;;  %v4912_v52 = vld [vmem:[#allocation8 + $0x114] sm:$0xf]  ;;  %v4472_v33 = vld [vmem:[#allocation8 + $0x118] sm:$0xf0] }
 0x9a6   :  { %2250 = vmatpush.bf16.msrb.mxu1 %v2238_v58  ;;  %v2481_v58 = vpop.permute.xlu2 %2480 }
 0x9a7   :  { %v2185_v0 = vpop.trf.xlu1 }
 0x9a8   :  { %v2201_v6 = vpack.c.bf16 %v2185_v0, %v2185_v0  ;;  %v4905_v0 = vld [vmem:[#allocation8 + $0xd4] sm:$0xf0] }
 0x9aa   :  { %2251 = vmatpush.bf16.msrb.mxu1 %v2237_v1  ;;  %v2314_v10 = vunpack.c.l.b16 %v2201_v6  ;;  %v4439_v1 = vor.u32 %v4905_v0, %v4438_v59  ;;  %v4414_v6 = vld [vmem:[#allocation8 + $0xa0] sm:$0xf]  ;;  %v4464_v59 = vld [vmem:[#allocation8 + $0x108] sm:$0xf0] }
 0x9ad   :  { %4288 = vmatmul.msk.bf16.vlgmr.msrb.gmra.mxu1 %vm482_vm11, %v2228_v29 }
 0x9af   :  { %v2186_v39 = vpop.trf.xlu1 }
 0x9b0   :  { %v2202_v51 = vpack.c.bf16 %v2186_v39, %v2186_v39  ;;  %v4430_v39 = vld [vmem:[#allocation8 + $0xc0] sm:$0xf] }
 0x9b2   :  { %v2315_v56 = vunpack.c.l.b16 %v2202_v51  ;;  %v4901_v51 = vld [vmem:[#allocation8 + $0xb4] sm:$0xf0] }
 0x9b4   :  { %v2318_v5 = vpack.c.b16 %v2315_v56, %v2314_v10  ;;  %v4406_v56 = vld [vmem:[#allocation8 + $0x90] sm:$0xf]  ;;  %v4996_v10 = vld [vmem:[%s5706_s2 + $0x1] ss:$0 sm:$0xff] }
 0x9b7   :  { %v2187_v2 = vpop.trf.xlu1 }
 0x9b8   :  { %v2203_v55 = vpack.c.bf16 %v2187_v2, %v2187_v2  ;;  %v4903_v2 = vld [vmem:[#allocation8 + $0xc4] sm:$0xf0] }
 0x9ba   :  { %v2316_v9 = vunpack.c.l.b16 %v2203_v55  ;;  %v4431_v55 = vor.u32 %v4903_v2, %v4430_v39 }
 0x9bf   :  { %v2188_v61 = vpop.trf.xlu1 }
 0x9c0   :  { %v2204_v3 = vpack.c.bf16 %v2188_v61, %v2188_v61  ;;  %v4422_v61 = vld [vmem:[#allocation8 + $0xb0] sm:$0xf] }
 0x9c2   :  { %v2317_v57 = vunpack.c.l.b16 %v2204_v3  ;;  %v4423_v3 = vor.u32 %v4901_v51, %v4422_v61 }
 0x9c4   :  { %v2319_v60 = vpack.c.b16 %v2317_v57, %v2316_v9  ;;  %v4899_v9 = vld [vmem:[#allocation8 + $0xa4] sm:$0xf0] }
 0x9c5   :  { %v4415_v57 = vor.u32 %v4899_v9, %v4414_v6 }
 0x9c6   :  { %2331 = vmatpush.bf16.msra.mxu3 %v2319_v60  ;;  %v4897_v60 = vld [vmem:[#allocation8 + $0x94] sm:$0xf0] }
 0x9c7   :  { %v2189_v4 = vpop.trf.xlu1 }
 0x9c8   :  { %v2205_v19 = vpack.c.bf16 %v2189_v4, %v2189_v4  ;;  %v4407_v4 = vor.u32 %v4897_v60, %v4406_v56 }
 0x9ca   :  { %2332 = vmatpush.bf16.msra.mxu3 %v2318_v5  ;;  %v2400_v62 = vunpack.c.l.b16 %v2205_v19  ;;  %v4398_v5 = vld [vmem:[#allocation8 + $0x80] sm:$0xf]  ;;  %v4922_v19 = vld [vmem:[#allocation8 + $0x164] sm:$0xf] }
 0x9cd   :  { %4290 = vmatmul.msk.bf16.vlgmr.msra.gmra.mxu3 %vm482_vm11, %v2309_v32  ;;  %v4895_v32 = vld [vmem:[#allocation8 + $0x84] sm:$0xf0] }
 0x9cf   :  { %v2190_v12 = vpop.trf.xlu1 }
 0x9d0   :  { %v2206_v18 = vpack.c.bf16 %v2190_v12, %v2190_v12  ;;  %v4924_v12 = vld [vmem:[#allocation8 + $0x174] sm:$0xf] }
 0x9d2   :  { %v2401_v25 = vunpack.c.l.b16 %v2206_v18 }
 0x9d4   :  { %v2404_v27 = vpack.c.b16 %v2401_v25, %v2400_v62  ;;  %v4504_v62 = vld [vmem:[#allocation8 + $0x158] sm:$0xf0] }
 0x9d7   :  { %v2191_v13 = vpop.trf.xlu1 }
 0x9d8   :  { %v2207_v14 = vpack.c.bf16 %v2191_v13, %v2191_v13  ;;  %v4520_v13 = vld [vmem:[#allocation8 + $0x178] sm:$0xf0] }
 0x9d9   :  { %v4523_v18 = vor.u32 %v4924_v12, %v4520_v13 }
 0x9da   :  { %v2402_v23 = vunpack.c.l.b16 %v2207_v14  ;;  %v2218_v14 = vmul.f32 %v4996_v10, %v5481_v53 }
 0x9df   :  { %v2192_v16 = vpop.trf.xlu1 }
 0x9e0   :  { %v2208_v17 = vpack.c.bf16 %v2192_v16, %v2192_v16  ;;  %v4399_v16 = vor.u32 %v4895_v32, %v4398_v5 }
 0x9e2   :  { %v2403_v7 = vunpack.c.l.b16 %v2208_v17  ;;  %v4286_v17 = vadd.f32 -1.0, %v2218_v14 }
 0x9e4   :  { %v2405_v8 = vpack.c.b16 %v2403_v7, %v2402_v23  ;;  %v4512_v23 = vld [vmem:[#allocation8 + $0x168] sm:$0xf0]  ;;  %v2222_v25 = vmul.f32 1e+09, %v4286_v17 }
 0x9e5   :  { %v4515_v7 = vor.u32 %v4922_v19, %v4512_v23 }
 0x9e6   :  { %2417 = vmatpush.bf16.msra.mxu1 %v2405_v8  ;;  %v4920_v8 = vld [vmem:[#allocation8 + $0x154] sm:$0xf] }
 0x9e7   :  { %v2193_v22 = vpop.trf.xlu1 }
 0x9e8   :  { %v2209_v36 = vpack.c.bf16 %v2193_v22, %v2193_v22  ;;  %v2219_v22 = vmul.f32 %v4996_v10, %v5469_v42 }
 0x9ea   :  { %2418 = vmatpush.bf16.msra.mxu1 %v2404_v27  ;;  %v2486_v46 = vunpack.c.l.b16 %v2209_v36 }
 0x9ed   :  { %4292 = vmatmul.msk.bf16.vlgmr.msra.gmra.mxu1 %vm482_vm11, %v2395_v28 }
 0x9ef   :  { %v2194_v30 = vpop.trf.xlu1 }
 0x9f0   :  { %v2210_v24 = vpack.c.bf16 %v2194_v30, %v2194_v30  ;;  %v4507_v30 = vor.u32 %v4920_v8, %v4504_v62 }
 0x9f2   :  { %v2487_v38 = vunpack.c.l.b16 %v2210_v24  ;;  %v4496_v24 = vld [vmem:[#allocation8 + $0x148] sm:$0xf0] }
 0x9f4   :  { %v2490_v48 = vpack.c.b16 %v2487_v38, %v2486_v46  ;;  %v4914_v46 = vld [vmem:[#allocation8 + $0x124] sm:$0xf] }
 0x9f7   :  { %v2195_v37 = vpop.trf.xlu1 }
 0x9f8   :  { %v2211_v31 = vpack.c.bf16 %v2195_v37, %v2195_v37 }
 0x9fa   :  { %v2488_v29 = vunpack.c.l.b16 %v2211_v31  ;;  %v4287_v31 = vadd.f32 -1.0, %v2219_v22 }
 0x9fc   :  { %v2223_v36 = vmul.f32 1e+09, %v4287_v31 }
 0x9ff   :  { %v2196_v34 = vpop.trf.xlu1 }
 0xa00   :  { %v2212_v45 = vpack.c.bf16 %v2196_v34, %v2196_v34  ;;  %v4918_v34 = vld [vmem:[#allocation8 + $0x144] sm:$0xf] }
 0xa02   :  { %v2489_v63 = vunpack.c.l.b16 %v2212_v45  ;;  %v4499_v45 = vor.u32 %v4918_v34, %v4496_v24 }
 0xa04   :  { %v2491_v15 = vpack.c.b16 %v2489_v63, %v2488_v29  ;;  %v4916_v29 = vld [vmem:[#allocation8 + $0x134] sm:$0xf]  ;;  %v4488_v63 = vld [vmem:[#allocation8 + $0x138] sm:$0xf0] }
 0xa05   :  { %v4491_v40 = vor.u32 %v4916_v29, %v4488_v63 }
 0xa06   :  { %2503 = vmatpush.bf16.msrb.mxu3 %v2491_v15 }
 0xa0a   :  { %2504 = vmatpush.bf16.msrb.mxu3 %v2490_v48 }
 0xa0d   :  { %4294 = vmatmul.msk.bf16.vlgmr.msrb.gmra.mxu3 %vm482_vm11, %v2481_v58  ;;  %v4910_v58 = vld [vmem:[#allocation8 + $0x104] sm:$0xf] }
 0xa0e   :  { %3015 = vmatpush.bf16.msra.mxu3 %v4455_v47  ;;  %v4480_v47 = vld [vmem:[#allocation8 + $0x128] sm:$0xf0]  ;;  %v4467_v0 = vor.u32 %v4910_v58, %v4464_v59 }
 0xa0f   :  { %v4483_v48 = vor.u32 %v4914_v46, %v4480_v47 }
 0xa12   :  { %3016 = vmatpush.bf16.msra.mxu3 %v4447_v54  ;;  %v4475_v54 = vor.u32 %v4912_v52, %v4472_v33 }
 0xa16   :  { %3017 = vmatpush.bf16.msra.mxu3 %v4439_v1 }
 0xa1a   :  { %3018 = vmatpush.bf16.msra.mxu3 %v4431_v55 }
 0xa1e   :  { %3019 = vmatpush.bf16.msra.mxu3 %v4423_v3 }
 0xa22   :  { %3020 = vmatpush.bf16.msra.mxu3 %v4415_v57 }
 0xa26   :  { %3021 = vmatpush.bf16.msra.mxu3 %v4407_v4 }
 0xa2a   :  { %3022 = vmatpush.bf16.msra.mxu3 %v4399_v16  ;;  %v2253_v27 = vpop.f32.mrf.mxu1 }
 0xa2b   :  { %v2254_v28 = vadd.f32 %v2253_v27, %v2222_v25 }
 0xa2d   :  { %3023 = vmatmul.bf16.vlgmr.msra.gmra.mxu3 %v5554_v11  ;;  %v2258_v37 = vsel %vm500_vm12, %v2254_v28, -inf }
 0xa2e   :  { %3071 = vmatpush.bf16.msrb.mxu3 %v4523_v18  ;;  %2259 = vmax.xlane.f32.xlu0 %v2258_v37 }
 0xa32   :  { %3072 = vmatpush.bf16.msrb.mxu3 %v4515_v7  ;;  %v2255_v38 = vpop.f32.mrf.mxu1 }
 0xa33   :  { %v2256_v15 = vadd.f32 %v2255_v38, %v2223_v36 }
 0xa35   :  { %v2261_v41 = vsel %vm500_vm12, %v2256_v15, -inf }
 0xa36   :  { %3073 = vmatpush.bf16.msrb.mxu3 %v4507_v30  ;;  %2262 = vmax.xlane.f32.xlu2 %v2261_v41 }
 0xa3a   :  { %3074 = vmatpush.bf16.msrb.mxu3 %v4499_v45 }
 0xa3e   :  { %3075 = vmatpush.bf16.msrb.mxu3 %v4491_v40 }
 0xa42   :  { %3076 = vmatpush.bf16.msrb.mxu3 %v4483_v48 }
 0xa46   :  { %3077 = vmatpush.bf16.msrb.mxu3 %v4475_v54 }
 0xa4a   :  { %3078 = vmatpush.bf16.msrb.mxu3 %v4467_v0 }
 0xa4d   :  { %3079 = vmatmul.bf16.vlgmr.msrb.gmra.mxu3 %v5557_v20 }
 0xa50   :  { %v2334_v1 = vpop.f32.mrf.mxu3 }
 0xa51   :  { %v2335_v39 = vadd.f32 %v2334_v1, %v2222_v25 }
 0xa53   :  { %v2339_v2 = vsel %vm500_vm12, %v2335_v39, -inf }
 0xa54   :  { %2340 = vmax.xlane.f32.xlu1 %v2339_v2 }
 0xa58   :  { %v2336_v55 = vpop.f32.mrf.mxu3 }
 0xa59   :  { %v2337_v61 = vadd.f32 %v2336_v55, %v2223_v36 }
 0xa5b   :  { %v2342_v51 = vsel %vm500_vm12, %v2337_v61, -inf }
 0xa5c   :  { %2343 = vmax.xlane.f32.xlu0 %v2342_v51 }
 0xa6a   :  { %v2420_v3 = vpop.f32.mrf.mxu1 }
 0xa6b   :  { %v2421_v6 = vadd.f32 %v2420_v3, %v2222_v25 }
 0xa6d   :  { %v2425_v9 = vsel %vm500_vm12, %v2421_v6, -inf }
 0xa6e   :  { %2426 = vmax.xlane.f32.xlu2 %v2425_v9 }
 0xa72   :  { %v2422_v57 = vpop.f32.mrf.mxu1 }
 0xa73   :  { %v2423_v56 = vadd.f32 %v2422_v57, %v2223_v36 }
 0xa75   :  { %v2428_v60 = vsel %vm500_vm12, %v2423_v56, -inf }
 0xa76   :  { %2429 = vmax.xlane.f32.xlu0 %v2428_v60 }
 0xa90   :  { %v2506_v10 = vpop.f32.mrf.mxu3 }
 0xa91   :  { %v2507_v4 = vadd.f32 %v2506_v10, %v2222_v25 }
 0xa93   :  { %v2511_v5 = vsel %vm500_vm12, %v2507_v4, -inf }
 0xa94   :  { %2512 = vmax.xlane.f32.xlu2 %v2511_v5 }
 0xa98   :  { %v2508_v32 = vpop.f32.mrf.mxu3 }
 0xa99   :  { %v2509_v12 = vadd.f32 %v2508_v32, %v2223_v36 }
 0xa9b   :  { %v2514_v13 = vsel %vm500_vm12, %v2509_v12, -inf }
 0xa9c   :  { %2515 = vmax.xlane.f32.xlu0 %v2514_v13 }
 0xaa1   :  { %v2260_v14 = vpop.xlane.xlu0 %2259 }
 0xaa2   :  { %v2264_v16 = vsub.f32 %v2254_v28, %v2260_v14 }
 0xaa4   :  { %v2266_v18 = vmul.f32 1.442695, %v2264_v16 }
 0xaa6   :  { %5041 = vpow2.f32 %v2266_v18 }
 0xaa9   :  { %v2263_v17 = vpop.xlane.xlu2 %2262 }
 0xaaa   :  { %v2265_v19 = vsub.f32 %v2256_v15, %v2263_v17 }
 0xaac   :  { %v5042_v23 = vpop.eup %5041  ;;  %v2268_v7 = vmul.f32 1.442695, %v2265_v19 }
 0xaad   :  { %v2270_v8 = vsel %vm500_vm12, %v5042_v23, 0.0 }
 0xaae   :  { %5043 = vpow2.f32 %v2268_v7  ;;  %2271 = vadd.xlane.f32.xlu2 %v2270_v8  ;;  %v4390_v7 = vld [vmem:[#allocation8 + $0x70] sm:$0xf]  ;;  %v4893_v8 = vld [vmem:[#allocation8 + $0x74] sm:$0xf0] }
 0xab4   :  { %v5044_v25 = vpop.eup %5043 }
 0xab5   :  { %v2273_v62 = vsel %vm500_vm12, %v5044_v25, 0.0 }
 0xab6   :  { %2274 = vadd.xlane.f32.xlu0 %v2273_v62 }
 0xac7   :  { %v2341_v22 = vpop.xlane.xlu1 %2340 }
 0xac8   :  { %v2345_v27 = vsub.f32 %v2335_v39, %v2341_v22  ;;  %v4391_v22 = vor.u32 %v4893_v8, %v4390_v7 }
 0xaca   :  { %v2347_v30 = vmul.f32 1.442695, %v2345_v27  ;;  %v4382_v27 = vld [vmem:[#allocation8 + $0x60] sm:$0xf] }
 0xacc   :  { %5045 = vpow2.f32 %v2347_v30  ;;  %v4891_v30 = vld [vmem:[#allocation8 + $0x64] sm:$0xf0] }
 0xacf   :  { %v2344_v37 = vpop.xlane.xlu0 %2343 }
 0xad0   :  { %v2346_v28 = vsub.f32 %v2337_v61, %v2344_v37 }
 0xad2   :  { %v5046_v31 = vpop.eup %5045  ;;  %v2349_v34 = vmul.f32 1.442695, %v2346_v28 }
 0xad3   :  { %v2351_v24 = vsel %vm500_vm12, %v5046_v31, 0.0 }
 0xad4   :  { %5047 = vpow2.f32 %v2349_v34  ;;  %2352 = vadd.xlane.f32.xlu2 %v2351_v24  ;;  %v4383_v34 = vor.u32 %v4891_v30, %v4382_v27  ;;  %v4374_v24 = vld [vmem:[#allocation8 + $0x50] sm:$0xf]  ;;  %v4448_v27 = vld [vmem:[#allocation8 + $0xe8] sm:$0xf0] }
 0xada   :  { %v5048_v45 = vpop.eup %5047 }
 0xadb   :  { %v2354_v36 = vsel %vm500_vm12, %v5048_v45, 0.0 }
 0xadc   :  { %2355 = vadd.xlane.f32.xlu0 %v2354_v36  ;;  %v4889_v36 = vld [vmem:[#allocation8 + $0x54] sm:$0xf0] }
 0xae1   :  { %v2427_v29 = vpop.xlane.xlu2 %2426 }
 0xae2   :  { %v2431_v63 = vsub.f32 %v2421_v6, %v2427_v29  ;;  %v4518_v29 = vld [vmem:[#allocation8 + $0x170] sm:$0xf] }
 0xae4   :  { %v2433_v38 = vmul.f32 1.442695, %v2431_v63  ;;  %v4925_v63 = vld [vmem:[#allocation8 + $0x174] sm:$0xf0] }
 0xae6   :  { %5049 = vpow2.f32 %v2433_v38 }
 0xae9   :  { %v2430_v15 = vpop.xlane.xlu0 %2429 }
 0xaea   :  { %v2432_v40 = vsub.f32 %v2423_v56, %v2430_v15 }
 0xaec   :  { %v5610_v41 = vpop.eup %5049  ;;  %v2435_v46 = vmul.f32 1.442695, %v2432_v40  ;;  %2362 = vrot.lane.b32.xlu2 %v5581_v35, %s5216_s4  ;;  %v4375_v40 = vor.u32 %v4889_v36, %v4374_v24  ;;  %v4911_v24 = vld [vmem:[#allocation8 + $0x104] sm:$0xf0]  ;;  %v4440_v36 = vld [vmem:[#allocation8 + $0xd8] sm:$0xf0] }
 0xaed   :  { %v2437_v47 = vsel %vm500_vm12, %v5610_v41, 0.0 }
 0xaee   :  { %5051 = vpow2.f32 %v2435_v46  ;;  %2438 = vadd.xlane.f32.xlu0 %v2437_v47  ;;  %v4519_v46 = vor.u32 %v4925_v63, %v4518_v29  ;;  %v4366_v47 = vld [vmem:[#allocation8 + $0x40] sm:$0xf] }
 0xaf4   :  { %v5052_v48 = vpop.eup %5051 }
 0xaf5   :  { %v2440_v52 = vsel %vm500_vm12, %v5052_v48, 0.0 }
 0xaf6   :  { %2441 = vadd.xlane.f32.xlu0 %v2440_v52  ;;  %v4923_v52 = vld [vmem:[#allocation8 + $0x164] sm:$0xf0] }
 0xb07   :  { %v2513_v33 = vpop.xlane.xlu2 %2512 }
 0xb08   :  { %v2517_v54 = vsub.f32 %v2507_v4, %v2513_v33 }
 0xb0a   :  { %v2519_v58 = vmul.f32 1.442695, %v2517_v54 }
 0xb0c   :  { %5053 = vpow2.f32 %v2519_v58 }
 0xb0f   :  { %v2516_v59 = vpop.xlane.xlu0 %2515 }
 0xb10   :  { %v2518_v0 = vsub.f32 %v2509_v12, %v2516_v59 }
 0xb12   :  { %v5617_v1 = vpop.eup %5053  ;;  %v2521_v39 = vmul.f32 1.442695, %v2518_v0 }
 0xb13   :  { %v2523_v2 = vsel %vm500_vm12, %v5617_v1, 0.0 }
 0xb14   :  { %5055 = vpow2.f32 %v2521_v39  ;;  %2524 = vadd.xlane.f32.xlu0 %v2523_v2  ;;  %v4358_v39 = vld [vmem:[#allocation8 + $0x30] sm:$0xf]  ;;  %v4885_v2 = vld [vmem:[#allocation8 + $0x34] sm:$0xf0] }
 0xb1a   :  { %v5056_v55 = vpop.eup %5055 }
 0xb1b   :  { %v2526_v61 = vsel %vm500_vm12, %v5056_v55, 0.0 }
 0xb1c   :  { %2527 = vadd.xlane.f32.xlu2 %v2526_v61  ;;  %v4502_v61 = vld [vmem:[#allocation8 + $0x150] sm:$0xf] }
 0xb21   :  { %v2272_v51 = vpop.xlane.xlu2 %2271 }
 0xb22   :  { %5057 = vrcp.f32 %v2272_v51  ;;  %v4359_v51 = vor.u32 %v4885_v2, %v4358_v39  ;;  %v4894_v2 = vld [vmem:[#allocation8 + $0x84] sm:$0xf] }
 0xb28   :  { %2448 = vrot.lane.b32.xlu0 %v5581_v35, %s5204_s29  ;;  %v5058_v6 = vpop.eup %5057 }
 0xb29   :  { %v2275_v3 = vpop.xlane.xlu0 %2274  ;;  %v2278_v57 = vmul.f32 %v5058_v6, %v5042_v23  ;;  %v4350_v6 = vld [vmem:[#allocation8 + $0x20] sm:$0xf] }
 0xb2a   :  { %5059 = vrcp.f32 %v2275_v3 }
 0xb30   :  { %v5060_v9 = vpop.eup %5059  ;;  %2534 = vrot.lane.b32.xlu0 %v5581_v35, %s5217_s21 }
 0xb31   :  { %v2279_v56 = vmul.f32 %v5060_v9, %v5044_v25  ;;  %v4883_v9 = vld [vmem:[#allocation8 + $0x24] sm:$0xf0] }
 0xb33   :  { %v2280_v60 = vpack.c.bf16 %v2279_v56, %v2278_v57  ;;  %v4919_v57 = vld [vmem:[#allocation8 + $0x144] sm:$0xf0]  ;;  %v4351_v56 = vor.u32 %v4883_v9, %v4350_v6 }
 0xb35   :  { %4289 = vmatmul.msk.bf16.vlgmr.msrb.gmra.mxu2 %vm500_vm12, %v2280_v60 }
 0xb47   :  { %v2353_v10 = vpop.xlane.xlu2 %2352 }
 0xb48   :  { %5061 = vrcp.f32 %v2353_v10  ;;  %v4342_v10 = vld [vmem:[#allocation8 + $0x10] sm:$0xf] }
 0xb4e   :  { %v5062_v32 = vpop.eup %5061 }
 0xb4f   :  { %v2363_v4 = vpop.permute.xlu2 %2362  ;;  %v2356_v5 = vpop.xlane.xlu0 %2355  ;;  %v2359_v13 = vmul.f32 %v5062_v32, %v5046_v31  ;;  %v4917_v32 = vld [vmem:[#allocation8 + $0x134] sm:$0xf0] }
 0xb50   :  { %5063 = vrcp.f32 %v2356_v5  ;;  %2375 = vmatpush.bf16.msrb.mxu0 %v2363_v4  ;;  %v4881_v4 = vld [vmem:[#allocation8 + $0x14] sm:$0xf0]  ;;  %v4486_v5 = vld [vmem:[#allocation8 + $0x130] sm:$0xf] }
 0xb56   :  { %v5064_v12 = vpop.eup %5063 }
 0xb57   :  { %v2360_v14 = vmul.f32 %v5064_v12, %v5048_v45  ;;  %v4343_v12 = vor.u32 %v4881_v4, %v4342_v10 }
 0xb59   :  { %v2361_v16 = vpack.c.bf16 %v2360_v14, %v2359_v13  ;;  %v4487_v13 = vor.u32 %v4917_v32, %v4486_v5  ;;  %v4334_v14 = vld [vmem:[#allocation8] sm:$0xf] }
 0xb5b   :  { %4291 = vmatmul.msk.bf16.vlgmr.msrb.gmra.mxu0 %vm500_vm12, %v2361_v16  ;;  %v4879_v16 = vld [vmem:[#allocation8 + $0x4] sm:$0xf0] }
 0xb61   :  { %v2439_v18 = vpop.xlane.xlu0 %2438 }
 0xb69   :  { %v2442_v35 = vpop.xlane.xlu0 %2441 }
 0xb6a   :  { %5065 = vrcp.f32 %v2442_v35  ;;  %v4915_v35 = vld [vmem:[#allocation8 + $0x124] sm:$0xf0] }
 0xb6b   :  { %5067 = vrcp.f32 %v2439_v18  ;;  %v4478_v18 = vld [vmem:[#allocation8 + $0x120] sm:$0xf] }
 0xb6c   :  { %v4479_v7 = vor.u32 %v4915_v35, %v4478_v18  ;;  %v4873_v18 = vld [vmem:[#allocation6 + $0x18] sm:$0xff] }
 0xb70   :  { %v5066_v23 = vpop.eup %5065 }
 0xb71   :  { %v5068_v25 = vpop.eup %5067  ;;  %v2446_v62 = vmul.f32 %v5066_v23, %v5052_v48  ;;  %v4887_v48 = vld [vmem:[#allocation8 + $0x44] sm:$0xf0]  ;;  %v4335_v23 = vor.u32 %v4879_v16, %v4334_v14  ;;  %v4874_v16 = vld [vmem:[#allocation6 + $0x20] sm:$0xff] }
 0xb72   :  { %v2445_v37 = vmul.f32 %v5068_v25, %v5610_v41  ;;  %v4510_v41 = vld [vmem:[#allocation8 + $0x160] sm:$0xf]  ;;  %v4367_v59 = vor.u32 %v4887_v48, %v4366_v47  ;;  %v4470_v25 = vld [vmem:[#allocation8 + $0x110] sm:$0xf]  ;;  %v4900_v48 = vld [vmem:[#allocation8 + $0xb4] sm:$0xf] }
 0xb73   :  { %v4511_v0 = vor.u32 %v4923_v52, %v4510_v41  ;;  %v4424_v41 = vld [vmem:[#allocation8 + $0xb8] sm:$0xf0]  ;;  %v4875_v14 = vld [vmem:[#allocation6 + $0x28] sm:$0xff] }
 0xb74   :  { %v2447_v31 = vpack.c.bf16 %v2446_v62, %v2445_v37  ;;  %v4913_v62 = vld [vmem:[#allocation8 + $0x114] sm:$0xf0]  ;;  %v4427_v52 = vor.u32 %v4900_v48, %v4424_v41  ;;  %v4878_v41 = vld [vmem:[#allocation8 + $0x4] sm:$0xf] }
 0xb75   :  { %v4471_v37 = vor.u32 %v4913_v62, %v4470_v25  ;;  %v4890_v62 = vld [vmem:[#allocation8 + $0x64] sm:$0xf] }
 0xb87   :  { %v2525_v17 = vpop.xlane.xlu0 %2524 }
 0xb8f   :  { %v2528_v19 = vpop.xlane.xlu2 %2527 }
 0xb90   :  { %5069 = vrcp.f32 %v2528_v19  ;;  %v4456_v19 = vld [vmem:[#allocation8 + $0xf8] sm:$0xf0] }
 0xb91   :  { %5071 = vrcp.f32 %v2525_v17  ;;  %v4908_v17 = vld [vmem:[#allocation8 + $0xf4] sm:$0xf] }
 0xb92   :  { %v4459_v8 = vor.u32 %v4908_v17, %v4456_v19  ;;  %v4872_v17 = vld [vmem:[#allocation6 + $0x10] sm:$0xff]  ;;  %v4871_v19 = vld [vmem:[#allocation6 + $0x8] sm:$0xff] }
 0xb96   :  { %v5070_v45 = vpop.eup %5069 }
 0xb97   :  { %v5072_v38 = vpop.eup %5071  ;;  %v2532_v15 = vmul.f32 %v5070_v45, %v5056_v55  ;;  %v4921_v55 = vld [vmem:[#allocation8 + $0x154] sm:$0xf0]  ;;  %v4904_v45 = vld [vmem:[#allocation8 + $0xd4] sm:$0xf] }
 0xb98   :  { %v2531_v33 = vmul.f32 %v5072_v38, %v5617_v1  ;;  %v4503_v3 = vor.u32 %v4921_v55, %v4502_v61  ;;  %v4494_v1 = vld [vmem:[#allocation8 + $0x140] sm:$0xf]  ;;  %v4443_v63 = vor.u32 %v4904_v45, %v4440_v36  ;;  %v4902_v38 = vld [vmem:[#allocation8 + $0xc4] sm:$0xf]  ;;  %v4400_v61 = vld [vmem:[#allocation8 + $0x88] sm:$0xf0] }
 0xb99   :  { %v4495_v60 = vor.u32 %v4919_v57, %v4494_v1  ;;  %v4403_v55 = vor.u32 %v4894_v2, %v4400_v61  ;;  %v4884_v45 = vld [vmem:[#allocation8 + $0x34] sm:$0xf]  ;;  %v4360_v36 = vld [vmem:[#allocation8 + $0x38] sm:$0xf0] }
 0xb9a   :  { %v2449_v28 = vpop.permute.xlu0 %2448  ;;  %v2533_v58 = vpack.c.bf16 %v2532_v15, %v2531_v33  ;;  %v4432_v15 = vld [vmem:[#allocation8 + $0xc8] sm:$0xf0]  ;;  %v4898_v33 = vld [vmem:[#allocation8 + $0xa4] sm:$0xf]  ;;  %v4932_v2 = vld [vmem:[#allocation9 + $0x30] sm:$0xff] }
 0xb9b   :  { %2461 = vmatpush.bf16.msra.mxu2 %v2449_v28  ;;  %v4435_v47 = vor.u32 %v4902_v38, %v4432_v15  ;;  %v4352_v38 = vld [vmem:[#allocation8 + $0x28] sm:$0xf0]  ;;  %v4940_v61 = vld [vmem:[#allocation9 + $0x70] sm:$0xff] }
 0xb9e   :  { %4293 = vmatmul.msk.bf16.vlgmr.msra.gmra.mxu2 %vm500_vm12, %v2447_v31 }
 0xb9f   :  { %3001 = vmatpush.bf16.msrb.mxu2 %v4391_v22  ;;  %v4906_v22 = vld [vmem:[#allocation8 + $0xe4] sm:$0xf] }
 0xba0   :  { %v4451_v31 = vor.u32 %v4906_v22, %v4448_v27  ;;  %v4384_v22 = vld [vmem:[#allocation8 + $0x68] sm:$0xf0] }
 0xba1   :  { %v4387_v27 = vor.u32 %v4890_v62, %v4384_v22  ;;  %v4943_v22 = vld [vmem:[#allocation9 + $0x88] sm:$0xff] }
 0xba2   :  { %v2535_v54 = vpop.permute.xlu0 %2534 }
 0xba3   :  { %3002 = vmatpush.bf16.msrb.mxu2 %v4383_v34  ;;  %2547 = vmatpush.bf16.msra.mxu0 %v2535_v54  ;;  %v4462_v34 = vld [vmem:[#allocation8 + $0x100] sm:$0xf]  ;;  %v4416_v54 = vld [vmem:[#allocation8 + $0xa8] sm:$0xf0] }
 0xba4   :  { %v4463_v29 = vor.u32 %v4911_v24, %v4462_v34  ;;  %v4368_v34 = vld [vmem:[#allocation8 + $0x48] sm:$0xf0] }
 0xba6   :  { %4295 = vmatmul.msk.bf16.vlgmr.msra.gmra.mxu0 %vm500_vm12, %v2533_v58  ;;  %v4419_v58 = vor.u32 %v4898_v33, %v4416_v54 }
 0xba7   :  { %3003 = vmatpush.bf16.msrb.mxu2 %v4375_v40  ;;  %3029 = vmatpush.bf16.msrb.mxu0 %v4519_v46 }
 0xbab   :  { %3004 = vmatpush.bf16.msrb.mxu2 %v4367_v59  ;;  %3030 = vmatpush.bf16.msrb.mxu0 %v4511_v0  ;;  %v4896_v59 = vld [vmem:[#allocation8 + $0x94] sm:$0xf]  ;;  %v4408_v0 = vld [vmem:[#allocation8 + $0x98] sm:$0xf0] }
 0xbac   :  { %v4411_v39 = vor.u32 %v4896_v59, %v4408_v0  ;;  %v4933_v0 = vld [vmem:[#allocation9 + $0x38] sm:$0xff] }
 0xbaf   :  { %3005 = vmatpush.bf16.msrb.mxu2 %v4359_v51  ;;  %3031 = vmatpush.bf16.msrb.mxu0 %v4503_v3 }
 0xbb3   :  { %3006 = vmatpush.bf16.msrb.mxu2 %v4351_v56  ;;  %3032 = vmatpush.bf16.msrb.mxu0 %v4495_v60 }
 0xbb7   :  { %3007 = vmatpush.bf16.msrb.mxu2 %v4343_v12  ;;  %3033 = vmatpush.bf16.msrb.mxu0 %v4487_v13  ;;  %v4877_v12 = vld [vmem:[#allocation6 + $0x38] sm:$0xff]  ;;  %v4876_v13 = vld [vmem:[#allocation6 + $0x30] sm:$0xff] }
 0xbb8   :  { %v2299_v30 = vpop.f32.mrf.mxu2  ;;  %2642 = vmatpush.bf16.msrb.mxu1 %v4877_v12  ;;  %v4927_v12 = vld [vmem:[#allocation9 + $0x8] sm:$0xff] }
 0xbb9   :  { %v2304_v28 = vpack.c.bf16 %v2299_v30, %v2299_v30  ;;  %v4888_v30 = vld [vmem:[#allocation8 + $0x54] sm:$0xf] }
 0xbbb   :  { %3008 = vmatpush.bf16.msrb.mxu2 %v4335_v23  ;;  %3034 = vmatpush.bf16.msrb.mxu0 %v4479_v7  ;;  %2306 = vst.msk [vmem:[#allocation2] sm:$0xf] %vm549_vm13, %v2304_v28  ;;  %v4870_v23 = vld [vmem:[#allocation6] sm:$0xff]  ;;  %v4892_v7 = vld [vmem:[#allocation8 + $0x74] sm:$0xf] }
 0xbbc   :  { %2643 = vmatpush.bf16.msrb.mxu1 %v4876_v13  ;;  %v4886_v28 = vld [vmem:[#allocation8 + $0x44] sm:$0xf]  ;;  %v4935_v13 = vld [vmem:[#allocation9 + $0x48] sm:$0xff] }
 0xbbd   :  { %v4371_v24 = vor.u32 %v4886_v28, %v4368_v34  ;;  %v4942_v28 = vld [vmem:[#allocation9 + $0x80] sm:$0xff]  ;;  %v4963_v34 = vld [vmem:[#allocation9 + $0x128] sm:$0xff] }
 0xbbe   :  { %3009 = vmatmul.bf16.vlgmr.msrb.gmra.mxu2 %v5559_v21 }
 0xbbf   :  { %3057 = vmatpush.bf16.msra.mxu2 %v4459_v8  ;;  %3035 = vmatpush.bf16.msrb.mxu0 %v4471_v37  ;;  %v4392_v8 = vld [vmem:[#allocation8 + $0x78] sm:$0xf0] }
 0xbc0   :  { %v2301_v40 = vpop.f32.mrf.mxu2  ;;  %2644 = vmatpush.bf16.msrb.mxu1 %v4875_v14  ;;  %v4395_v25 = vor.u32 %v4892_v7, %v4392_v8  ;;  %v4376_v37 = vld [vmem:[#allocation8 + $0x58] sm:$0xf0] }
 0xbc1   :  { %v2305_v46 = vpack.c.bf16 %v2301_v40, %v2301_v40  ;;  %v4880_v40 = vld [vmem:[#allocation8 + $0x14] sm:$0xf]  ;;  %v4945_v14 = vld [vmem:[#allocation9 + $0x98] sm:$0xff] }
 0xbc2   :  { %v4965_v7 = vld [vmem:[#allocation9 + $0x138] sm:$0xff] }
 0xbc3   :  { %3058 = vmatpush.bf16.msra.mxu2 %v4451_v31  ;;  %3036 = vmatpush.bf16.msrb.mxu0 %v4463_v29  ;;  %2307 = vst.msk [vmem:[#allocation2 + $0x4] sm:$0xf] %vm549_vm13, %v2305_v46  ;;  %v4379_v31 = vor.u32 %v4888_v30, %v4376_v37  ;;  %v4363_v29 = vor.u32 %v4884_v45, %v4360_v36  ;;  %v4344_v46 = vld [vmem:[#allocation8 + $0x18] sm:$0xf0]  ;;  %v4964_v30 = vld [vmem:[#allocation9 + $0x130] sm:$0xff] }
 0xbc4   :  { %2645 = vmatpush.bf16.msrb.mxu1 %v4874_v16  ;;  %v4347_v48 = vor.u32 %v4880_v40, %v4344_v46  ;;  %v4953_v16 = vld [vmem:[#allocation9 + $0xd8] sm:$0xff]  ;;  %v4972_v37 = vld [vmem:[#allocation9 + $0x170] sm:$0xff]  ;;  %v4970_v40 = vld [vmem:[#allocation9 + $0x160] sm:$0xff] }
 0xbc5   :  { %v4973_v8 = vld [vmem:[#allocation9 + $0x178] sm:$0xff] }
 0xbc6   :  { %3037 = vmatmul.bf16.vlgmr.msrb.gmra.mxu0 %v5557_v20  ;;  %v2755_v45 = vld [vmem:[%s5713_s9] sm:$0x3] }
 0xbc7   :  { %3059 = vmatpush.bf16.msra.mxu2 %v4443_v63  ;;  %v4882_v63 = vld [vmem:[#allocation8 + $0x24] sm:$0xf]  ;;  %3541 = vmatpush.bf16.msra.mxu0 %v4933_v0 }
 0xbc8   :  { %2646 = vmatpush.bf16.msrb.mxu1 %v4873_v18  ;;  %v4355_v15 = vor.u32 %v4882_v63, %v4352_v38  ;;  %v4926_v18 = vld [vmem:[#allocation9] sm:$0xff]  ;;  %v2757_v38 = vperm.slane %v2755_v45, 0 }
 0xbcb   :  { %3060 = vmatpush.bf16.msra.mxu2 %v4435_v47  ;;  %3542 = vmatpush.bf16.msra.mxu0 %v4932_v2  ;;  %v4960_v2 = vld [vmem:[#allocation9 + $0x110] sm:$0xff] }
 0xbcc   :  { %2647 = vmatpush.bf16.msrb.mxu1 %v4872_v17  ;;  %v4944_v17 = vld [vmem:[#allocation9 + $0x90] sm:$0xff] }
 0xbcf   :  { %3061 = vmatpush.bf16.msra.mxu2 %v4427_v52  ;;  %v4336_v52 = vld [vmem:[#allocation8 + $0x8] sm:$0xf0] }
 0xbd0   :  { %2648 = vmatpush.bf16.msrb.mxu1 %v4871_v19  ;;  %v4339_v33 = vor.u32 %v4878_v41, %v4336_v52  ;;  %v2758_v41 = vperm.slane %v2755_v45, 1  ;;  %v4961_v52 = vld [vmem:[#allocation9 + $0x118] sm:$0xff] }
 0xbd3   :  { %3062 = vmatpush.bf16.msra.mxu2 %v4419_v58 }
 0xbd4   :  { %2649 = vmatpush.bf16.msrb.mxu1 %v4870_v23  ;;  %v4952_v23 = vld [vmem:[#allocation9 + $0xd0] sm:$0xff] }
 0xbd7   :  { %3063 = vmatpush.bf16.msra.mxu2 %v4411_v39  ;;  %v4941_v39 = vld [vmem:[#allocation9 + $0x78] sm:$0xff] }
 0xbd8   :  { %v2377_v51 = vpop.f32.mrf.mxu0  ;;  %3043 = vmatpush.bf16.msra.mxu1 %v4395_v25  ;;  %v3024_v25 = vpop.f32.mrf.mxu3 }
 0xbd9   :  { %v2382_v3 = vpack.c.bf16 %v2377_v51, %v2377_v51  ;;  %v4939_v51 = vld [vmem:[#allocation9 + $0x68] sm:$0xff] }
 0xbdb   :  { %3064 = vmatpush.bf16.msra.mxu2 %v4403_v55  ;;  %2386 = vrot.lane.b32.xlu0 %v2382_v3, %s5217_s21  ;;  %v4931_v55 = vld [vmem:[#allocation9 + $0x28] sm:$0xff]  ;;  %v4949_v3 = vld [vmem:[#allocation9 + $0xb8] sm:$0xff] }
 0xbdc   :  { %3044 = vmatpush.bf16.msra.mxu1 %v4387_v27  ;;  %3543 = vmatpush.bf16.msra.mxu0 %v4931_v55  ;;  %v4951_v27 = vld [vmem:[#allocation9 + $0xc8] sm:$0xff] }
 0xbde   :  { %3065 = vmatmul.bf16.vlgmr.msra.gmra.mxu2 %v5554_v11 }
 0xbdf   :  { %3569 = vmatpush.bf16.msrb.mxu2 %v4949_v3 }
 0xbe0   :  { %v2379_v20 = vpop.f32.mrf.mxu0  ;;  %3045 = vmatpush.bf16.msra.mxu1 %v4379_v31  ;;  %v4950_v31 = vld [vmem:[#allocation9 + $0xc0] sm:$0xff]  ;;  %v3026_v46 = vpop.f32.mrf.mxu3 }
 0xbe1   :  { %v2383_v6 = vpack.c.bf16 %v2379_v20, %v2379_v20  ;;  %v4957_v20 = vld [vmem:[#allocation9 + $0xf8] sm:$0xff] }
 0xbe2   :  { %3583 = vmatpush.bf16.msra.mxu3 %v4957_v20 }
 0xbe3   :  { %2388 = vrot.lane.b32.xlu0 %v2383_v6, %s5217_s21  ;;  %v4930_v6 = vld [vmem:[#allocation9 + $0x20] sm:$0xff] }
 0xbe4   :  { %3046 = vmatpush.bf16.msra.mxu1 %v4371_v24  ;;  %3544 = vmatpush.bf16.msra.mxu0 %v4930_v6  ;;  %v4971_v24 = vld [vmem:[#allocation9 + $0x168] sm:$0xff] }
 0xbe8   :  { %3047 = vmatpush.bf16.msra.mxu1 %v4363_v29  ;;  %v3080_v55 = vpop.f32.mrf.mxu3 }
 0xbec   :  { %3048 = vmatpush.bf16.msra.mxu1 %v4355_v15  ;;  %v4962_v15 = vld [vmem:[#allocation9 + $0x120] sm:$0xff] }
 0xbf0   :  { %3049 = vmatpush.bf16.msra.mxu1 %v4347_v48 }
 0xbf4   :  { %3050 = vmatpush.bf16.msra.mxu1 %v4339_v33  ;;  %v4969_v33 = vld [vmem:[#allocation9 + $0x158] sm:$0xff] }
 0xc21   :  { %v2463_v9 = vpop.f32.mrf.mxu2 }
 0xc22   :  { %v2468_v1 = vpack.c.bf16 %v2463_v9, %v2463_v9  ;;  %v4938_v9 = vld [vmem:[#allocation9 + $0x60] sm:$0xff] }
 0xc23   :  { %v2549_v60 = vpop.f32.mrf.mxu0 }
 0xc24   :  { %2472 = vrot.lane.b32.xlu2 %v2468_v1, %s5204_s29  ;;  %v2554_v10 = vpack.c.bf16 %v2549_v60, %v2549_v60  ;;  %v4948_v1 = vld [vmem:[#allocation9 + $0xb0] sm:$0xff]  ;;  %v4947_v60 = vld [vmem:[#allocation9 + $0xa8] sm:$0xff] }
 0xc25   :  { %3570 = vmatpush.bf16.msrb.mxu2 %v4948_v1  ;;  %v4959_v1 = vld [vmem:[#allocation9 + $0x108] sm:$0xff] }
 0xc29   :  { %v2465_v57 = vpop.f32.mrf.mxu2  ;;  %3571 = vmatpush.bf16.msrb.mxu2 %v4947_v60 }
 0xc2a   :  { %v2469_v56 = vpack.c.bf16 %v2465_v57, %v2465_v57  ;;  %v4929_v57 = vld [vmem:[#allocation9 + $0x18] sm:$0xff] }
 0xc2b   :  { %v2551_v11 = vpop.f32.mrf.mxu0  ;;  %3545 = vmatpush.bf16.msra.mxu0 %v4929_v57 }
 0xc2c   :  { %2474 = vrot.lane.b32.xlu0 %v2469_v56, %s5204_s29  ;;  %v2555_v4 = vpack.c.bf16 %v2551_v11, %v2551_v11  ;;  %v4937_v56 = vld [vmem:[#allocation9 + $0x58] sm:$0xff]  ;;  %v4928_v11 = vld [vmem:[#allocation9 + $0x10] sm:$0xff] }
 0xc2f   :  { %3546 = vmatpush.bf16.msra.mxu0 %v4928_v11 }
 0xc33   :  { %3547 = vmatpush.bf16.msra.mxu0 %v4927_v12 }
 0xc34   :  { %2558 = vrot.lane.b32.xlu0 %v2554_v10, %s5216_s4  ;;  %v4955_v10 = vld [vmem:[#allocation9 + $0xe8] sm:$0xff] }
 0xc37   :  { %3548 = vmatpush.bf16.msra.mxu0 %v4926_v18 }
 0xc3b   :  { %3597 = vmatpush.bf16.msrb.mxu0 %v4965_v7 }
 0xc3c   :  { %2560 = vrot.lane.b32.xlu0 %v2555_v4, %s5216_s4  ;;  %v4936_v4 = vld [vmem:[#allocation9 + $0x50] sm:$0xff] }
 0xc3f   :  { %3598 = vmatpush.bf16.msrb.mxu0 %v4964_v30 }
 0xc41   :  { %v3010_v19 = vpop.f32.mrf.mxu2 }
 0xc42   :  { %v3011_v48 = vadd.f32 %v3010_v19, %v2757_v38 }
 0xc43   :  { %v3038_v36 = vpop.f32.mrf.mxu0  ;;  %3599 = vmatpush.bf16.msrb.mxu0 %v4963_v34 }
 0xc44   :  { %v3025_v0 = vadd.f32 %v3024_v25, %v3011_v48 }
 0xc46   :  { %v3039_v6 = vadd.f32 %v3038_v36, %v3025_v0 }
 0xc47   :  { %3600 = vmatpush.bf16.msrb.mxu0 %v4962_v15 }
 0xc49   :  { %v3012_v29 = vpop.f32.mrf.mxu2 }
 0xc4b   :  { %3601 = vmatpush.bf16.msrb.mxu0 %v4961_v52 }
 0xc4d   :  { %v2387_v5 = vpop.permute.xlu0 %2386 }
 0xc4e   :  { %2392 = vst.msk [vmem:[#allocation2] sm:$0xf] %vm636_vm14, %v2387_v5  ;;  %v4946_v5 = vld [vmem:[#allocation9 + $0xa0] sm:$0xff] }
 0xc4f   :  { %3572 = vmatpush.bf16.msrb.mxu2 %v4946_v5  ;;  %3602 = vmatpush.bf16.msrb.mxu0 %v4960_v2  ;;  %v4966_v5 = vld [vmem:[#allocation9 + $0x140] sm:$0xff] }
 0xc53   :  { %3573 = vmatpush.bf16.msrb.mxu2 %v4945_v14  ;;  %3603 = vmatpush.bf16.msrb.mxu0 %v4959_v1  ;;  %v3082_v14 = vpop.f32.mrf.mxu3 }
 0xc55   :  { %v2389_v32 = vpop.permute.xlu0 %2388 }
 0xc56   :  { %2393 = vst.msk [vmem:[#allocation2 + $0x4] sm:$0xf] %vm636_vm14, %v2389_v32  ;;  %v4954_v32 = vld [vmem:[#allocation9 + $0xe0] sm:$0xff] }
 0xc57   :  { %3574 = vmatpush.bf16.msrb.mxu2 %v4944_v17 }
 0xc5b   :  { %3575 = vmatpush.bf16.msrb.mxu2 %v4943_v22 }
 0xc5f   :  { %3576 = vmatpush.bf16.msrb.mxu2 %v4942_v28 }
 0xc7e   :  { %v2473_v35 = vpop.permute.xlu2 %2472 }
 0xc7f   :  { %2478 = vst.msk [vmem:[#allocation2] sm:$0xf] %vm723_vm15, %v2473_v35  ;;  %v4934_v35 = vld [vmem:[#allocation9 + $0x40] sm:$0xff] }
 0xc9e   :  { %v2475_v47 = vpop.permute.xlu0 %2474 }
 0xc9f   :  { %2479 = vst.msk [vmem:[#allocation2 + $0x4] sm:$0xf] %vm723_vm15, %v2475_v47  ;;  %v3013_v47 = vadd.f32 %v3012_v29, %v2757_v38 }
 0xca6   :  { %v2559_v54 = vpop.permute.xlu0 %2558 }
 0xca7   :  { %2564 = vst.msk [vmem:[#allocation2] sm:$0xf] %vm810_vm0, %v2559_v54  ;;  %v3027_v54 = vadd.f32 %v3026_v46, %v3013_v47 }
 0xcae   :  { %v2561_v58 = vpop.permute.xlu0 %2560 }
 0xcaf   :  { %2565 = vst.msk [vmem:[#allocation2 + $0x4] sm:$0xf] %vm810_vm0, %v2561_v58  ;;  %v3066_v58 = vpop.f32.mrf.mxu2 }
 0xcb6   :  { %v4869_v59 = vld [vmem:[#allocation2] sm:$0xff] }
 0xcb7   :  { %2650 = vmatmul.bf16.vlgmr.msrb.gmra.mxu1 %v4869_v59 }
 0xcb8   :  { %3555 = vmatpush.bf16.msrb.mxu1 %v4941_v39 }
 0xcbc   :  { %3556 = vmatpush.bf16.msrb.mxu1 %v4940_v61  ;;  %v4968_v61 = vld [vmem:[#allocation9 + $0x150] sm:$0xff] }
 0xcc0   :  { %3557 = vmatpush.bf16.msrb.mxu1 %v4939_v51  ;;  %v3040_v51 = vpop.f32.mrf.mxu0 }
 0xcc1   :  { %v3041_v3 = vadd.f32 %v3040_v51, %v3027_v54 }
 0xcc3   :  { %v3087_v57 = vmax.f32 %v3041_v3, 0.0 }
 0xcc4   :  { %3558 = vmatpush.bf16.msrb.mxu1 %v4938_v9 }
 0xcc5   :  { %v3091_v12 = vmul.f32 %v3087_v57, %v5469_v42 }
 0xcc7   :  { %3051 = vmatmul.bf16.vlgmr.msra.gmra.mxu1 %v5559_v21  ;;  %v4956_v21 = vld [vmem:[#allocation9 + $0xf0] sm:$0xff]  ;;  %v3095_v17 = vrot.slane %v3091_v12, 7 }
 0xcc8   :  { %3584 = vmatpush.bf16.msra.mxu3 %v4956_v21  ;;  %3559 = vmatpush.bf16.msrb.mxu1 %v4937_v56  ;;  %v4967_v21 = vld [vmem:[#allocation9 + $0x148] sm:$0xff] }
 0xccc   :  { %3585 = vmatpush.bf16.msra.mxu3 %v4955_v10  ;;  %3560 = vmatpush.bf16.msrb.mxu1 %v4936_v4  ;;  %v3085_v10 = vmax.f32 %v3039_v6, 0.0  ;;  %v4958_v4 = vld [vmem:[#allocation9 + $0x100] sm:$0xff] }
 0xccd   :  { %3604 = vmatpush.bf16.msrb.mxu0 %v4958_v4 }
 0xcce   :  { %v3089_v18 = vmul.f32 %v3085_v10, %v5481_v53 }
 0xcd0   :  { %3586 = vmatpush.bf16.msra.mxu3 %v4954_v32  ;;  %3561 = vmatpush.bf16.msrb.mxu1 %v4935_v13  ;;  %v3068_v32 = vpop.f32.mrf.mxu2  ;;  %v3093_v7 = vrot.slane %v3089_v18, 7  ;;  %v3105_v2 = vrot.slane %v3089_v18, 1 }
 0xcd2   :  { %v3099_v25 = vsel %vm920_vm9, %v3095_v17, %v3093_v7 }
 0xcd3   :  { %v3101_v29 = vmul.f32 %v5346_v49, %v3099_v25 }
 0xcd4   :  { %3587 = vmatpush.bf16.msra.mxu3 %v4953_v16  ;;  %3562 = vmatpush.bf16.msrb.mxu1 %v4934_v35 }
 0xcd8   :  { %3588 = vmatpush.bf16.msra.mxu3 %v4952_v23  ;;  %3611 = vmatpush.bf16.msra.mxu1 %v4973_v8 }
 0xcdc   :  { %3589 = vmatpush.bf16.msra.mxu3 %v4951_v27  ;;  %3612 = vmatpush.bf16.msra.mxu1 %v4972_v37  ;;  %v3097_v37 = vsel %vm920_vm9, %v3093_v7, %v3095_v17 }
 0xce0   :  { %3590 = vmatpush.bf16.msra.mxu3 %v4950_v31  ;;  %3613 = vmatpush.bf16.msra.mxu1 %v4971_v24 }
 0xce4   :  { %3614 = vmatpush.bf16.msra.mxu1 %v4970_v40 }
 0xce8   :  { %3615 = vmatpush.bf16.msra.mxu1 %v4969_v33 }
 0xcec   :  { %3616 = vmatpush.bf16.msra.mxu1 %v4968_v61 }
 0xcf0   :  { %3617 = vmatpush.bf16.msra.mxu1 %v4967_v21 }
 0xcf4   :  { %3618 = vmatpush.bf16.msra.mxu1 %v4966_v5 }
 0xd34   :  { %v5650_v62 = vpop.f32.mrf.mxu1 }
 0xd3c   :  { %v5655_v63 = vpop.f32.mrf.mxu1 }
 0xd44   :  { %v3052_v59 = vpop.f32.mrf.mxu1 }
 0xd45   :  { %v3053_v39 = vadd.f32 %v3052_v59, %v2758_v41 }
 0xd47   :  { %v3067_v20 = vadd.f32 %v3066_v58, %v3053_v39  ;;  %v3107_v58 = vrot.slane %v3091_v12, 1 }
 0xd49   :  { %v3081_v9 = vadd.f32 %v3080_v55, %v3067_v20  ;;  %v3109_v6 = vsel %vm927_vm10, %v3105_v2, %v3107_v58 }
 0xd4b   :  { %v3086_v56 = vmax.f32 %v3081_v9, 0.0 }
 0xd4c   :  { %v3054_v60 = vpop.f32.mrf.mxu1 }
 0xd4d   :  { %v3055_v11 = vadd.f32 %v3054_v60, %v2758_v41  ;;  %v3090_v16 = vmul.f32 %v3086_v56, %v5481_v53 }
 0xd4f   :  { %v3069_v13 = vadd.f32 %v3068_v32, %v3055_v11  ;;  %v3119_v23 = vpack.c.bf16 %v3090_v16, %v3089_v18  ;;  %v3094_v22 = vrot.slane %v3090_v16, 7  ;;  %v3106_v59 = vrot.slane %v3090_v16, 1  ;;  %v5074_v18 = vld [vmem:[%s5707_s3 + $0x8] sm:$0x3f]  ;;  %s5218_s3 = smov [#allocation11]  }
 0xd50   :  { %v2652_v16 = vadd.f32 %v4997_v44, %v5650_v62  ;;  %s3639_s7 = sshll.u32 %s5218_s3, 4  ;;  %s3640_s7 = int_to_ptr.vmem [resolvable:$true] %s3639_s7 }
 0xd51   :  { %v3083_v35 = vadd.f32 %v3082_v14, %v3069_v13  ;;  %v3135_v28 = vunpack.c.l.b16 %v3119_v23  ;;  %v3136_v31 = vunpack.c.h.b16 %v3119_v23 }
 0xd53   :  { %v3088_v19 = vmax.f32 %v3083_v35, 0.0  ;;  %v2656_v35 = vperm.slane %v5074_v18, 2 }
 0xd55   :  { %v3092_v8 = vmul.f32 %v3088_v19, %v5469_v42  ;;  %v2657_v7 = vmul.f32 %v2656_v35, %v2652_v16 }
 0xd57   :  { %v3096_v27 = vrot.slane %v3092_v8, 7  ;;  %v3120_v30 = vpack.c.bf16 %v3092_v8, %v3091_v12  ;;  %v3108_v48 = vrot.slane %v3092_v8, 1 }
 0xd59   :  { %v3137_v34 = vunpack.c.l.b16 %v3120_v30  ;;  %v3138_v24 = vunpack.c.h.b16 %v3120_v30  ;;  %v3098_v45 = vsel %vm920_vm9, %v3094_v22, %v3096_v27  ;;  %v3100_v36 = vsel %vm920_vm9, %v3096_v27, %v3094_v22 }
 0xd5a   :  { %v3102_v38 = vmul.f32 %v5346_v49, %v3100_v36  ;;  %v3118_v15 = vpack.c.bf16 %v3098_v45, %v3097_v37  ;;  %v3112_v61 = vsel %vm927_vm10, %v3108_v48, %v3106_v59  ;;  %v3111_v49 = vsel %vm927_vm10, %v3107_v58, %v3105_v2 }
 0xd5b   :  { %v3139_v40 = vpack.c.b16 %v3137_v34, %v3135_v28  ;;  %v3140_v46 = vpack.c.b16 %v3138_v24, %v3136_v31  ;;  %v3116_v55 = vmul.f32 %v5356_v26, %v3112_v61  ;;  %v3115_v51 = vmul.f32 %v5356_v26, %v3111_v49  ;;  %v4998_v26 = vld [vmem:[%s5715_s11] ss:$0 sm:$0xff] }
 0xd5c   :  { %v3117_v47 = vpack.c.bf16 %v3102_v38, %v3101_v29  ;;  %v3127_v52 = vunpack.c.l.b16 %v3118_v15  ;;  %v3128_v54 = vunpack.c.h.b16 %v3118_v15  ;;  %v3110_v3 = vsel %vm927_vm10, %v3106_v59, %v3108_v48 }
 0xd5d   :  { %3577 = vmatmul.bf16.vlgmr.msrb.gmra.mxu2 %v3139_v40  ;;  %3591 = vmatmul.bf16.vlgmr.msra.gmra.mxu3 %v3140_v46  ;;  %v3122_v20 = vpack.c.bf16 %v3116_v55, %v3115_v51  ;;  %v3121_v9 = vpack.c.bf16 %v3110_v3, %v3109_v6  ;;  %v2659_v37 = vmul.f32 %v2657_v7, %v5481_v53  ;;  %v3627_v24 = vperm.slane %v5074_v18, 5 }
 0xd5e   :  { %v3125_v41 = vunpack.c.l.b16 %v3117_v47  ;;  %v3126_v33 = vunpack.c.h.b16 %v3117_v47  ;;  %v2654_v31 = vadd.f32 %v4997_v44, %v5655_v63 }
 0xd5f   :  { %v3147_v1 = vunpack.c.l.b16 %v3122_v20  ;;  %v3148_v21 = vunpack.c.h.b16 %v3122_v20  ;;  %v3145_v57 = vunpack.c.l.b16 %v3121_v9  ;;  %v3146_v56 = vunpack.c.h.b16 %v3121_v9 }
 0xd60   :  { %v3129_v0 = vpack.c.b16 %v3127_v52, %v3125_v41  ;;  %v3130_v39 = vpack.c.b16 %v3128_v54, %v3126_v33  ;;  %v2661_v29 = vadd.f32 %v2659_v37, %v5484_v50  ;;  %v2658_v38 = vmul.f32 %v2656_v35, %v2654_v31 }
 0xd61   :  { %v3149_v60 = vpack.c.b16 %v3147_v1, %v3145_v57  ;;  %v3150_v10 = vpack.c.b16 %v3148_v21, %v3146_v56 }
 0xd62   :  { %3549 = vmatmul.bf16.vlgmr.msra.gmra.mxu0 %v3129_v0  ;;  %3563 = vmatmul.bf16.vlgmr.msrb.gmra.mxu1 %v3130_v39  ;;  %v2660_v52 = vmul.f32 %v2658_v38, %v5469_v42 }
 0xd72   :  { %3605 = vmatmul.bf16.vlgmr.msrb.gmra.mxu0 %v3149_v60  ;;  %3619 = vmatmul.bf16.vlgmr.msra.gmra.mxu1 %v3150_v10 }
 0xddf   :  { %v3550_v11 = vpop.f32.mrf.mxu0  ;;  %v3564_v4 = vpop.f32.mrf.mxu1 }
 0xde0   :  { %v3551_v5 = vadd.f32 %v4998_v26, %v3550_v11  ;;  %v3578_v12 = vpop.f32.mrf.mxu2  ;;  %v3592_v23 = vpop.f32.mrf.mxu3 }
 0xde2   :  { %v3565_v32 = vadd.f32 %v3564_v4, %v3551_v5 }
 0xde4   :  { %v3579_v17 = vadd.f32 %v3578_v12, %v3565_v32 }
 0xde6   :  { %v3593_v8 = vadd.f32 %v3592_v23, %v3579_v17 }
 0xde7   :  { %v3552_v13 = vpop.f32.mrf.mxu0  ;;  %v3566_v14 = vpop.f32.mrf.mxu1 }
 0xde8   :  { %v3553_v19 = vadd.f32 %v4998_v26, %v3552_v13  ;;  %v3580_v28 = vpop.f32.mrf.mxu2  ;;  %v3594_v36 = vpop.f32.mrf.mxu3 }
 0xdea   :  { %v3567_v25 = vadd.f32 %v3566_v14, %v3553_v19 }
 0xdec   :  { %v3581_v62 = vadd.f32 %v3580_v28, %v3567_v25 }
 0xdee   :  { %v3595_v15 = vadd.f32 %v3594_v36, %v3581_v62 }
 0xdef   :  { %v3606_v22 = vpop.f32.mrf.mxu0  ;;  %v3620_v27 = vpop.f32.mrf.mxu1 }
 0xdf0   :  { %v3607_v30 = vadd.f32 %v3606_v22, %v3593_v8 }
 0xdf2   :  { %v3621_v34 = vadd.f32 %v3620_v27, %v3607_v30 }
 0xdf4   :  { %v3625_v45 = vmul.f32 %v3621_v34, %v5481_v53  ;;  %v2662_v53 = vadd.f32 %v2660_v52, %v5472_v43 }
 0xdf6   :  { %v3628_v40 = vmul.f32 %v3627_v24, %v3625_v45 }
 0xdf7   :  { %v3608_v46 = vpop.f32.mrf.mxu0  ;;  %v3622_v41 = vpop.f32.mrf.mxu1 }
 0xdf8   :  { %v3630_v47 = vadd.f32 %v3628_v40, %v2661_v29  ;;  %v3609_v48 = vadd.f32 %v3608_v46, %v3595_v15 }
 0xdfa   :  { %3633 = vst [vmem:[#allocation11 + $0x10] sm:$0xff] %v3630_v47  ;;  %v3623_v33 = vadd.f32 %v3622_v41, %v3609_v48 }
 0xdfc   :  { %v3626_v63 = vmul.f32 %v3623_v33, %v5469_v42 }
 0xdfe   :  { %v3629_v50 = vmul.f32 %v3627_v24, %v3626_v63 }
 0xe00   :  { %v3631_v54 = vadd.f32 %v3629_v50, %v2662_v53 }
 0xe02   :  { %3634 = vst [vmem:[#allocation11 + $0x18] sm:$0xff] %v3631_v54 }
 0xe03   :  { %3647 = dma.vmem_to_hbm [thread:$0]  %s3640_s7, 512, %s3642_s27, [#allocation5], %s5210_s23, %s5210_s23, %s5211_s24  }
 0xe04   :  { %5201 = dma.done.wait [#allocation5], 512  }
 0xe05   :  { %5202 = vsyncadd [#allocation5], 4294966784 }
 0xe06   :  { %3652 = vsyncpa [#allocation4], 1 }
 0xe07   :  { %3653 = vsyncpa [#allocation7], 1 }
 0xe08   :  { %3654 = vsyncpa [#allocation10], 1 }
 0xe09   :  { %3655 = vsyncpa [#allocation5], 1 }

</bundles_post_ra>
